<compile_context>
chip_gen: v7x
topology: tpu7x:2x2x1
jax: 0.10.0
libtpu: 0.0.40
codegen_flags: <defaults>
</compile_context>

<pallas_src>
import functools

import jax
import jax.numpy as jnp
import numpy as np
from jax import lax
from jax.experimental import pallas as pl
from jax.experimental.pallas import tpu as pltpu

LANE = 128
SUBLANE = 8


def _round_up(x, m):
    return ((x + m - 1) // m) * m


# ----------------------------------------------------------------------------
# Fused kernel: all GRU layers + classification head in one pallas_call.
# Gate order follows PyTorch: (r, z, n), each gate padded to Hp lanes.
# ----------------------------------------------------------------------------
def make_fused_rnn_kernel(num_layers, S, Bp, Hp):
    Hp3 = 3 * Hp

    def kernel(*refs):
        # --- unpack refs (layout fixed by the wrapper) ---
        x_ref = refs[0]                              # (S, Bp, Ip)
        idx = 1
        layer_refs = []
        for _ in range(num_layers):
            layer_refs.append(refs[idx:idx + 4])     # (wih, whh, bih, bhh_n)
            idx += 4
        w1_ref, b1_ref, w2_ref, b2_ref = refs[idx:idx + 4]
        idx += 4
        out_ref = refs[idx]                          # (Bp, Cp)
        seq_buf = refs[idx + 1]                      # VMEM (S, Bp, Hp)
        gi_buf = refs[idx + 2]                       # VMEM (S, Bp, 3*Hp)

        h_last = None
        for l in range(num_layers):
            wih_ref, whh_ref, bih_ref, bhhn_ref = layer_refs[l]

            if l == 0:
                inp = x_ref[...]                              # (S, Bp, Ip)
            else:
                inp = seq_buf[...]                            # (S, Bp, Hp)
            in_dim = inp.shape[-1]

            # Hoisted input projection for the WHOLE sequence: one MXU matmul,
            # off the serial critical path.  bih already contains b_ih + the
            # r/z parts of b_hh (folded at pack time).
            gi_all = (jnp.dot(inp.reshape(S * Bp, in_dim), wih_ref[...],
                              preferred_element_type=jnp.float32)
                      + bih_ref[...])                         # (S*Bp, 3Hp)
            gi_buf[...] = gi_all.reshape(S, Bp, Hp3)

            whh = whh_ref[...]                                # (Hp, 3Hp)
            # Hoist the broadcast of the n-gate recurrent bias out of the loop
            # (JAX does not CSE broadcast_in_dim inside loops).
            bhh_n = jnp.broadcast_to(bhhn_ref[...], (Bp, Hp)) # (Bp, Hp)
            write_seq = (l < num_layers - 1)

            def step(t, h_prev, _write=write_seq):
                gi = gi_buf[t]                                # (Bp, 3Hp)
                gh = jnp.dot(h_prev, whh,
                             preferred_element_type=jnp.float32)
                # gate slices fall on 128-lane vreg boundaries
                r = jax.nn.sigmoid(gi[:, 0:Hp] + gh[:, 0:Hp])
                z = jax.nn.sigmoid(gi[:, Hp:2 * Hp] + gh[:, Hp:2 * Hp])
                n = jnp.tanh(gi[:, 2 * Hp:3 * Hp]
                             + r * (gh[:, 2 * Hp:3 * Hp] + bhh_n))
                h_new = (1.0 - z) * n + z * h_prev
                if _write:
                    seq_buf[t] = h_new
                return h_new

            h0 = jnp.zeros((Bp, Hp), jnp.float32)
            # Short, fixed trip count -> unroll for LLO scheduler visibility.
            h_last = lax.fori_loop(0, S, step, h0, unroll=True)

        # ----- classification head: fc1 -> sigmoid -> fc2 -----
        z1 = (jnp.dot(h_last, w1_ref[...],
                      preferred_element_type=jnp.float32) + b1_ref[...])
        a1 = jax.nn.sigmoid(z1)
        logits = (jnp.dot(a1, w2_ref[...],
                          preferred_element_type=jnp.float32) + b2_ref[...])
        out_ref[...] = logits.astype(out_ref.dtype)

    return kernel


def rnn_forward_pallas(packed, x, *, input_size, hidden_size, num_layers,
                       n_classes):
    """x: (seq_len, batch, input_size) -> logits (batch, n_classes)."""
    S, B, I = x.shape
    H = hidden_size
    Hp = _round_up(H, LANE)
    Ip = _round_up(input_size, LANE)
    Cp = _round_up(n_classes, LANE)
    Bp = _round_up(max(B, SUBLANE), SUBLANE)

    # Zero-pad x to (S, Bp, Ip): padded rows/cols are mathematically inert.
    x_pad = jnp.zeros((S, Bp, Ip), jnp.float32).at[:, :B, :I].set(
        x.astype(jnp.float32))

    args = [x_pad]
    for layer_w in packed["gru"]:
        args.extend(layer_w)
    args.extend(packed["head"])

    kernel = make_fused_rnn_kernel(num_layers, S, Bp, Hp)

    out = pl.pallas_call(
        kernel,
        out_shape=jax.ShapeDtypeStruct((Bp, Cp), jnp.float32),
        in_specs=[pl.BlockSpec(memory_space=pltpu.MemorySpace.VMEM)] * len(args),
        out_specs=pl.BlockSpec(memory_space=pltpu.MemorySpace.VMEM),
        scratch_shapes=[
            pltpu.VMEM((S, Bp, Hp), jnp.float32),       # layer output sequence
            pltpu.VMEM((S, Bp, 3 * Hp), jnp.float32),   # hoisted input proj.
        ],
    )(*args)

    return out[:B, :n_classes]


# ----------------------------------------------------------------------------
# Parameter construction (PyTorch-shaped, pre-transposed) and lane-padded
# packing for the kernel.
# ----------------------------------------------------------------------------
def init_params(key, input_size, hidden_size, num_layers, n_classes):
    params = {"gru": []}
    bound = 1.0 / np.sqrt(hidden_size)
    for layer in range(num_layers):
        in_sz = input_size if layer == 0 else hidden_size
        key, k1, k2, k3, k4 = jax.random.split(key, 5)
        # Stored transposed: (in, 3H) / (H, 3H); biases (1, 3H). Gates (r|z|n).
        w_ih_t = jax.random.uniform(k1, (in_sz, 3 * hidden_size), jnp.float32,
                                    -bound, bound)
        w_hh_t = jax.random.uniform(k2, (hidden_size, 3 * hidden_size),
                                    jnp.float32, -bound, bound)
        b_ih = jax.random.uniform(k3, (1, 3 * hidden_size), jnp.float32,
                                  -bound, bound)
        b_hh = jax.random.uniform(k4, (1, 3 * hidden_size), jnp.float32,
                                  -bound, bound)
        params["gru"].append((w_ih_t, w_hh_t, b_ih, b_hh))

    h2 = hidden_size // 2
    key, k1, k2, k3, k4 = jax.random.split(key, 5)
    b1_bound = 1.0 / np.sqrt(hidden_size)
    b2_bound = 1.0 / np.sqrt(h2)
    params["fc1_w_t"] = jax.random.uniform(k1, (hidden_size, h2), jnp.float32,
                                           -b1_bound, b1_bound)
    params["fc1_b"] = jax.random.uniform(k2, (1, h2), jnp.float32,
                                         -b1_bound, b1_bound)
    params["fc2_w_t"] = jax.random.uniform(k3, (h2, n_classes), jnp.float32,
                                           -b2_bound, b2_bound)
    params["fc2_b"] = jax.random.uniform(k4, (1, n_classes), jnp.float32,
                                         -b2_bound, b2_bound)
    return params


def pack_params(params, input_size, hidden_size, num_layers, n_classes):
    """Zero-pad every feature dim to 128 lanes, per gate, kernel layout.

    b_hh for the r/z gates is folded into the hoisted bias (bih); only the
    n-gate recurrent bias is kept separate (it sits inside the r * (...) term).
    """
    H = hidden_size
    Hp = _round_up(H, LANE)
    Ip = _round_up(input_size, LANE)
    H2 = H // 2
    H2p = _round_up(H2, LANE)
    Cp = _round_up(n_classes, LANE)

    packed = {"gru": []}
    for l, (w_ih_t, w_hh_t, b_ih, b_hh) in enumerate(params["gru"]):
        in_dim = input_size if l == 0 else H
        in_pad = Ip if l == 0 else Hp
        wih = np.zeros((in_pad, 3 * Hp), np.float32)
        whh = np.zeros((Hp, 3 * Hp), np.float32)
        bih = np.zeros((1, 3 * Hp), np.float32)
        bhh_n = np.zeros((1, Hp), np.float32)
        wih_np, whh_np = np.asarray(w_ih_t), np.asarray(w_hh_t)
        bih_np, bhh_np = np.asarray(b_ih), np.asarray(b_hh)
        for g in range(3):  # each gate gets its own 128-lane-aligned slot
            wih[:in_dim, g * Hp:g * Hp + H] = wih_np[:, g * H:(g + 1) * H]
            whh[:H, g * Hp:g * Hp + H] = whh_np[:, g * H:(g + 1) * H]
            bih[:, g * Hp:g * Hp + H] = bih_np[:, g * H:(g + 1) * H]
            if g < 2:   # fold r/z recurrent bias into the hoisted bias
                bih[:, g * Hp:g * Hp + H] += bhh_np[:, g * H:(g + 1) * H]
        bhh_n[:, :H] = bhh_np[:, 2 * H:3 * H]
        packed["gru"].append((jnp.asarray(wih), jnp.asarray(whh),
                              jnp.asarray(bih), jnp.asarray(bhh_n)))

    w1 = np.zeros((Hp, H2p), np.float32)
    w1[:H, :H2] = np.asarray(params["fc1_w_t"])
    b1 = np.zeros((1, H2p), np.float32)
    b1[:, :H2] = np.asarray(params["fc1_b"])
    w2 = np.zeros((H2p, Cp), np.float32)
    w2[:H2, :n_classes] = np.asarray(params["fc2_w_t"])
    b2 = np.zeros((1, Cp), np.float32)
    b2[:, :n_classes] = np.asarray(params["fc2_b"])
    packed["head"] = (jnp.asarray(w1), jnp.asarray(b1),
                      jnp.asarray(w2), jnp.asarray(b2))
    return packed


# ----------------------------------------------------------------------------
# Pure-JAX reference (unpadded), for correctness check.
# ----------------------------------------------------------------------------
def rnn_forward_ref(params, x):
    layer_in = x
    h_last = None
    for (w_ih_t, w_hh_t, b_ih, b_hh) in params["gru"]:
        B = x.shape[1]
        H = w_hh_t.shape[0]
        h = jnp.zeros((B, H), jnp.float32)
        outs = []
        for t in range(layer_in.shape[0]):
            gi = layer_in[t] @ w_ih_t + b_ih
            gh = h @ w_hh_t + b_hh
            r = jax.nn.sigmoid(gi[:, 0:H] + gh[:, 0:H])
            z = jax.nn.sigmoid(gi[:, H:2 * H] + gh[:, H:2 * H])
            n = jnp.tanh(gi[:, 2 * H:] + r * gh[:, 2 * H:])
            h = (1.0 - z) * n + z * h
            outs.append(h)
        layer_in = jnp.stack(outs, axis=0)
        h_last = h
    a = jax.nn.sigmoid(h_last @ params["fc1_w_t"] + params["fc1_b"])
    return a @ params["fc2_w_t"] + params["fc2_b"]


if __name__ == "__main__":
    # Small shapes consistent with the module's forward: x is (seq, batch, in).
    seq_len, batch, input_size = 8, 4, 16
    hidden_size, num_layers, n_classes = 32, 2, 4

    key = jax.random.PRNGKey(0)
    kp, kx = jax.random.split(key)
    params = init_params(kp, input_size, hidden_size, num_layers, n_classes)
    packed = pack_params(params, input_size, hidden_size, num_layers, n_classes)
    x = jax.random.normal(kx, (seq_len, batch, input_size), jnp.float32)

    fwd = jax.jit(functools.partial(
        rnn_forward_pallas,
        input_size=input_size, hidden_size=hidden_size,
        num_layers=num_layers, n_classes=n_classes))

    out = fwd(packed, x)
    out = jax.block_until_ready(out)

    ref = rnn_forward_ref(params, x)
    np.testing.assert_allclose(np.asarray(out), np.asarray(ref),
                               atol=1e-4, rtol=1e-4)

    assert out.shape == (batch, n_classes)
    print("KERNEL_OK")
</pallas_src>

<mosaic_0001>
module attributes {stable_mosaic.version = 11 : i64} {
  func.func @kernel(%arg0: memref<8x8x128xf32, #tpu.memory_space<vmem>>, %arg1: memref<128x384xf32, #tpu.memory_space<vmem>>, %arg2: memref<128x384xf32, #tpu.memory_space<vmem>>, %arg3: memref<1x384xf32, #tpu.memory_space<vmem>>, %arg4: memref<1x128xf32, #tpu.memory_space<vmem>>, %arg5: memref<128x384xf32, #tpu.memory_space<vmem>>, %arg6: memref<128x384xf32, #tpu.memory_space<vmem>>, %arg7: memref<1x384xf32, #tpu.memory_space<vmem>>, %arg8: memref<1x128xf32, #tpu.memory_space<vmem>>, %arg9: memref<128x128xf32, #tpu.memory_space<vmem>>, %arg10: memref<1x128xf32, #tpu.memory_space<vmem>>, %arg11: memref<128x128xf32, #tpu.memory_space<vmem>>, %arg12: memref<1x128xf32, #tpu.memory_space<vmem>>, %arg13: memref<8x128xf32, #tpu.memory_space<vmem>>, %arg14: memref<8x8x128xf32, #tpu.memory_space<vmem>>, %arg15: memref<8x8x384xf32, #tpu.memory_space<vmem>>) attributes {dimension_semantics = [], scalar_prefetch = 0 : i64, scratch_operands = 2 : i64, tpu.core_type = #tpu.core_type<tc>} {
    %c0 = arith.constant 0 : index
    %c0_0 = arith.constant 0 : index
    %c0_1 = arith.constant 0 : index
    %0 = vector.load %arg0[%c0, %c0_0, %c0_1] : memref<8x8x128xf32, #tpu.memory_space<vmem>>, vector<8x8x128xf32>
    %1 = vector.shape_cast %0 : vector<8x8x128xf32> to vector<64x128xf32>
    %c0_2 = arith.constant 0 : index
    %c0_3 = arith.constant 0 : index
    %2 = vector.load %arg1[%c0_2, %c0_3] : memref<128x384xf32, #tpu.memory_space<vmem>>, vector<128x384xf32>
    %cst = arith.constant dense<0.000000e+00> : vector<64x384xf32>
    %3 = tpu.matmul %1, %2, %cst {dimension_numbers = #tpu.dot_dimension_numbers<[1], [0], [0], [1], [0, 0, 1, 1], [], []>} : vector<64x128xf32>, vector<128x384xf32>, vector<64x384xf32> -> vector<64x384xf32>
    %c0_4 = arith.constant 0 : index
    %c0_5 = arith.constant 0 : index
    %4 = vector.load %arg3[%c0_4, %c0_5] : memref<1x384xf32, #tpu.memory_space<vmem>>, vector<1x384xf32>
    %5 = vector.broadcast %4 : vector<1x384xf32> to vector<64x384xf32>
    %6 = arith.addf %3, %5 : vector<64x384xf32>
    %7 = vector.shape_cast %6 : vector<64x384xf32> to vector<8x8x384xf32>
    %c0_6 = arith.constant 0 : index
    %c0_7 = arith.constant 0 : index
    %c0_8 = arith.constant 0 : index
    %8 = vector.load %arg15[%c0_6, %c0_7, %c0_8] : memref<8x8x384xf32, #tpu.memory_space<vmem>>, vector<8x8x384xf32>
    tpu.vector_store %arg15[%c0_6, %c0_7, %c0_8], %7 {strides = array<i32>} : memref<8x8x384xf32, #tpu.memory_space<vmem>>, vector<8x8x384xf32>,
    %c0_9 = arith.constant 0 : index
    %c0_10 = arith.constant 0 : index
    %9 = vector.load %arg2[%c0_9, %c0_10] : memref<128x384xf32, #tpu.memory_space<vmem>>, vector<128x384xf32>
    %c0_11 = arith.constant 0 : index
    %c0_12 = arith.constant 0 : index
    %10 = vector.load %arg4[%c0_11, %c0_12] : memref<1x128xf32, #tpu.memory_space<vmem>>, vector<1x128xf32>
    %11 = vector.shape_cast %10 : vector<1x128xf32> to vector<1x128xf32>
    %12 = vector.broadcast %11 : vector<1x128xf32> to vector<8x128xf32>
    %cst_13 = arith.constant 0.000000e+00 : f32
    %13 = vector.broadcast %cst_13 : f32 to vector<8x128xf32>
    %c0_i32 = arith.constant 0 : i32
    %14 = arith.index_cast %c0_i32 : i32 to index
    %c0_14 = arith.constant 0 : index
    %c0_15 = arith.constant 0 : index
    %15 = vector.load %arg15[%14, %c0_14, %c0_15] : memref<8x8x384xf32, #tpu.memory_space<vmem>>, vector<1x8x384xf32>
    %16 = vector.shape_cast %15 : vector<1x8x384xf32> to vector<8x384xf32>
    %cst_16 = arith.constant dense<0.000000e+00> : vector<8x384xf32>
    %17 = tpu.matmul %13, %9, %cst_16 {dimension_numbers = #tpu.dot_dimension_numbers<[1], [0], [0], [1], [0, 0, 1, 1], [], []>} : vector<8x128xf32>, vector<128x384xf32>, vector<8x384xf32> -> vector<8x384xf32>
    %18 = vector.extract_strided_slice %16 {offsets = [0, 0], sizes = [8, 128], strides = [1, 1]} : vector<8x384xf32> to vector<8x128xf32>
    %19 = vector.extract_strided_slice %17 {offsets = [0, 0], sizes = [8, 128], strides = [1, 1]} : vector<8x384xf32> to vector<8x128xf32>
    %20 = arith.addf %18, %19 : vector<8x128xf32>
    %21 = arith.negf %20 : vector<8x128xf32>
    %22 = math.exp %21 : vector<8x128xf32>
    %cst_17 = arith.constant 1.000000e+00 : f32
    %23 = vector.broadcast %cst_17 : f32 to vector<8x128xf32>
    %24 = arith.addf %23, %22 : vector<8x128xf32>
    %25 = arith.divf %23, %24 : vector<8x128xf32>
    %26 = vector.extract_strided_slice %16 {offsets = [0, 128], sizes = [8, 128], strides = [1, 1]} : vector<8x384xf32> to vector<8x128xf32>
    %27 = vector.extract_strided_slice %17 {offsets = [0, 128], sizes = [8, 128], strides = [1, 1]} : vector<8x384xf32> to vector<8x128xf32>
    %28 = arith.addf %26, %27 : vector<8x128xf32>
    %29 = arith.negf %28 : vector<8x128xf32>
    %30 = math.exp %29 : vector<8x128xf32>
    %cst_18 = arith.constant 1.000000e+00 : f32
    %31 = vector.broadcast %cst_18 : f32 to vector<8x128xf32>
    %32 = arith.addf %31, %30 : vector<8x128xf32>
    %33 = arith.divf %31, %32 : vector<8x128xf32>
    %34 = vector.extract_strided_slice %16 {offsets = [0, 256], sizes = [8, 128], strides = [1, 1]} : vector<8x384xf32> to vector<8x128xf32>
    %35 = vector.extract_strided_slice %17 {offsets = [0, 256], sizes = [8, 128], strides = [1, 1]} : vector<8x384xf32> to vector<8x128xf32>
    %36 = arith.addf %35, %12 : vector<8x128xf32>
    %37 = arith.mulf %25, %36 : vector<8x128xf32>
    %38 = arith.addf %34, %37 : vector<8x128xf32>
    %39 = math.tanh %38 : vector<8x128xf32>
    %cst_19 = arith.constant 1.000000e+00 : f32
    %40 = vector.broadcast %cst_19 : f32 to vector<8x128xf32>
    %41 = arith.subf %40, %33 : vector<8x128xf32>
    %42 = arith.mulf %41, %39 : vector<8x128xf32>
    %43 = arith.mulf %33, %13 : vector<8x128xf32>
    %44 = arith.addf %42, %43 : vector<8x128xf32>
    %45 = arith.index_cast %c0_i32 : i32 to index
    %c0_20 = arith.constant 0 : index
    %c0_21 = arith.constant 0 : index
    %46 = vector.load %arg14[%45, %c0_20, %c0_21] : memref<8x8x128xf32, #tpu.memory_space<vmem>>, vector<1x8x128xf32>
    %47 = vector.shape_cast %46 : vector<1x8x128xf32> to vector<8x128xf32>
    %48 = vector.shape_cast %44 : vector<8x128xf32> to vector<1x8x128xf32>
    tpu.vector_store %arg14[%45, %c0_20, %c0_21], %48 {strides = array<i32>} : memref<8x8x128xf32, #tpu.memory_space<vmem>>, vector<1x8x128xf32>,
    %c1_i32 = arith.constant 1 : i32
    %49 = arith.index_cast %c1_i32 : i32 to index
    %c0_22 = arith.constant 0 : index
    %c0_23 = arith.constant 0 : index
    %50 = vector.load %arg15[%49, %c0_22, %c0_23] : memref<8x8x384xf32, #tpu.memory_space<vmem>>, vector<1x8x384xf32>
    %51 = vector.shape_cast %50 : vector<1x8x384xf32> to vector<8x384xf32>
    %cst_24 = arith.constant dense<0.000000e+00> : vector<8x384xf32>
    %52 = tpu.matmul %44, %9, %cst_24 {dimension_numbers = #tpu.dot_dimension_numbers<[1], [0], [0], [1], [0, 0, 1, 1], [], []>} : vector<8x128xf32>, vector<128x384xf32>, vector<8x384xf32> -> vector<8x384xf32>
    %53 = vector.extract_strided_slice %51 {offsets = [0, 0], sizes = [8, 128], strides = [1, 1]} : vector<8x384xf32> to vector<8x128xf32>
    %54 = vector.extract_strided_slice %52 {offsets = [0, 0], sizes = [8, 128], strides = [1, 1]} : vector<8x384xf32> to vector<8x128xf32>
    %55 = arith.addf %53, %54 : vector<8x128xf32>
    %56 = arith.negf %55 : vector<8x128xf32>
    %57 = math.exp %56 : vector<8x128xf32>
    %cst_25 = arith.constant 1.000000e+00 : f32
    %58 = vector.broadcast %cst_25 : f32 to vector<8x128xf32>
    %59 = arith.addf %58, %57 : vector<8x128xf32>
    %60 = arith.divf %58, %59 : vector<8x128xf32>
    %61 = vector.extract_strided_slice %51 {offsets = [0, 128], sizes = [8, 128], strides = [1, 1]} : vector<8x384xf32> to vector<8x128xf32>
    %62 = vector.extract_strided_slice %52 {offsets = [0, 128], sizes = [8, 128], strides = [1, 1]} : vector<8x384xf32> to vector<8x128xf32>
    %63 = arith.addf %61, %62 : vector<8x128xf32>
    %64 = arith.negf %63 : vector<8x128xf32>
    %65 = math.exp %64 : vector<8x128xf32>
    %cst_26 = arith.constant 1.000000e+00 : f32
    %66 = vector.broadcast %cst_26 : f32 to vector<8x128xf32>
    %67 = arith.addf %66, %65 : vector<8x128xf32>
    %68 = arith.divf %66, %67 : vector<8x128xf32>
    %69 = vector.extract_strided_slice %51 {offsets = [0, 256], sizes = [8, 128], strides = [1, 1]} : vector<8x384xf32> to vector<8x128xf32>
    %70 = vector.extract_strided_slice %52 {offsets = [0, 256], sizes = [8, 128], strides = [1, 1]} : vector<8x384xf32> to vector<8x128xf32>
    %71 = arith.addf %70, %12 : vector<8x128xf32>
    %72 = arith.mulf %60, %71 : vector<8x128xf32>
    %73 = arith.addf %69, %72 : vector<8x128xf32>
    %74 = math.tanh %73 : vector<8x128xf32>
    %cst_27 = arith.constant 1.000000e+00 : f32
    %75 = vector.broadcast %cst_27 : f32 to vector<8x128xf32>
    %76 = arith.subf %75, %68 : vector<8x128xf32>
    %77 = arith.mulf %76, %74 : vector<8x128xf32>
    %78 = arith.mulf %68, %44 : vector<8x128xf32>
    %79 = arith.addf %77, %78 : vector<8x128xf32>
    %80 = arith.index_cast %c1_i32 : i32 to index
    %c0_28 = arith.constant 0 : index
    %c0_29 = arith.constant 0 : index
    %81 = vector.load %arg14[%80, %c0_28, %c0_29] : memref<8x8x128xf32, #tpu.memory_space<vmem>>, vector<1x8x128xf32>
    %82 = vector.shape_cast %81 : vector<1x8x128xf32> to vector<8x128xf32>
    %83 = vector.shape_cast %79 : vector<8x128xf32> to vector<1x8x128xf32>
    tpu.vector_store %arg14[%80, %c0_28, %c0_29], %83 {strides = array<i32>} : memref<8x8x128xf32, #tpu.memory_space<vmem>>, vector<1x8x128xf32>,
    %c2_i32 = arith.constant 2 : i32
    %84 = arith.index_cast %c2_i32 : i32 to index
    %c0_30 = arith.constant 0 : index
    %c0_31 = arith.constant 0 : index
    %85 = vector.load %arg15[%84, %c0_30, %c0_31] : memref<8x8x384xf32, #tpu.memory_space<vmem>>, vector<1x8x384xf32>
    %86 = vector.shape_cast %85 : vector<1x8x384xf32> to vector<8x384xf32>
    %cst_32 = arith.constant dense<0.000000e+00> : vector<8x384xf32>
    %87 = tpu.matmul %79, %9, %cst_32 {dimension_numbers = #tpu.dot_dimension_numbers<[1], [0], [0], [1], [0, 0, 1, 1], [], []>} : vector<8x128xf32>, vector<128x384xf32>, vector<8x384xf32> -> vector<8x384xf32>
    %88 = vector.extract_strided_slice %86 {offsets = [0, 0], sizes = [8, 128], strides = [1, 1]} : vector<8x384xf32> to vector<8x128xf32>
    %89 = vector.extract_strided_slice %87 {offsets = [0, 0], sizes = [8, 128], strides = [1, 1]} : vector<8x384xf32> to vector<8x128xf32>
    %90 = arith.addf %88, %89 : vector<8x128xf32>
    %91 = arith.negf %90 : vector<8x128xf32>
    %92 = math.exp %91 : vector<8x128xf32>
    %cst_33 = arith.constant 1.000000e+00 : f32
    %93 = vector.broadcast %cst_33 : f32 to vector<8x128xf32>
    %94 = arith.addf %93, %92 : vector<8x128xf32>
    %95 = arith.divf %93, %94 : vector<8x128xf32>
    %96 = vector.extract_strided_slice %86 {offsets = [0, 128], sizes = [8, 128], strides = [1, 1]} : vector<8x384xf32> to vector<8x128xf32>
    %97 = vector.extract_strided_slice %87 {offsets = [0, 128], sizes = [8, 128], strides = [1, 1]} : vector<8x384xf32> to vector<8x128xf32>
    %98 = arith.addf %96, %97 : vector<8x128xf32>
    %99 = arith.negf %98 : vector<8x128xf32>
    %100 = math.exp %99 : vector<8x128xf32>
    %cst_34 = arith.constant 1.000000e+00 : f32
    %101 = vector.broadcast %cst_34 : f32 to vector<8x128xf32>
    %102 = arith.addf %101, %100 : vector<8x128xf32>
    %103 = arith.divf %101, %102 : vector<8x128xf32>
    %104 = vector.extract_strided_slice %86 {offsets = [0, 256], sizes = [8, 128], strides = [1, 1]} : vector<8x384xf32> to vector<8x128xf32>
    %105 = vector.extract_strided_slice %87 {offsets = [0, 256], sizes = [8, 128], strides = [1, 1]} : vector<8x384xf32> to vector<8x128xf32>
    %106 = arith.addf %105, %12 : vector<8x128xf32>
    %107 = arith.mulf %95, %106 : vector<8x128xf32>
    %108 = arith.addf %104, %107 : vector<8x128xf32>
    %109 = math.tanh %108 : vector<8x128xf32>
    %cst_35 = arith.constant 1.000000e+00 : f32
    %110 = vector.broadcast %cst_35 : f32 to vector<8x128xf32>
    %111 = arith.subf %110, %103 : vector<8x128xf32>
    %112 = arith.mulf %111, %109 : vector<8x128xf32>
    %113 = arith.mulf %103, %79 : vector<8x128xf32>
    %114 = arith.addf %112, %113 : vector<8x128xf32>
    %115 = arith.index_cast %c2_i32 : i32 to index
    %c0_36 = arith.constant 0 : index
    %c0_37 = arith.constant 0 : index
    %116 = vector.load %arg14[%115, %c0_36, %c0_37] : memref<8x8x128xf32, #tpu.memory_space<vmem>>, vector<1x8x128xf32>
    %117 = vector.shape_cast %116 : vector<1x8x128xf32> to vector<8x128xf32>
    %118 = vector.shape_cast %114 : vector<8x128xf32> to vector<1x8x128xf32>
    tpu.vector_store %arg14[%115, %c0_36, %c0_37], %118 {strides = array<i32>} : memref<8x8x128xf32, #tpu.memory_space<vmem>>, vector<1x8x128xf32>,
    %c3_i32 = arith.constant 3 : i32
    %119 = arith.index_cast %c3_i32 : i32 to index
    %c0_38 = arith.constant 0 : index
    %c0_39 = arith.constant 0 : index
    %120 = vector.load %arg15[%119, %c0_38, %c0_39] : memref<8x8x384xf32, #tpu.memory_space<vmem>>, vector<1x8x384xf32>
    %121 = vector.shape_cast %120 : vector<1x8x384xf32> to vector<8x384xf32>
    %cst_40 = arith.constant dense<0.000000e+00> : vector<8x384xf32>
    %122 = tpu.matmul %114, %9, %cst_40 {dimension_numbers = #tpu.dot_dimension_numbers<[1], [0], [0], [1], [0, 0, 1, 1], [], []>} : vector<8x128xf32>, vector<128x384xf32>, vector<8x384xf32> -> vector<8x384xf32>
    %123 = vector.extract_strided_slice %121 {offsets = [0, 0], sizes = [8, 128], strides = [1, 1]} : vector<8x384xf32> to vector<8x128xf32>
    %124 = vector.extract_strided_slice %122 {offsets = [0, 0], sizes = [8, 128], strides = [1, 1]} : vector<8x384xf32> to vector<8x128xf32>
    %125 = arith.addf %123, %124 : vector<8x128xf32>
    %126 = arith.negf %125 : vector<8x128xf32>
    %127 = math.exp %126 : vector<8x128xf32>
    %cst_41 = arith.constant 1.000000e+00 : f32
    %128 = vector.broadcast %cst_41 : f32 to vector<8x128xf32>
    %129 = arith.addf %128, %127 : vector<8x128xf32>
    %130 = arith.divf %128, %129 : vector<8x128xf32>
    %131 = vector.extract_strided_slice %121 {offsets = [0, 128], sizes = [8, 128], strides = [1, 1]} : vector<8x384xf32> to vector<8x128xf32>
    %132 = vector.extract_strided_slice %122 {offsets = [0, 128], sizes = [8, 128], strides = [1, 1]} : vector<8x384xf32> to vector<8x128xf32>
    %133 = arith.addf %131, %132 : vector<8x128xf32>
    %134 = arith.negf %133 : vector<8x128xf32>
    %135 = math.exp %134 : vector<8x128xf32>
    %cst_42 = arith.constant 1.000000e+00 : f32
    %136 = vector.broadcast %cst_42 : f32 to vector<8x128xf32>
    %137 = arith.addf %136, %135 : vector<8x128xf32>
    %138 = arith.divf %136, %137 : vector<8x128xf32>
    %139 = vector.extract_strided_slice %121 {offsets = [0, 256], sizes = [8, 128], strides = [1, 1]} : vector<8x384xf32> to vector<8x128xf32>
    %140 = vector.extract_strided_slice %122 {offsets = [0, 256], sizes = [8, 128], strides = [1, 1]} : vector<8x384xf32> to vector<8x128xf32>
    %141 = arith.addf %140, %12 : vector<8x128xf32>
    %142 = arith.mulf %130, %141 : vector<8x128xf32>
    %143 = arith.addf %139, %142 : vector<8x128xf32>
    %144 = math.tanh %143 : vector<8x128xf32>
    %cst_43 = arith.constant 1.000000e+00 : f32
    %145 = vector.broadcast %cst_43 : f32 to vector<8x128xf32>
    %146 = arith.subf %145, %138 : vector<8x128xf32>
    %147 = arith.mulf %146, %144 : vector<8x128xf32>
    %148 = arith.mulf %138, %114 : vector<8x128xf32>
    %149 = arith.addf %147, %148 : vector<8x128xf32>
    %150 = arith.index_cast %c3_i32 : i32 to index
    %c0_44 = arith.constant 0 : index
    %c0_45 = arith.constant 0 : index
    %151 = vector.load %arg14[%150, %c0_44, %c0_45] : memref<8x8x128xf32, #tpu.memory_space<vmem>>, vector<1x8x128xf32>
    %152 = vector.shape_cast %151 : vector<1x8x128xf32> to vector<8x128xf32>
    %153 = vector.shape_cast %149 : vector<8x128xf32> to vector<1x8x128xf32>
    tpu.vector_store %arg14[%150, %c0_44, %c0_45], %153 {strides = array<i32>} : memref<8x8x128xf32, #tpu.memory_space<vmem>>, vector<1x8x128xf32>,
    %c4_i32 = arith.constant 4 : i32
    %154 = arith.index_cast %c4_i32 : i32 to index
    %c0_46 = arith.constant 0 : index
    %c0_47 = arith.constant 0 : index
    %155 = vector.load %arg15[%154, %c0_46, %c0_47] : memref<8x8x384xf32, #tpu.memory_space<vmem>>, vector<1x8x384xf32>
    %156 = vector.shape_cast %155 : vector<1x8x384xf32> to vector<8x384xf32>
    %cst_48 = arith.constant dense<0.000000e+00> : vector<8x384xf32>
    %157 = tpu.matmul %149, %9, %cst_48 {dimension_numbers = #tpu.dot_dimension_numbers<[1], [0], [0], [1], [0, 0, 1, 1], [], []>} : vector<8x128xf32>, vector<128x384xf32>, vector<8x384xf32> -> vector<8x384xf32>
    %158 = vector.extract_strided_slice %156 {offsets = [0, 0], sizes = [8, 128], strides = [1, 1]} : vector<8x384xf32> to vector<8x128xf32>
    %159 = vector.extract_strided_slice %157 {offsets = [0, 0], sizes = [8, 128], strides = [1, 1]} : vector<8x384xf32> to vector<8x128xf32>
    %160 = arith.addf %158, %159 : vector<8x128xf32>
    %161 = arith.negf %160 : vector<8x128xf32>
    %162 = math.exp %161 : vector<8x128xf32>
    %cst_49 = arith.constant 1.000000e+00 : f32
    %163 = vector.broadcast %cst_49 : f32 to vector<8x128xf32>
    %164 = arith.addf %163, %162 : vector<8x128xf32>
    %165 = arith.divf %163, %164 : vector<8x128xf32>
    %166 = vector.extract_strided_slice %156 {offsets = [0, 128], sizes = [8, 128], strides = [1, 1]} : vector<8x384xf32> to vector<8x128xf32>
    %167 = vector.extract_strided_slice %157 {offsets = [0, 128], sizes = [8, 128], strides = [1, 1]} : vector<8x384xf32> to vector<8x128xf32>
    %168 = arith.addf %166, %167 : vector<8x128xf32>
    %169 = arith.negf %168 : vector<8x128xf32>
    %170 = math.exp %169 : vector<8x128xf32>
    %cst_50 = arith.constant 1.000000e+00 : f32
    %171 = vector.broadcast %cst_50 : f32 to vector<8x128xf32>
    %172 = arith.addf %171, %170 : vector<8x128xf32>
    %173 = arith.divf %171, %172 : vector<8x128xf32>
    %174 = vector.extract_strided_slice %156 {offsets = [0, 256], sizes = [8, 128], strides = [1, 1]} : vector<8x384xf32> to vector<8x128xf32>
    %175 = vector.extract_strided_slice %157 {offsets = [0, 256], sizes = [8, 128], strides = [1, 1]} : vector<8x384xf32> to vector<8x128xf32>
    %176 = arith.addf %175, %12 : vector<8x128xf32>
    %177 = arith.mulf %165, %176 : vector<8x128xf32>
    %178 = arith.addf %174, %177 : vector<8x128xf32>
    %179 = math.tanh %178 : vector<8x128xf32>
    %cst_51 = arith.constant 1.000000e+00 : f32
    %180 = vector.broadcast %cst_51 : f32 to vector<8x128xf32>
    %181 = arith.subf %180, %173 : vector<8x128xf32>
    %182 = arith.mulf %181, %179 : vector<8x128xf32>
    %183 = arith.mulf %173, %149 : vector<8x128xf32>
    %184 = arith.addf %182, %183 : vector<8x128xf32>
    %185 = arith.index_cast %c4_i32 : i32 to index
    %c0_52 = arith.constant 0 : index
    %c0_53 = arith.constant 0 : index
    %186 = vector.load %arg14[%185, %c0_52, %c0_53] : memref<8x8x128xf32, #tpu.memory_space<vmem>>, vector<1x8x128xf32>
    %187 = vector.shape_cast %186 : vector<1x8x128xf32> to vector<8x128xf32>
    %188 = vector.shape_cast %184 : vector<8x128xf32> to vector<1x8x128xf32>
    tpu.vector_store %arg14[%185, %c0_52, %c0_53], %188 {strides = array<i32>} : memref<8x8x128xf32, #tpu.memory_space<vmem>>, vector<1x8x128xf32>,
    %c5_i32 = arith.constant 5 : i32
    %189 = arith.index_cast %c5_i32 : i32 to index
    %c0_54 = arith.constant 0 : index
    %c0_55 = arith.constant 0 : index
    %190 = vector.load %arg15[%189, %c0_54, %c0_55] : memref<8x8x384xf32, #tpu.memory_space<vmem>>, vector<1x8x384xf32>
    %191 = vector.shape_cast %190 : vector<1x8x384xf32> to vector<8x384xf32>
    %cst_56 = arith.constant dense<0.000000e+00> : vector<8x384xf32>
    %192 = tpu.matmul %184, %9, %cst_56 {dimension_numbers = #tpu.dot_dimension_numbers<[1], [0], [0], [1], [0, 0, 1, 1], [], []>} : vector<8x128xf32>, vector<128x384xf32>, vector<8x384xf32> -> vector<8x384xf32>
    %193 = vector.extract_strided_slice %191 {offsets = [0, 0], sizes = [8, 128], strides = [1, 1]} : vector<8x384xf32> to vector<8x128xf32>
    %194 = vector.extract_strided_slice %192 {offsets = [0, 0], sizes = [8, 128], strides = [1, 1]} : vector<8x384xf32> to vector<8x128xf32>
    %195 = arith.addf %193, %194 : vector<8x128xf32>
    %196 = arith.negf %195 : vector<8x128xf32>
    %197 = math.exp %196 : vector<8x128xf32>
    %cst_57 = arith.constant 1.000000e+00 : f32
    %198 = vector.broadcast %cst_57 : f32 to vector<8x128xf32>
    %199 = arith.addf %198, %197 : vector<8x128xf32>
    %200 = arith.divf %198, %199 : vector<8x128xf32>
    %201 = vector.extract_strided_slice %191 {offsets = [0, 128], sizes = [8, 128], strides = [1, 1]} : vector<8x384xf32> to vector<8x128xf32>
    %202 = vector.extract_strided_slice %192 {offsets = [0, 128], sizes = [8, 128], strides = [1, 1]} : vector<8x384xf32> to vector<8x128xf32>
    %203 = arith.addf %201, %202 : vector<8x128xf32>
    %204 = arith.negf %203 : vector<8x128xf32>
    %205 = math.exp %204 : vector<8x128xf32>
    %cst_58 = arith.constant 1.000000e+00 : f32
    %206 = vector.broadcast %cst_58 : f32 to vector<8x128xf32>
    %207 = arith.addf %206, %205 : vector<8x128xf32>
    %208 = arith.divf %206, %207 : vector<8x128xf32>
    %209 = vector.extract_strided_slice %191 {offsets = [0, 256], sizes = [8, 128], strides = [1, 1]} : vector<8x384xf32> to vector<8x128xf32>
    %210 = vector.extract_strided_slice %192 {offsets = [0, 256], sizes = [8, 128], strides = [1, 1]} : vector<8x384xf32> to vector<8x128xf32>
    %211 = arith.addf %210, %12 : vector<8x128xf32>
    %212 = arith.mulf %200, %211 : vector<8x128xf32>
    %213 = arith.addf %209, %212 : vector<8x128xf32>
    %214 = math.tanh %213 : vector<8x128xf32>
    %cst_59 = arith.constant 1.000000e+00 : f32
    %215 = vector.broadcast %cst_59 : f32 to vector<8x128xf32>
    %216 = arith.subf %215, %208 : vector<8x128xf32>
    %217 = arith.mulf %216, %214 : vector<8x128xf32>
    %218 = arith.mulf %208, %184 : vector<8x128xf32>
    %219 = arith.addf %217, %218 : vector<8x128xf32>
    %220 = arith.index_cast %c5_i32 : i32 to index
    %c0_60 = arith.constant 0 : index
    %c0_61 = arith.constant 0 : index
    %221 = vector.load %arg14[%220, %c0_60, %c0_61] : memref<8x8x128xf32, #tpu.memory_space<vmem>>, vector<1x8x128xf32>
    %222 = vector.shape_cast %221 : vector<1x8x128xf32> to vector<8x128xf32>
    %223 = vector.shape_cast %219 : vector<8x128xf32> to vector<1x8x128xf32>
    tpu.vector_store %arg14[%220, %c0_60, %c0_61], %223 {strides = array<i32>} : memref<8x8x128xf32, #tpu.memory_space<vmem>>, vector<1x8x128xf32>,
    %c6_i32 = arith.constant 6 : i32
    %224 = arith.index_cast %c6_i32 : i32 to index
    %c0_62 = arith.constant 0 : index
    %c0_63 = arith.constant 0 : index
    %225 = vector.load %arg15[%224, %c0_62, %c0_63] : memref<8x8x384xf32, #tpu.memory_space<vmem>>, vector<1x8x384xf32>
    %226 = vector.shape_cast %225 : vector<1x8x384xf32> to vector<8x384xf32>
    %cst_64 = arith.constant dense<0.000000e+00> : vector<8x384xf32>
    %227 = tpu.matmul %219, %9, %cst_64 {dimension_numbers = #tpu.dot_dimension_numbers<[1], [0], [0], [1], [0, 0, 1, 1], [], []>} : vector<8x128xf32>, vector<128x384xf32>, vector<8x384xf32> -> vector<8x384xf32>
    %228 = vector.extract_strided_slice %226 {offsets = [0, 0], sizes = [8, 128], strides = [1, 1]} : vector<8x384xf32> to vector<8x128xf32>
    %229 = vector.extract_strided_slice %227 {offsets = [0, 0], sizes = [8, 128], strides = [1, 1]} : vector<8x384xf32> to vector<8x128xf32>
    %230 = arith.addf %228, %229 : vector<8x128xf32>
    %231 = arith.negf %230 : vector<8x128xf32>
    %232 = math.exp %231 : vector<8x128xf32>
    %cst_65 = arith.constant 1.000000e+00 : f32
    %233 = vector.broadcast %cst_65 : f32 to vector<8x128xf32>
    %234 = arith.addf %233, %232 : vector<8x128xf32>
    %235 = arith.divf %233, %234 : vector<8x128xf32>
    %236 = vector.extract_strided_slice %226 {offsets = [0, 128], sizes = [8, 128], strides = [1, 1]} : vector<8x384xf32> to vector<8x128xf32>
    %237 = vector.extract_strided_slice %227 {offsets = [0, 128], sizes = [8, 128], strides = [1, 1]} : vector<8x384xf32> to vector<8x128xf32>
    %238 = arith.addf %236, %237 : vector<8x128xf32>
    %239 = arith.negf %238 : vector<8x128xf32>
    %240 = math.exp %239 : vector<8x128xf32>
    %cst_66 = arith.constant 1.000000e+00 : f32
    %241 = vector.broadcast %cst_66 : f32 to vector<8x128xf32>
    %242 = arith.addf %241, %240 : vector<8x128xf32>
    %243 = arith.divf %241, %242 : vector<8x128xf32>
    %244 = vector.extract_strided_slice %226 {offsets = [0, 256], sizes = [8, 128], strides = [1, 1]} : vector<8x384xf32> to vector<8x128xf32>
    %245 = vector.extract_strided_slice %227 {offsets = [0, 256], sizes = [8, 128], strides = [1, 1]} : vector<8x384xf32> to vector<8x128xf32>
    %246 = arith.addf %245, %12 : vector<8x128xf32>
    %247 = arith.mulf %235, %246 : vector<8x128xf32>
    %248 = arith.addf %244, %247 : vector<8x128xf32>
    %249 = math.tanh %248 : vector<8x128xf32>
    %cst_67 = arith.constant 1.000000e+00 : f32
    %250 = vector.broadcast %cst_67 : f32 to vector<8x128xf32>
    %251 = arith.subf %250, %243 : vector<8x128xf32>
    %252 = arith.mulf %251, %249 : vector<8x128xf32>
    %253 = arith.mulf %243, %219 : vector<8x128xf32>
    %254 = arith.addf %252, %253 : vector<8x128xf32>
    %255 = arith.index_cast %c6_i32 : i32 to index
    %c0_68 = arith.constant 0 : index
    %c0_69 = arith.constant 0 : index
    %256 = vector.load %arg14[%255, %c0_68, %c0_69] : memref<8x8x128xf32, #tpu.memory_space<vmem>>, vector<1x8x128xf32>
    %257 = vector.shape_cast %256 : vector<1x8x128xf32> to vector<8x128xf32>
    %258 = vector.shape_cast %254 : vector<8x128xf32> to vector<1x8x128xf32>
    tpu.vector_store %arg14[%255, %c0_68, %c0_69], %258 {strides = array<i32>} : memref<8x8x128xf32, #tpu.memory_space<vmem>>, vector<1x8x128xf32>,
    %c7_i32 = arith.constant 7 : i32
    %259 = arith.index_cast %c7_i32 : i32 to index
    %c0_70 = arith.constant 0 : index
    %c0_71 = arith.constant 0 : index
    %260 = vector.load %arg15[%259, %c0_70, %c0_71] : memref<8x8x384xf32, #tpu.memory_space<vmem>>, vector<1x8x384xf32>
    %261 = vector.shape_cast %260 : vector<1x8x384xf32> to vector<8x384xf32>
    %cst_72 = arith.constant dense<0.000000e+00> : vector<8x384xf32>
    %262 = tpu.matmul %254, %9, %cst_72 {dimension_numbers = #tpu.dot_dimension_numbers<[1], [0], [0], [1], [0, 0, 1, 1], [], []>} : vector<8x128xf32>, vector<128x384xf32>, vector<8x384xf32> -> vector<8x384xf32>
    %263 = vector.extract_strided_slice %261 {offsets = [0, 0], sizes = [8, 128], strides = [1, 1]} : vector<8x384xf32> to vector<8x128xf32>
    %264 = vector.extract_strided_slice %262 {offsets = [0, 0], sizes = [8, 128], strides = [1, 1]} : vector<8x384xf32> to vector<8x128xf32>
    %265 = arith.addf %263, %264 : vector<8x128xf32>
    %266 = arith.negf %265 : vector<8x128xf32>
    %267 = math.exp %266 : vector<8x128xf32>
    %cst_73 = arith.constant 1.000000e+00 : f32
    %268 = vector.broadcast %cst_73 : f32 to vector<8x128xf32>
    %269 = arith.addf %268, %267 : vector<8x128xf32>
    %270 = arith.divf %268, %269 : vector<8x128xf32>
    %271 = vector.extract_strided_slice %261 {offsets = [0, 128], sizes = [8, 128], strides = [1, 1]} : vector<8x384xf32> to vector<8x128xf32>
    %272 = vector.extract_strided_slice %262 {offsets = [0, 128], sizes = [8, 128], strides = [1, 1]} : vector<8x384xf32> to vector<8x128xf32>
    %273 = arith.addf %271, %272 : vector<8x128xf32>
    %274 = arith.negf %273 : vector<8x128xf32>
    %275 = math.exp %274 : vector<8x128xf32>
    %cst_74 = arith.constant 1.000000e+00 : f32
    %276 = vector.broadcast %cst_74 : f32 to vector<8x128xf32>
    %277 = arith.addf %276, %275 : vector<8x128xf32>
    %278 = arith.divf %276, %277 : vector<8x128xf32>
    %279 = vector.extract_strided_slice %261 {offsets = [0, 256], sizes = [8, 128], strides = [1, 1]} : vector<8x384xf32> to vector<8x128xf32>
    %280 = vector.extract_strided_slice %262 {offsets = [0, 256], sizes = [8, 128], strides = [1, 1]} : vector<8x384xf32> to vector<8x128xf32>
    %281 = arith.addf %280, %12 : vector<8x128xf32>
    %282 = arith.mulf %270, %281 : vector<8x128xf32>
    %283 = arith.addf %279, %282 : vector<8x128xf32>
    %284 = math.tanh %283 : vector<8x128xf32>
    %cst_75 = arith.constant 1.000000e+00 : f32
    %285 = vector.broadcast %cst_75 : f32 to vector<8x128xf32>
    %286 = arith.subf %285, %278 : vector<8x128xf32>
    %287 = arith.mulf %286, %284 : vector<8x128xf32>
    %288 = arith.mulf %278, %254 : vector<8x128xf32>
    %289 = arith.addf %287, %288 : vector<8x128xf32>
    %290 = arith.index_cast %c7_i32 : i32 to index
    %c0_76 = arith.constant 0 : index
    %c0_77 = arith.constant 0 : index
    %291 = vector.load %arg14[%290, %c0_76, %c0_77] : memref<8x8x128xf32, #tpu.memory_space<vmem>>, vector<1x8x128xf32>
    %292 = vector.shape_cast %291 : vector<1x8x128xf32> to vector<8x128xf32>
    %293 = vector.shape_cast %289 : vector<8x128xf32> to vector<1x8x128xf32>
    tpu.vector_store %arg14[%290, %c0_76, %c0_77], %293 {strides = array<i32>} : memref<8x8x128xf32, #tpu.memory_space<vmem>>, vector<1x8x128xf32>,
    %c8_i32 = arith.constant 8 : i32
    %c0_78 = arith.constant 0 : index
    %c0_79 = arith.constant 0 : index
    %c0_80 = arith.constant 0 : index
    %294 = vector.load %arg14[%c0_78, %c0_79, %c0_80] : memref<8x8x128xf32, #tpu.memory_space<vmem>>, vector<8x8x128xf32>
    %295 = vector.shape_cast %294 : vector<8x8x128xf32> to vector<64x128xf32>
    %c0_81 = arith.constant 0 : index
    %c0_82 = arith.constant 0 : index
    %296 = vector.load %arg5[%c0_81, %c0_82] : memref<128x384xf32, #tpu.memory_space<vmem>>, vector<128x384xf32>
    %cst_83 = arith.constant dense<0.000000e+00> : vector<64x384xf32>
    %297 = tpu.matmul %295, %296, %cst_83 {dimension_numbers = #tpu.dot_dimension_numbers<[1], [0], [0], [1], [0, 0, 1, 1], [], []>} : vector<64x128xf32>, vector<128x384xf32>, vector<64x384xf32> -> vector<64x384xf32>
    %c0_84 = arith.constant 0 : index
    %c0_85 = arith.constant 0 : index
    %298 = vector.load %arg7[%c0_84, %c0_85] : memref<1x384xf32, #tpu.memory_space<vmem>>, vector<1x384xf32>
    %299 = vector.broadcast %298 : vector<1x384xf32> to vector<64x384xf32>
    %300 = arith.addf %297, %299 : vector<64x384xf32>
    %301 = vector.shape_cast %300 : vector<64x384xf32> to vector<8x8x384xf32>
    %c0_86 = arith.constant 0 : index
    %c0_87 = arith.constant 0 : index
    %c0_88 = arith.constant 0 : index
    %302 = vector.load %arg15[%c0_86, %c0_87, %c0_88] : memref<8x8x384xf32, #tpu.memory_space<vmem>>, vector<8x8x384xf32>
    tpu.vector_store %arg15[%c0_86, %c0_87, %c0_88], %301 {strides = array<i32>} : memref<8x8x384xf32, #tpu.memory_space<vmem>>, vector<8x8x384xf32>,
    %c0_89 = arith.constant 0 : index
    %c0_90 = arith.constant 0 : index
    %303 = vector.load %arg6[%c0_89, %c0_90] : memref<128x384xf32, #tpu.memory_space<vmem>>, vector<128x384xf32>
    %c0_91 = arith.constant 0 : index
    %c0_92 = arith.constant 0 : index
    %304 = vector.load %arg8[%c0_91, %c0_92] : memref<1x128xf32, #tpu.memory_space<vmem>>, vector<1x128xf32>
    %305 = vector.shape_cast %304 : vector<1x128xf32> to vector<1x128xf32>
    %306 = vector.broadcast %305 : vector<1x128xf32> to vector<8x128xf32>
    %cst_93 = arith.constant 0.000000e+00 : f32
    %307 = vector.broadcast %cst_93 : f32 to vector<8x128xf32>
    %c0_i32_94 = arith.constant 0 : i32
    %308 = arith.index_cast %c0_i32_94 : i32 to index
    %c0_95 = arith.constant 0 : index
    %c0_96 = arith.constant 0 : index
    %309 = vector.load %arg15[%308, %c0_95, %c0_96] : memref<8x8x384xf32, #tpu.memory_space<vmem>>, vector<1x8x384xf32>
    %310 = vector.shape_cast %309 : vector<1x8x384xf32> to vector<8x384xf32>
    %cst_97 = arith.constant dense<0.000000e+00> : vector<8x384xf32>
    %311 = tpu.matmul %307, %303, %cst_97 {dimension_numbers = #tpu.dot_dimension_numbers<[1], [0], [0], [1], [0, 0, 1, 1], [], []>} : vector<8x128xf32>, vector<128x384xf32>, vector<8x384xf32> -> vector<8x384xf32>
    %312 = vector.extract_strided_slice %310 {offsets = [0, 0], sizes = [8, 128], strides = [1, 1]} : vector<8x384xf32> to vector<8x128xf32>
    %313 = vector.extract_strided_slice %311 {offsets = [0, 0], sizes = [8, 128], strides = [1, 1]} : vector<8x384xf32> to vector<8x128xf32>
    %314 = arith.addf %312, %313 : vector<8x128xf32>
    %315 = arith.negf %314 : vector<8x128xf32>
    %316 = math.exp %315 : vector<8x128xf32>
    %cst_98 = arith.constant 1.000000e+00 : f32
    %317 = vector.broadcast %cst_98 : f32 to vector<8x128xf32>
    %318 = arith.addf %317, %316 : vector<8x128xf32>
    %319 = arith.divf %317, %318 : vector<8x128xf32>
    %320 = vector.extract_strided_slice %310 {offsets = [0, 128], sizes = [8, 128], strides = [1, 1]} : vector<8x384xf32> to vector<8x128xf32>
    %321 = vector.extract_strided_slice %311 {offsets = [0, 128], sizes = [8, 128], strides = [1, 1]} : vector<8x384xf32> to vector<8x128xf32>
    %322 = arith.addf %320, %321 : vector<8x128xf32>
    %323 = arith.negf %322 : vector<8x128xf32>
    %324 = math.exp %323 : vector<8x128xf32>
    %cst_99 = arith.constant 1.000000e+00 : f32
    %325 = vector.broadcast %cst_99 : f32 to vector<8x128xf32>
    %326 = arith.addf %325, %324 : vector<8x128xf32>
    %327 = arith.divf %325, %326 : vector<8x128xf32>
    %328 = vector.extract_strided_slice %310 {offsets = [0, 256], sizes = [8, 128], strides = [1, 1]} : vector<8x384xf32> to vector<8x128xf32>
    %329 = vector.extract_strided_slice %311 {offsets = [0, 256], sizes = [8, 128], strides = [1, 1]} : vector<8x384xf32> to vector<8x128xf32>
    %330 = arith.addf %329, %306 : vector<8x128xf32>
    %331 = arith.mulf %319, %330 : vector<8x128xf32>
    %332 = arith.addf %328, %331 : vector<8x128xf32>
    %333 = math.tanh %332 : vector<8x128xf32>
    %cst_100 = arith.constant 1.000000e+00 : f32
    %334 = vector.broadcast %cst_100 : f32 to vector<8x128xf32>
    %335 = arith.subf %334, %327 : vector<8x128xf32>
    %336 = arith.mulf %335, %333 : vector<8x128xf32>
    %337 = arith.mulf %327, %307 : vector<8x128xf32>
    %338 = arith.addf %336, %337 : vector<8x128xf32>
    %c1_i32_101 = arith.constant 1 : i32
    %339 = arith.index_cast %c1_i32_101 : i32 to index
    %c0_102 = arith.constant 0 : index
    %c0_103 = arith.constant 0 : index
    %340 = vector.load %arg15[%339, %c0_102, %c0_103] : memref<8x8x384xf32, #tpu.memory_space<vmem>>, vector<1x8x384xf32>
    %341 = vector.shape_cast %340 : vector<1x8x384xf32> to vector<8x384xf32>
    %cst_104 = arith.constant dense<0.000000e+00> : vector<8x384xf32>
    %342 = tpu.matmul %338, %303, %cst_104 {dimension_numbers = #tpu.dot_dimension_numbers<[1], [0], [0], [1], [0, 0, 1, 1], [], []>} : vector<8x128xf32>, vector<128x384xf32>, vector<8x384xf32> -> vector<8x384xf32>
    %343 = vector.extract_strided_slice %341 {offsets = [0, 0], sizes = [8, 128], strides = [1, 1]} : vector<8x384xf32> to vector<8x128xf32>
    %344 = vector.extract_strided_slice %342 {offsets = [0, 0], sizes = [8, 128], strides = [1, 1]} : vector<8x384xf32> to vector<8x128xf32>
    %345 = arith.addf %343, %344 : vector<8x128xf32>
    %346 = arith.negf %345 : vector<8x128xf32>
    %347 = math.exp %346 : vector<8x128xf32>
    %cst_105 = arith.constant 1.000000e+00 : f32
    %348 = vector.broadcast %cst_105 : f32 to vector<8x128xf32>
    %349 = arith.addf %348, %347 : vector<8x128xf32>
    %350 = arith.divf %348, %349 : vector<8x128xf32>
    %351 = vector.extract_strided_slice %341 {offsets = [0, 128], sizes = [8, 128], strides = [1, 1]} : vector<8x384xf32> to vector<8x128xf32>
    %352 = vector.extract_strided_slice %342 {offsets = [0, 128], sizes = [8, 128], strides = [1, 1]} : vector<8x384xf32> to vector<8x128xf32>
    %353 = arith.addf %351, %352 : vector<8x128xf32>
    %354 = arith.negf %353 : vector<8x128xf32>
    %355 = math.exp %354 : vector<8x128xf32>
    %cst_106 = arith.constant 1.000000e+00 : f32
    %356 = vector.broadcast %cst_106 : f32 to vector<8x128xf32>
    %357 = arith.addf %356, %355 : vector<8x128xf32>
    %358 = arith.divf %356, %357 : vector<8x128xf32>
    %359 = vector.extract_strided_slice %341 {offsets = [0, 256], sizes = [8, 128], strides = [1, 1]} : vector<8x384xf32> to vector<8x128xf32>
    %360 = vector.extract_strided_slice %342 {offsets = [0, 256], sizes = [8, 128], strides = [1, 1]} : vector<8x384xf32> to vector<8x128xf32>
    %361 = arith.addf %360, %306 : vector<8x128xf32>
    %362 = arith.mulf %350, %361 : vector<8x128xf32>
    %363 = arith.addf %359, %362 : vector<8x128xf32>
    %364 = math.tanh %363 : vector<8x128xf32>
    %cst_107 = arith.constant 1.000000e+00 : f32
    %365 = vector.broadcast %cst_107 : f32 to vector<8x128xf32>
    %366 = arith.subf %365, %358 : vector<8x128xf32>
    %367 = arith.mulf %366, %364 : vector<8x128xf32>
    %368 = arith.mulf %358, %338 : vector<8x128xf32>
    %369 = arith.addf %367, %368 : vector<8x128xf32>
    %c2_i32_108 = arith.constant 2 : i32
    %370 = arith.index_cast %c2_i32_108 : i32 to index
    %c0_109 = arith.constant 0 : index
    %c0_110 = arith.constant 0 : index
    %371 = vector.load %arg15[%370, %c0_109, %c0_110] : memref<8x8x384xf32, #tpu.memory_space<vmem>>, vector<1x8x384xf32>
    %372 = vector.shape_cast %371 : vector<1x8x384xf32> to vector<8x384xf32>
    %cst_111 = arith.constant dense<0.000000e+00> : vector<8x384xf32>
    %373 = tpu.matmul %369, %303, %cst_111 {dimension_numbers = #tpu.dot_dimension_numbers<[1], [0], [0], [1], [0, 0, 1, 1], [], []>} : vector<8x128xf32>, vector<128x384xf32>, vector<8x384xf32> -> vector<8x384xf32>
    %374 = vector.extract_strided_slice %372 {offsets = [0, 0], sizes = [8, 128], strides = [1, 1]} : vector<8x384xf32> to vector<8x128xf32>
    %375 = vector.extract_strided_slice %373 {offsets = [0, 0], sizes = [8, 128], strides = [1, 1]} : vector<8x384xf32> to vector<8x128xf32>
    %376 = arith.addf %374, %375 : vector<8x128xf32>
    %377 = arith.negf %376 : vector<8x128xf32>
    %378 = math.exp %377 : vector<8x128xf32>
    %cst_112 = arith.constant 1.000000e+00 : f32
    %379 = vector.broadcast %cst_112 : f32 to vector<8x128xf32>
    %380 = arith.addf %379, %378 : vector<8x128xf32>
    %381 = arith.divf %379, %380 : vector<8x128xf32>
    %382 = vector.extract_strided_slice %372 {offsets = [0, 128], sizes = [8, 128], strides = [1, 1]} : vector<8x384xf32> to vector<8x128xf32>
    %383 = vector.extract_strided_slice %373 {offsets = [0, 128], sizes = [8, 128], strides = [1, 1]} : vector<8x384xf32> to vector<8x128xf32>
    %384 = arith.addf %382, %383 : vector<8x128xf32>
    %385 = arith.negf %384 : vector<8x128xf32>
    %386 = math.exp %385 : vector<8x128xf32>
    %cst_113 = arith.constant 1.000000e+00 : f32
    %387 = vector.broadcast %cst_113 : f32 to vector<8x128xf32>
    %388 = arith.addf %387, %386 : vector<8x128xf32>
    %389 = arith.divf %387, %388 : vector<8x128xf32>
    %390 = vector.extract_strided_slice %372 {offsets = [0, 256], sizes = [8, 128], strides = [1, 1]} : vector<8x384xf32> to vector<8x128xf32>
    %391 = vector.extract_strided_slice %373 {offsets = [0, 256], sizes = [8, 128], strides = [1, 1]} : vector<8x384xf32> to vector<8x128xf32>
    %392 = arith.addf %391, %306 : vector<8x128xf32>
    %393 = arith.mulf %381, %392 : vector<8x128xf32>
    %394 = arith.addf %390, %393 : vector<8x128xf32>
    %395 = math.tanh %394 : vector<8x128xf32>
    %cst_114 = arith.constant 1.000000e+00 : f32
    %396 = vector.broadcast %cst_114 : f32 to vector<8x128xf32>
    %397 = arith.subf %396, %389 : vector<8x128xf32>
    %398 = arith.mulf %397, %395 : vector<8x128xf32>
    %399 = arith.mulf %389, %369 : vector<8x128xf32>
    %400 = arith.addf %398, %399 : vector<8x128xf32>
    %c3_i32_115 = arith.constant 3 : i32
    %401 = arith.index_cast %c3_i32_115 : i32 to index
    %c0_116 = arith.constant 0 : index
    %c0_117 = arith.constant 0 : index
    %402 = vector.load %arg15[%401, %c0_116, %c0_117] : memref<8x8x384xf32, #tpu.memory_space<vmem>>, vector<1x8x384xf32>
    %403 = vector.shape_cast %402 : vector<1x8x384xf32> to vector<8x384xf32>
    %cst_118 = arith.constant dense<0.000000e+00> : vector<8x384xf32>
    %404 = tpu.matmul %400, %303, %cst_118 {dimension_numbers = #tpu.dot_dimension_numbers<[1], [0], [0], [1], [0, 0, 1, 1], [], []>} : vector<8x128xf32>, vector<128x384xf32>, vector<8x384xf32> -> vector<8x384xf32>
    %405 = vector.extract_strided_slice %403 {offsets = [0, 0], sizes = [8, 128], strides = [1, 1]} : vector<8x384xf32> to vector<8x128xf32>
    %406 = vector.extract_strided_slice %404 {offsets = [0, 0], sizes = [8, 128], strides = [1, 1]} : vector<8x384xf32> to vector<8x128xf32>
    %407 = arith.addf %405, %406 : vector<8x128xf32>
    %408 = arith.negf %407 : vector<8x128xf32>
    %409 = math.exp %408 : vector<8x128xf32>
    %cst_119 = arith.constant 1.000000e+00 : f32
    %410 = vector.broadcast %cst_119 : f32 to vector<8x128xf32>
    %411 = arith.addf %410, %409 : vector<8x128xf32>
    %412 = arith.divf %410, %411 : vector<8x128xf32>
    %413 = vector.extract_strided_slice %403 {offsets = [0, 128], sizes = [8, 128], strides = [1, 1]} : vector<8x384xf32> to vector<8x128xf32>
    %414 = vector.extract_strided_slice %404 {offsets = [0, 128], sizes = [8, 128], strides = [1, 1]} : vector<8x384xf32> to vector<8x128xf32>
    %415 = arith.addf %413, %414 : vector<8x128xf32>
    %416 = arith.negf %415 : vector<8x128xf32>
    %417 = math.exp %416 : vector<8x128xf32>
    %cst_120 = arith.constant 1.000000e+00 : f32
    %418 = vector.broadcast %cst_120 : f32 to vector<8x128xf32>
    %419 = arith.addf %418, %417 : vector<8x128xf32>
    %420 = arith.divf %418, %419 : vector<8x128xf32>
    %421 = vector.extract_strided_slice %403 {offsets = [0, 256], sizes = [8, 128], strides = [1, 1]} : vector<8x384xf32> to vector<8x128xf32>
    %422 = vector.extract_strided_slice %404 {offsets = [0, 256], sizes = [8, 128], strides = [1, 1]} : vector<8x384xf32> to vector<8x128xf32>
    %423 = arith.addf %422, %306 : vector<8x128xf32>
    %424 = arith.mulf %412, %423 : vector<8x128xf32>
    %425 = arith.addf %421, %424 : vector<8x128xf32>
    %426 = math.tanh %425 : vector<8x128xf32>
    %cst_121 = arith.constant 1.000000e+00 : f32
    %427 = vector.broadcast %cst_121 : f32 to vector<8x128xf32>
    %428 = arith.subf %427, %420 : vector<8x128xf32>
    %429 = arith.mulf %428, %426 : vector<8x128xf32>
    %430 = arith.mulf %420, %400 : vector<8x128xf32>
    %431 = arith.addf %429, %430 : vector<8x128xf32>
    %c4_i32_122 = arith.constant 4 : i32
    %432 = arith.index_cast %c4_i32_122 : i32 to index
    %c0_123 = arith.constant 0 : index
    %c0_124 = arith.constant 0 : index
    %433 = vector.load %arg15[%432, %c0_123, %c0_124] : memref<8x8x384xf32, #tpu.memory_space<vmem>>, vector<1x8x384xf32>
    %434 = vector.shape_cast %433 : vector<1x8x384xf32> to vector<8x384xf32>
    %cst_125 = arith.constant dense<0.000000e+00> : vector<8x384xf32>
    %435 = tpu.matmul %431, %303, %cst_125 {dimension_numbers = #tpu.dot_dimension_numbers<[1], [0], [0], [1], [0, 0, 1, 1], [], []>} : vector<8x128xf32>, vector<128x384xf32>, vector<8x384xf32> -> vector<8x384xf32>
    %436 = vector.extract_strided_slice %434 {offsets = [0, 0], sizes = [8, 128], strides = [1, 1]} : vector<8x384xf32> to vector<8x128xf32>
    %437 = vector.extract_strided_slice %435 {offsets = [0, 0], sizes = [8, 128], strides = [1, 1]} : vector<8x384xf32> to vector<8x128xf32>
    %438 = arith.addf %436, %437 : vector<8x128xf32>
    %439 = arith.negf %438 : vector<8x128xf32>
    %440 = math.exp %439 : vector<8x128xf32>
    %cst_126 = arith.constant 1.000000e+00 : f32
    %441 = vector.broadcast %cst_126 : f32 to vector<8x128xf32>
    %442 = arith.addf %441, %440 : vector<8x128xf32>
    %443 = arith.divf %441, %442 : vector<8x128xf32>
    %444 = vector.extract_strided_slice %434 {offsets = [0, 128], sizes = [8, 128], strides = [1, 1]} : vector<8x384xf32> to vector<8x128xf32>
    %445 = vector.extract_strided_slice %435 {offsets = [0, 128], sizes = [8, 128], strides = [1, 1]} : vector<8x384xf32> to vector<8x128xf32>
    %446 = arith.addf %444, %445 : vector<8x128xf32>
    %447 = arith.negf %446 : vector<8x128xf32>
    %448 = math.exp %447 : vector<8x128xf32>
    %cst_127 = arith.constant 1.000000e+00 : f32
    %449 = vector.broadcast %cst_127 : f32 to vector<8x128xf32>
    %450 = arith.addf %449, %448 : vector<8x128xf32>
    %451 = arith.divf %449, %450 : vector<8x128xf32>
    %452 = vector.extract_strided_slice %434 {offsets = [0, 256], sizes = [8, 128], strides = [1, 1]} : vector<8x384xf32> to vector<8x128xf32>
    %453 = vector.extract_strided_slice %435 {offsets = [0, 256], sizes = [8, 128], strides = [1, 1]} : vector<8x384xf32> to vector<8x128xf32>
    %454 = arith.addf %453, %306 : vector<8x128xf32>
    %455 = arith.mulf %443, %454 : vector<8x128xf32>
    %456 = arith.addf %452, %455 : vector<8x128xf32>
    %457 = math.tanh %456 : vector<8x128xf32>
    %cst_128 = arith.constant 1.000000e+00 : f32
    %458 = vector.broadcast %cst_128 : f32 to vector<8x128xf32>
    %459 = arith.subf %458, %451 : vector<8x128xf32>
    %460 = arith.mulf %459, %457 : vector<8x128xf32>
    %461 = arith.mulf %451, %431 : vector<8x128xf32>
    %462 = arith.addf %460, %461 : vector<8x128xf32>
    %c5_i32_129 = arith.constant 5 : i32
    %463 = arith.index_cast %c5_i32_129 : i32 to index
    %c0_130 = arith.constant 0 : index
    %c0_131 = arith.constant 0 : index
    %464 = vector.load %arg15[%463, %c0_130, %c0_131] : memref<8x8x384xf32, #tpu.memory_space<vmem>>, vector<1x8x384xf32>
    %465 = vector.shape_cast %464 : vector<1x8x384xf32> to vector<8x384xf32>
    %cst_132 = arith.constant dense<0.000000e+00> : vector<8x384xf32>
    %466 = tpu.matmul %462, %303, %cst_132 {dimension_numbers = #tpu.dot_dimension_numbers<[1], [0], [0], [1], [0, 0, 1, 1], [], []>} : vector<8x128xf32>, vector<128x384xf32>, vector<8x384xf32> -> vector<8x384xf32>
    %467 = vector.extract_strided_slice %465 {offsets = [0, 0], sizes = [8, 128], strides = [1, 1]} : vector<8x384xf32> to vector<8x128xf32>
    %468 = vector.extract_strided_slice %466 {offsets = [0, 0], sizes = [8, 128], strides = [1, 1]} : vector<8x384xf32> to vector<8x128xf32>
    %469 = arith.addf %467, %468 : vector<8x128xf32>
    %470 = arith.negf %469 : vector<8x128xf32>
    %471 = math.exp %470 : vector<8x128xf32>
    %cst_133 = arith.constant 1.000000e+00 : f32
    %472 = vector.broadcast %cst_133 : f32 to vector<8x128xf32>
    %473 = arith.addf %472, %471 : vector<8x128xf32>
    %474 = arith.divf %472, %473 : vector<8x128xf32>
    %475 = vector.extract_strided_slice %465 {offsets = [0, 128], sizes = [8, 128], strides = [1, 1]} : vector<8x384xf32> to vector<8x128xf32>
    %476 = vector.extract_strided_slice %466 {offsets = [0, 128], sizes = [8, 128], strides = [1, 1]} : vector<8x384xf32> to vector<8x128xf32>
    %477 = arith.addf %475, %476 : vector<8x128xf32>
    %478 = arith.negf %477 : vector<8x128xf32>
    %479 = math.exp %478 : vector<8x128xf32>
    %cst_134 = arith.constant 1.000000e+00 : f32
    %480 = vector.broadcast %cst_134 : f32 to vector<8x128xf32>
    %481 = arith.addf %480, %479 : vector<8x128xf32>
    %482 = arith.divf %480, %481 : vector<8x128xf32>
    %483 = vector.extract_strided_slice %465 {offsets = [0, 256], sizes = [8, 128], strides = [1, 1]} : vector<8x384xf32> to vector<8x128xf32>
    %484 = vector.extract_strided_slice %466 {offsets = [0, 256], sizes = [8, 128], strides = [1, 1]} : vector<8x384xf32> to vector<8x128xf32>
    %485 = arith.addf %484, %306 : vector<8x128xf32>
    %486 = arith.mulf %474, %485 : vector<8x128xf32>
    %487 = arith.addf %483, %486 : vector<8x128xf32>
    %488 = math.tanh %487 : vector<8x128xf32>
    %cst_135 = arith.constant 1.000000e+00 : f32
    %489 = vector.broadcast %cst_135 : f32 to vector<8x128xf32>
    %490 = arith.subf %489, %482 : vector<8x128xf32>
    %491 = arith.mulf %490, %488 : vector<8x128xf32>
    %492 = arith.mulf %482, %462 : vector<8x128xf32>
    %493 = arith.addf %491, %492 : vector<8x128xf32>
    %c6_i32_136 = arith.constant 6 : i32
    %494 = arith.index_cast %c6_i32_136 : i32 to index
    %c0_137 = arith.constant 0 : index
    %c0_138 = arith.constant 0 : index
    %495 = vector.load %arg15[%494, %c0_137, %c0_138] : memref<8x8x384xf32, #tpu.memory_space<vmem>>, vector<1x8x384xf32>
    %496 = vector.shape_cast %495 : vector<1x8x384xf32> to vector<8x384xf32>
    %cst_139 = arith.constant dense<0.000000e+00> : vector<8x384xf32>
    %497 = tpu.matmul %493, %303, %cst_139 {dimension_numbers = #tpu.dot_dimension_numbers<[1], [0], [0], [1], [0, 0, 1, 1], [], []>} : vector<8x128xf32>, vector<128x384xf32>, vector<8x384xf32> -> vector<8x384xf32>
    %498 = vector.extract_strided_slice %496 {offsets = [0, 0], sizes = [8, 128], strides = [1, 1]} : vector<8x384xf32> to vector<8x128xf32>
    %499 = vector.extract_strided_slice %497 {offsets = [0, 0], sizes = [8, 128], strides = [1, 1]} : vector<8x384xf32> to vector<8x128xf32>
    %500 = arith.addf %498, %499 : vector<8x128xf32>
    %501 = arith.negf %500 : vector<8x128xf32>
    %502 = math.exp %501 : vector<8x128xf32>
    %cst_140 = arith.constant 1.000000e+00 : f32
    %503 = vector.broadcast %cst_140 : f32 to vector<8x128xf32>
    %504 = arith.addf %503, %502 : vector<8x128xf32>
    %505 = arith.divf %503, %504 : vector<8x128xf32>
    %506 = vector.extract_strided_slice %496 {offsets = [0, 128], sizes = [8, 128], strides = [1, 1]} : vector<8x384xf32> to vector<8x128xf32>
    %507 = vector.extract_strided_slice %497 {offsets = [0, 128], sizes = [8, 128], strides = [1, 1]} : vector<8x384xf32> to vector<8x128xf32>
    %508 = arith.addf %506, %507 : vector<8x128xf32>
    %509 = arith.negf %508 : vector<8x128xf32>
    %510 = math.exp %509 : vector<8x128xf32>
    %cst_141 = arith.constant 1.000000e+00 : f32
    %511 = vector.broadcast %cst_141 : f32 to vector<8x128xf32>
    %512 = arith.addf %511, %510 : vector<8x128xf32>
    %513 = arith.divf %511, %512 : vector<8x128xf32>
    %514 = vector.extract_strided_slice %496 {offsets = [0, 256], sizes = [8, 128], strides = [1, 1]} : vector<8x384xf32> to vector<8x128xf32>
    %515 = vector.extract_strided_slice %497 {offsets = [0, 256], sizes = [8, 128], strides = [1, 1]} : vector<8x384xf32> to vector<8x128xf32>
    %516 = arith.addf %515, %306 : vector<8x128xf32>
    %517 = arith.mulf %505, %516 : vector<8x128xf32>
    %518 = arith.addf %514, %517 : vector<8x128xf32>
    %519 = math.tanh %518 : vector<8x128xf32>
    %cst_142 = arith.constant 1.000000e+00 : f32
    %520 = vector.broadcast %cst_142 : f32 to vector<8x128xf32>
    %521 = arith.subf %520, %513 : vector<8x128xf32>
    %522 = arith.mulf %521, %519 : vector<8x128xf32>
    %523 = arith.mulf %513, %493 : vector<8x128xf32>
    %524 = arith.addf %522, %523 : vector<8x128xf32>
    %c7_i32_143 = arith.constant 7 : i32
    %525 = arith.index_cast %c7_i32_143 : i32 to index
    %c0_144 = arith.constant 0 : index
    %c0_145 = arith.constant 0 : index
    %526 = vector.load %arg15[%525, %c0_144, %c0_145] : memref<8x8x384xf32, #tpu.memory_space<vmem>>, vector<1x8x384xf32>
    %527 = vector.shape_cast %526 : vector<1x8x384xf32> to vector<8x384xf32>
    %cst_146 = arith.constant dense<0.000000e+00> : vector<8x384xf32>
    %528 = tpu.matmul %524, %303, %cst_146 {dimension_numbers = #tpu.dot_dimension_numbers<[1], [0], [0], [1], [0, 0, 1, 1], [], []>} : vector<8x128xf32>, vector<128x384xf32>, vector<8x384xf32> -> vector<8x384xf32>
    %529 = vector.extract_strided_slice %527 {offsets = [0, 0], sizes = [8, 128], strides = [1, 1]} : vector<8x384xf32> to vector<8x128xf32>
    %530 = vector.extract_strided_slice %528 {offsets = [0, 0], sizes = [8, 128], strides = [1, 1]} : vector<8x384xf32> to vector<8x128xf32>
    %531 = arith.addf %529, %530 : vector<8x128xf32>
    %532 = arith.negf %531 : vector<8x128xf32>
    %533 = math.exp %532 : vector<8x128xf32>
    %cst_147 = arith.constant 1.000000e+00 : f32
    %534 = vector.broadcast %cst_147 : f32 to vector<8x128xf32>
    %535 = arith.addf %534, %533 : vector<8x128xf32>
    %536 = arith.divf %534, %535 : vector<8x128xf32>
    %537 = vector.extract_strided_slice %527 {offsets = [0, 128], sizes = [8, 128], strides = [1, 1]} : vector<8x384xf32> to vector<8x128xf32>
    %538 = vector.extract_strided_slice %528 {offsets = [0, 128], sizes = [8, 128], strides = [1, 1]} : vector<8x384xf32> to vector<8x128xf32>
    %539 = arith.addf %537, %538 : vector<8x128xf32>
    %540 = arith.negf %539 : vector<8x128xf32>
    %541 = math.exp %540 : vector<8x128xf32>
    %cst_148 = arith.constant 1.000000e+00 : f32
    %542 = vector.broadcast %cst_148 : f32 to vector<8x128xf32>
    %543 = arith.addf %542, %541 : vector<8x128xf32>
    %544 = arith.divf %542, %543 : vector<8x128xf32>
    %545 = vector.extract_strided_slice %527 {offsets = [0, 256], sizes = [8, 128], strides = [1, 1]} : vector<8x384xf32> to vector<8x128xf32>
    %546 = vector.extract_strided_slice %528 {offsets = [0, 256], sizes = [8, 128], strides = [1, 1]} : vector<8x384xf32> to vector<8x128xf32>
    %547 = arith.addf %546, %306 : vector<8x128xf32>
    %548 = arith.mulf %536, %547 : vector<8x128xf32>
    %549 = arith.addf %545, %548 : vector<8x128xf32>
    %550 = math.tanh %549 : vector<8x128xf32>
    %cst_149 = arith.constant 1.000000e+00 : f32
    %551 = vector.broadcast %cst_149 : f32 to vector<8x128xf32>
    %552 = arith.subf %551, %544 : vector<8x128xf32>
    %553 = arith.mulf %552, %550 : vector<8x128xf32>
    %554 = arith.mulf %544, %524 : vector<8x128xf32>
    %555 = arith.addf %553, %554 : vector<8x128xf32>
    %c8_i32_150 = arith.constant 8 : i32
    %c0_151 = arith.constant 0 : index
    %c0_152 = arith.constant 0 : index
    %556 = vector.load %arg9[%c0_151, %c0_152] : memref<128x128xf32, #tpu.memory_space<vmem>>, vector<128x128xf32>
    %cst_153 = arith.constant dense<0.000000e+00> : vector<8x128xf32>
    %557 = tpu.matmul %555, %556, %cst_153 {dimension_numbers = #tpu.dot_dimension_numbers<[1], [0], [0], [1], [0, 0, 1, 1], [], []>} : vector<8x128xf32>, vector<128x128xf32>, vector<8x128xf32> -> vector<8x128xf32>
    %c0_154 = arith.constant 0 : index
    %c0_155 = arith.constant 0 : index
    %558 = vector.load %arg10[%c0_154, %c0_155] : memref<1x128xf32, #tpu.memory_space<vmem>>, vector<1x128xf32>
    %559 = vector.broadcast %558 : vector<1x128xf32> to vector<8x128xf32>
    %560 = arith.addf %557, %559 : vector<8x128xf32>
    %561 = arith.negf %560 : vector<8x128xf32>
    %562 = math.exp %561 : vector<8x128xf32>
    %cst_156 = arith.constant 1.000000e+00 : f32
    %563 = vector.broadcast %cst_156 : f32 to vector<8x128xf32>
    %564 = arith.addf %563, %562 : vector<8x128xf32>
    %565 = arith.divf %563, %564 : vector<8x128xf32>
    %c0_157 = arith.constant 0 : index
    %c0_158 = arith.constant 0 : index
    %566 = vector.load %arg11[%c0_157, %c0_158] : memref<128x128xf32, #tpu.memory_space<vmem>>, vector<128x128xf32>
    %cst_159 = arith.constant dense<0.000000e+00> : vector<8x128xf32>
    %567 = tpu.matmul %565, %566, %cst_159 {dimension_numbers = #tpu.dot_dimension_numbers<[1], [0], [0], [1], [0, 0, 1, 1], [], []>} : vector<8x128xf32>, vector<128x128xf32>, vector<8x128xf32> -> vector<8x128xf32>
    %c0_160 = arith.constant 0 : index
    %c0_161 = arith.constant 0 : index
    %568 = vector.load %arg12[%c0_160, %c0_161] : memref<1x128xf32, #tpu.memory_space<vmem>>, vector<1x128xf32>
    %569 = vector.broadcast %568 : vector<1x128xf32> to vector<8x128xf32>
    %570 = arith.addf %567, %569 : vector<8x128xf32>
    %c0_162 = arith.constant 0 : index
    %c0_163 = arith.constant 0 : index
    %571 = vector.load %arg13[%c0_162, %c0_163] : memref<8x128xf32, #tpu.memory_space<vmem>>, vector<8x128xf32>
    tpu.vector_store %arg13[%c0_162, %c0_163], %570 {strides = array<i32>} : memref<8x128xf32, #tpu.memory_space<vmem>>, vector<8x128xf32>,
    return
  }
}

</mosaic_0001>

<bundles_post_ra>
// kernel: rnn_forward_pallas.1
= control target key start
LH: loop header
LB: loop body
LE: loop exit
PB: predicated region body
PF: predicated region fallthrough
CT: control target
= control target key end

     0   :  { %18 = vsyncpa [#allocation5], 0  ;;  %s7591_s0 = inlined_call_operand.vmem [shape: f32[8,8,128], index: 0, kind: input, shape index: {}]   ;;  %s7592_s1 = inlined_call_operand.hbm [shape: f32[128,384], index: 1, kind: input, shape index: {}]   ;;  %s7593_s2 = inlined_call_operand.hbm [shape: f32[128,384], index: 2, kind: input, shape index: {}]   ;;  %s7594_s3 = inlined_call_operand.vmem [shape: f32[1,384], index: 3, kind: input, shape index: {}]   ;;  %s7595_s4 = inlined_call_operand.hbm [shape: f32[1,128], index: 4, kind: input, shape index: {}]   ;;  %s7596_s5 = inlined_call_operand.hbm [shape: f32[128,384], index: 5, kind: input, shape index: {}]   ;;  %s7597_s6 = inlined_call_operand.hbm [shape: f32[128,384], index: 6, kind: input, shape index: {}]   ;;  %s7598_s7 = inlined_call_operand.vmem [shape: f32[1,384], index: 7, kind: input, shape index: {}]   ;;  %s7599_s8 = inlined_call_operand.hbm [shape: f32[1,128], index: 8, kind: input, shape index: {}]   ;;  %s7600_s9 = inlined_call_operand.hbm [shape: f32[128,128], index: 9, kind: input, shape index: {}]   ;;  %s7601_s10 = inlined_call_operand.hbm [shape: f32[1,128], index: 10, kind: input, shape index: {}]   ;;  %s7602_s11 = inlined_call_operand.vmem [shape: f32[128,128], index: 11, kind: input, shape index: {}]   ;;  %s7603_s12 = inlined_call_operand.vmem [shape: f32[1,128], index: 12, kind: input, shape index: {}]   ;;  %s7604_s13 = inlined_call_operand.vmem [shape: f32[8,128], index: 13, kind: output, shape index: {}]  }
   0x1   :  { %19 = vsyncpa [#allocation7], 0 }
   0x2   :  { %20 = vsyncpa [#allocation10], 0 }
   0x3   :  { %21 = vsyncpa [#allocation13], 0 }
   0x4   :  { %22 = vsyncpa [#allocation16], 0  ;;  %s6378_s25 = smov [#allocation6]   ;;  %s6379_s27 = smov [#allocation9]  }
   0x5   :  { %s42_s26 = sshll.u32 %s6378_s25, 4  ;;  %s66_s28 = sshll.u32 %s6379_s27, 4  ;;  %s43_s26 = int_to_ptr.vmem [resolvable:$true] %s42_s26  ;;  %s6463_s28 = int_to_ptr.vmem [resolvable:$true] %s66_s28 }
   0x6   :  { %s6192_s14 = scalar_lea.hbm %s7593_s2, 6144 }
   0x7   :  { %p6193_p0 = scmp.ne.s32.totalorder %s7593_s2, %s6192_s14  ;;  %p6196_p1 = scmp.lt.u32.totalorder %s6192_s14, %s7593_s2 }
   0x9   :  { %p6198_p2 = pnand %p6196_p1, %p6193_p0 }
   0xb   :  { %6201 = shalt.err (!%p6198_p2)
}
   0xc   :  { %s6202_s19 = scalar_lea.vmem %s43_s26, 6144  ;;  %p6207_p4 = scmp.lt.s32.totalorder %s43_s26, %s43_s26 }
   0xd   :  { %p6203_p3 = scmp.ne.s32.totalorder %s43_s26, %s6202_s19  ;;  %p6208_p5 = scmp.lt.s32.totalorder %s6202_s19, %s6202_s19 }
   0xf   :  { %p6209_p6 = por %p6208_p5, %p6207_p4 }
  0x11   :  { %p6210_p7 = pnand %p6209_p6, %p6203_p3 }
  0x13   :  { %6213 = shalt.err (!%p6210_p7)
}
  0x14   :  { %s6380_s20 = smov 384   ;;  %s6381_s21 = smov 24  }
  0x15   :  { %48 = dma.hbm_to_vmem [thread:$0]  %s7593_s2, 6144, %s43_s26, [#allocation7], %s6380_s20, %s6380_s20, %s6381_s21  }
  0x16   :  { %s6214_s27 = scalar_lea.hbm %s7596_s5, 6144 }
  0x17   :  { %p6215_p8 = scmp.ne.s32.totalorder %s7596_s5, %s6214_s27  ;;  %p6218_p9 = scmp.lt.u32.totalorder %s6214_s27, %s7596_s5 }
  0x19   :  { %p6220_p10 = pnand %p6218_p9, %p6215_p8 }
  0x1b   :  { %6223 = shalt.err (!%p6220_p10)
}
  0x1c   :  { %s6224_s16 = scalar_lea.vmem %s6463_s28, 6144  ;;  %p6229_p12 = scmp.lt.s32.totalorder %s6463_s28, %s6463_s28 }
  0x1d   :  { %p6225_p11 = scmp.ne.s32.totalorder %s6463_s28, %s6224_s16  ;;  %p6230_p13 = scmp.lt.s32.totalorder %s6224_s16, %s6224_s16 }
  0x1f   :  { %p6231_p0 = por %p6230_p13, %p6229_p12 }
  0x21   :  { %p6232_p1 = pnand %p6231_p0, %p6225_p11 }
  0x23   :  { %6235 = shalt.err (!%p6232_p1)
}
  0x24   :  { %72 = dma.hbm_to_vmem [thread:$0]  %s7596_s5, 6144, %s6463_s28, [#allocation10], %s6380_s20, %s6380_s20, %s6381_s21  }
  0x25   :  { %s6382_s17 = smov [#allocation12]   ;;  %s6383_s19 = smov [#allocation4]  }
  0x26   :  { %s93_s18 = sshll.u32 %s6382_s17, 4  ;;  %s30_s22 = sshll.u32 %s6383_s19, 4  ;;  %s94_s18 = int_to_ptr.vmem [resolvable:$true] %s93_s18  ;;  %s6500_s22 = int_to_ptr.vmem [resolvable:$true] %s30_s22 }
  0x27   :  { %s6236_s25 = scalar_lea.hbm %s7599_s8, 16 }
  0x28   :  { %p6237_p2 = scmp.ne.s32.totalorder %s7599_s8, %s6236_s25  ;;  %p6240_p3 = scmp.lt.u32.totalorder %s6236_s25, %s7599_s8 }
  0x2a   :  { %p6242_p4 = pnand %p6240_p3, %p6237_p2 }
  0x2c   :  { %6245 = shalt.err (!%p6242_p4)
}
  0x2d   :  { %s6246_s5 = scalar_lea.vmem %s94_s18, 16  ;;  %s6250_s28 = scalar_lea.vmem %s94_s18, 32 }
  0x2e   :  { %p6247_p5 = scmp.ne.s32.totalorder %s94_s18, %s6246_s5  ;;  %p6251_p6 = scmp.lt.s32.totalorder %s94_s18, %s94_s18 }
  0x2f   :  { %p6252_p7 = scmp.lt.s32.totalorder %s6250_s28, %s6246_s5 }
  0x31   :  { %p6253_p8 = por %p6252_p7, %p6251_p6 }
  0x33   :  { %p6254_p9 = pnand %p6253_p8, %p6247_p5 }
  0x35   :  { %6257 = shalt.err (!%p6254_p9)
}
  0x36   :  { %96 = dma.hbm_to_vmem [thread:$0]  %s7599_s8, 16, %s94_s18, [#allocation13]  }
  0x37   :  { %s6258_s17 = scalar_lea.hbm %s7592_s1, 6144 }
  0x38   :  { %p6259_p10 = scmp.ne.s32.totalorder %s7592_s1, %s6258_s17  ;;  %p6262_p11 = scmp.lt.u32.totalorder %s6258_s17, %s7592_s1 }
  0x3a   :  { %p6264_p12 = pnand %p6262_p11, %p6259_p10 }
  0x3c   :  { %6267 = shalt.err (!%p6264_p12)
}
  0x3d   :  { %s6268_s27 = scalar_lea.vmem %s6500_s22, 6144  ;;  %p6273_p0 = scmp.lt.s32.totalorder %s6500_s22, %s6500_s22 }
  0x3e   :  { %p6269_p13 = scmp.ne.s32.totalorder %s6500_s22, %s6268_s27  ;;  %p6274_p1 = scmp.lt.s32.totalorder %s6268_s27, %s6268_s27 }
  0x40   :  { %p6275_p2 = por %p6274_p1, %p6273_p0 }
  0x42   :  { %p6276_p3 = pnand %p6275_p2, %p6269_p13 }
  0x44   :  { %6279 = shalt.err (!%p6276_p3)
}
  0x45   :  { %36 = dma.hbm_to_vmem [thread:$0]  %s7592_s1, 6144, %s6500_s22, [#allocation5], %s6380_s20, %s6380_s20, %s6381_s21  }
  0x46   :  { %s6384_s29 = smov [#allocation8]   ;;  %s6385_s14 = smov [#allocation11]  }
  0x47   :  { %s57_s30 = sshll.u32 %s6384_s29, 4  ;;  %s78_s5 = sshll.u32 %s6385_s14, 4  ;;  %s58_s30 = int_to_ptr.vmem [resolvable:$true] %s57_s30  ;;  %s6534_s5 = int_to_ptr.vmem [resolvable:$true] %s78_s5 }
  0x48   :  { %s6280_s16 = scalar_lea.hbm %s7595_s4, 16 }
  0x49   :  { %p6281_p4 = scmp.ne.s32.totalorder %s7595_s4, %s6280_s16  ;;  %p6284_p5 = scmp.lt.u32.totalorder %s6280_s16, %s7595_s4 }
  0x4b   :  { %p6286_p6 = pnand %p6284_p5, %p6281_p4 }
  0x4d   :  { %6289 = shalt.err (!%p6286_p6)
}
  0x4e   :  { %s6290_s1 = scalar_lea.vmem %s58_s30, 16  ;;  %s6294_s22 = scalar_lea.vmem %s58_s30, 32 }
  0x4f   :  { %p6291_p7 = scmp.ne.s32.totalorder %s58_s30, %s6290_s1  ;;  %p6295_p8 = scmp.lt.s32.totalorder %s58_s30, %s58_s30 }
  0x50   :  { %p6296_p9 = scmp.lt.s32.totalorder %s6294_s22, %s6290_s1 }
  0x52   :  { %p6297_p10 = por %p6296_p9, %p6295_p8 }
  0x54   :  { %p6298_p11 = pnand %p6297_p10, %p6291_p7 }
  0x56   :  { %6301 = shalt.err (!%p6298_p11)
}
  0x57   :  { %60 = dma.hbm_to_vmem [thread:$0]  %s7595_s4, 16, %s58_s30, [#allocation7]  }
  0x58   :  { %s6302_s8 = scalar_lea.hbm %s7597_s6, 6144 }
  0x59   :  { %p6303_p12 = scmp.ne.s32.totalorder %s7597_s6, %s6302_s8  ;;  %p6306_p13 = scmp.lt.u32.totalorder %s6302_s8, %s7597_s6 }
  0x5b   :  { %p6308_p0 = pnand %p6306_p13, %p6303_p12 }
  0x5d   :  { %6311 = shalt.err (!%p6308_p0)
}
  0x5e   :  { %s6312_s15 = scalar_lea.vmem %s6534_s5, 6144  ;;  %p6317_p2 = scmp.lt.s32.totalorder %s6534_s5, %s6534_s5 }
  0x5f   :  { %p6313_p1 = scmp.ne.s32.totalorder %s6534_s5, %s6312_s15  ;;  %p6318_p3 = scmp.lt.s32.totalorder %s6312_s15, %s6312_s15 }
  0x61   :  { %p6319_p4 = por %p6318_p3, %p6317_p2 }
  0x63   :  { %p6320_p5 = pnand %p6319_p4, %p6313_p1 }
  0x65   :  { %6323 = shalt.err (!%p6320_p5)
}
  0x66   :  { %84 = dma.hbm_to_vmem [thread:$0]  %s7597_s6, 6144, %s6534_s5, [#allocation10], %s6380_s20, %s6380_s20, %s6381_s21  }
  0x67   :  { %s6386_s16 = smov [#allocation14]   ;;  %s6324_s19 = scalar_lea.hbm %s7600_s9, 2048 }
  0x68   :  { %s102_s2 = sshll.u32 %s6386_s16, 4  ;;  %p6325_p6 = scmp.ne.s32.totalorder %s7600_s9, %s6324_s19  ;;  %s103_s2 = int_to_ptr.vmem [resolvable:$true] %s102_s2 }
  0x69   :  { %p6328_p7 = scmp.lt.u32.totalorder %s6324_s19, %s7600_s9 }
  0x6b   :  { %p6330_p8 = pnand %p6328_p7, %p6325_p6 }
  0x6d   :  { %6333 = shalt.err (!%p6330_p8)
}
  0x6e   :  { %s6334_s25 = scalar_lea.vmem %s103_s2, 2048  ;;  %p6339_p10 = scmp.lt.s32.totalorder %s103_s2, %s103_s2 }
  0x6f   :  { %p6335_p9 = scmp.ne.s32.totalorder %s103_s2, %s6334_s25  ;;  %p6340_p11 = scmp.lt.s32.totalorder %s6334_s25, %s6334_s25 }
  0x71   :  { %p6341_p12 = por %p6340_p11, %p6339_p10 }
  0x73   :  { %p6342_p13 = pnand %p6341_p12, %p6335_p9 }
  0x75   :  { %6345 = shalt.err (!%p6342_p13)
}
  0x76   :  { %s6387_s6 = smov 128   ;;  %s6388_s20 = smov 8  }
  0x77   :  { %108 = dma.hbm_to_vmem [thread:$0]  %s7600_s9, 2048, %s103_s2, [#allocation13], %s6387_s6, %s6387_s6, %s6388_s20  }
  0x78   :  { %s6389_s27 = smov [#allocation15]   ;;  %s6346_s14 = scalar_lea.hbm %s7601_s10, 16 }
  0x79   :  { %s115_s8 = sshll.u32 %s6389_s27, 4  ;;  %p6347_p0 = scmp.ne.s32.totalorder %s7601_s10, %s6346_s14  ;;  %s116_s8 = int_to_ptr.vmem [resolvable:$true] %s115_s8 }
  0x7a   :  { %p6350_p1 = scmp.lt.u32.totalorder %s6346_s14, %s7601_s10 }
  0x7c   :  { %p6352_p2 = pnand %p6350_p1, %p6347_p0 }
  0x7e   :  { %6355 = shalt.err (!%p6352_p2)
}
  0x7f   :  { %s6356_s16 = scalar_lea.vmem %s116_s8, 16  ;;  %s6360_s9 = scalar_lea.vmem %s116_s8, 32 }
  0x80   :  { %p6357_p3 = scmp.ne.s32.totalorder %s116_s8, %s6356_s16  ;;  %p6361_p4 = scmp.lt.s32.totalorder %s116_s8, %s116_s8 }
  0x81   :  { %p6362_p5 = scmp.lt.s32.totalorder %s6360_s9, %s6356_s16 }
  0x83   :  { %p6363_p6 = por %p6362_p5, %p6361_p4 }
  0x85   :  { %p6364_p7 = pnand %p6363_p6, %p6357_p3 }
  0x87   :  { %6367 = shalt.err (!%p6364_p7)
}
  0x88   :  { %118 = dma.hbm_to_vmem [thread:$0]  %s7601_s10, 16, %s116_s8, [#allocation16]  }
  0x89   :  { %6368 = dma.done.wait [#allocation5], 6144  }
  0x8a   :  { %6369 = vsyncadd [#allocation5], 4294961152 }
  0x8b   :  { %6370 = dma.done.wait [#allocation7], 6160  }
  0x8c   :  { %6371 = vsyncadd [#allocation7], 4294961136 }
  0x8d   :  { %6372 = dma.done.wait [#allocation10], 12288  }
  0x8e   :  { %6373 = vsyncadd [#allocation10], 4294955008 }
  0x8f   :  { %6374 = dma.done.wait [#allocation13], 2064  }
  0x90   :  { %6375 = vsyncadd [#allocation13], 4294965232 }
  0x91   :  { %6376 = dma.done.wait [#allocation16], 16  }
  0x92   :  { %6377 = vsyncadd [#allocation16], 4294967280  ;;  %v6390_v0 = vmov 0.0   ;;  %v156_v1 = vld [vmem:[#allocation4 + $0x8] sm:$0xff]  ;;  %v159_v2 = vld [vmem:[#allocation4 + $0x20] sm:$0xff]  ;;  %vm6392_vm0 = vmmov 0  }
  0x93   :  { %284 = vmatprep.mubr.f32.mxu0 %v6390_v0  ;;  %v155_v3 = vld [vmem:[#allocation4] sm:$0xff]  ;;  %v4876_v4 = vpack.c.bf16 %v159_v2, %v156_v1  ;;  %v158_v5 = vld [vmem:[#allocation4 + $0x18] sm:$0xff]  ;;  %v165_v7 = vld [vmem:[#allocation4 + $0x50] sm:$0xff] }
  0x94   :  { %v162_v6 = vld [vmem:[#allocation4 + $0x38] sm:$0xff]  ;;  %v4878_v8 = vpack.c.bf16 %v158_v5, %v155_v3  ;;  %v161_v10 = vld [vmem:[#allocation4 + $0x30] sm:$0xff]  ;;  %v164_v11 = vld [vmem:[#allocation4 + $0x48] sm:$0xff] }
  0x95   :  { %v4880_v9 = vpack.c.bf16 %v165_v7, %v162_v6  ;;  %v168_v12 = vld [vmem:[#allocation4 + $0x68] sm:$0xff]  ;;  %4877 = vmatprep.subr.bf16.mxu0 %v4876_v4  ;;  %v171_v13 = vld [vmem:[#allocation4 + $0x80] sm:$0xff]  ;;  %v4882_v14 = vpack.c.bf16 %v164_v11, %v161_v10  ;;  %v170_v17 = vld [vmem:[#allocation4 + $0x78] sm:$0xff] }
  0x96   :  { %4879 = vmatpush1.bf16.msra.mxu0 %v4878_v8  ;;  %v4884_v15 = vpack.c.bf16 %v171_v13, %v168_v12  ;;  %v167_v16 = vld [vmem:[#allocation4 + $0x60] sm:$0xff]  ;;  %v174_v18 = vld [vmem:[#allocation4 + $0x98] sm:$0xff]  ;;  %v177_v19 = vld [vmem:[#allocation4 + $0xb0] sm:$0xff] }
  0x97   :  { %4881 = vmatprep.subr.bf16.mxu0 %v4880_v9  ;;  %v4886_v20 = vpack.c.bf16 %v170_v17, %v167_v16  ;;  %v173_v21 = vld [vmem:[#allocation4 + $0x90] sm:$0xff]  ;;  %v4888_v22 = vpack.c.bf16 %v177_v19, %v174_v18  ;;  %v176_v23 = vld [vmem:[#allocation4 + $0xa8] sm:$0xff]  ;;  %v183_v27 = vld [vmem:[#allocation4 + $0xe0] sm:$0xff] }
  0x98   :  { %v157_v24 = vld [vmem:[#allocation4 + $0x10] sm:$0xff]  ;;  %v160_v25 = vld [vmem:[#allocation4 + $0x28] sm:$0xff]  ;;  %v163_v29 = vld [vmem:[#allocation4 + $0x40] sm:$0xff]  ;;  %v4890_v31 = vpack.c.bf16 %v176_v23, %v173_v21 }
  0x99   :  { %v180_v26 = vld [vmem:[#allocation4 + $0xc8] sm:$0xff]  ;;  %v4908_v28 = vpack.c.bf16 %v160_v25, %v157_v24  ;;  %v166_v30 = vld [vmem:[#allocation4 + $0x58] sm:$0xff]  ;;  %v179_v32 = vld [vmem:[#allocation4 + $0xc0] sm:$0xff] }
  0x9a   :  { %4883 = vmatpush1.bf16.msra.mxu0 %v4882_v14  ;;  %v4912_v33 = vpack.c.bf16 %v166_v30, %v163_v29  ;;  %v4892_v34 = vpack.c.bf16 %v183_v27, %v180_v26  ;;  %v182_v35 = vld [vmem:[#allocation4 + $0xd8] sm:$0xff]  ;;  %v6596_v36 = vld [vmem:[%s7591_s0] sm:$0xff]  ;;  %v169_v37 = vld [vmem:[#allocation4 + $0x70] sm:$0xff] }
  0x9b   :  { %4885 = vmatprep.subr.bf16.mxu0 %v4884_v15  ;;  %4909 = vmatprep.subr.bf16.mxu1 %v4908_v28  ;;  %v186_v38 = vld [vmem:[#allocation4 + $0xf8] sm:$0xff]  ;;  %v189_v39 = vld [vmem:[#allocation4 + $0x110] sm:$0xff]  ;;  %v172_v40 = vld [vmem:[#allocation4 + $0x88] sm:$0xff]  ;;  %v4894_v42 = vpack.c.bf16 %v182_v35, %v179_v32 }
  0x9c   :  { %4911 = vmatpush3.bf16.msra.mxu1 %v4908_v28  ;;  %4190 = vmatprep.mubr.f32.mxu1 %v6596_v36  ;;  %v4916_v41 = vpack.c.bf16 %v172_v40, %v169_v37  ;;  %v175_v43 = vld [vmem:[#allocation4 + $0xa0] sm:$0xff]  ;;  %v178_v44 = vld [vmem:[#allocation4 + $0xb8] sm:$0xff]  ;;  %v4896_v45 = vpack.c.bf16 %v189_v39, %v186_v38  ;;  %v185_v46 = vld [vmem:[#allocation4 + $0xf0] sm:$0xff]  ;;  %v6391_v40 = vmov 0.0|0.0  }
  0x9d   :  { %4913 = vmatprep.subr.bf16.mxu1 %v4912_v33  ;;  %v188_v47 = vld [vmem:[#allocation4 + $0x108] sm:$0xff]  ;;  %v195_v49 = vld [vmem:[#allocation4 + $0x140] sm:$0xff]  ;;  %v4920_v50 = vpack.c.bf16 %v178_v44, %v175_v43  ;;  %v181_v51 = vld [vmem:[#allocation4 + $0xd0] sm:$0xff] }
  0x9e   :  { %4887 = vmatpush1.bf16.msra.mxu0 %v4886_v20  ;;  %v192_v48 = vld [vmem:[#allocation4 + $0x128] sm:$0xff]  ;;  %v4898_v53 = vpack.c.bf16 %v188_v47, %v185_v46  ;;  %v191_v55 = vld [vmem:[#allocation4 + $0x120] sm:$0xff]  ;;  %v194_v56 = vld [vmem:[#allocation4 + $0x138] sm:$0xff] }
  0x9f   :  { %4889 = vmatprep.subr.bf16.mxu0 %v4888_v22  ;;  %v184_v52 = vld [vmem:[#allocation4 + $0xe8] sm:$0xff]  ;;  %v4900_v54 = vpack.c.bf16 %v195_v49, %v192_v48  ;;  %v198_v57 = vld [vmem:[#allocation4 + $0x158] sm:$0xff]  ;;  %v201_v58 = vld [vmem:[#allocation4 + $0x170] sm:$0xff]  ;;  %v4902_v62 = vpack.c.bf16 %v194_v56, %v191_v55 }
  0xa0   :  { %4915 = vmatpush3.bf16.msra.mxu1 %v4912_v33  ;;  %v4924_v59 = vpack.c.bf16 %v184_v52, %v181_v51  ;;  %v187_v60 = vld [vmem:[#allocation4 + $0x100] sm:$0xff]  ;;  %v190_v61 = vld [vmem:[#allocation4 + $0x118] sm:$0xff]  ;;  %v4904_v63 = vpack.c.bf16 %v201_v58, %v198_v57  ;;  %v197_v1 = vld [vmem:[#allocation4 + $0x150] sm:$0xff] }
  0xa1   :  { %4917 = vmatprep.subr.bf16.mxu1 %v4916_v41  ;;  %v200_v2 = vld [vmem:[#allocation4 + $0x168] sm:$0xff]  ;;  %v466_v4 = vld [vmem:[#allocation6 + $0x20] sm:$0xff]  ;;  %v4928_v5 = vpack.c.bf16 %v190_v61, %v187_v60  ;;  %v193_v6 = vld [vmem:[#allocation4 + $0x130] sm:$0xff] }
  0xa2   :  { %4891 = vmatpush1.bf16.msra.mxu0 %v4890_v31  ;;  %v463_v3 = vld [vmem:[#allocation6 + $0x8] sm:$0xff]  ;;  %v4906_v8 = vpack.c.bf16 %v200_v2, %v197_v1  ;;  %v462_v10 = vld [vmem:[#allocation6] sm:$0xff]  ;;  %v465_v11 = vld [vmem:[#allocation6 + $0x18] sm:$0xff] }
  0xa3   :  { %4893 = vmatprep.subr.bf16.mxu0 %v4892_v34  ;;  %v196_v7 = vld [vmem:[#allocation4 + $0x148] sm:$0xff]  ;;  %v6599_v9 = vpack.c.bf16 %v466_v4, %v463_v3  ;;  %v469_v12 = vld [vmem:[#allocation6 + $0x38] sm:$0xff]  ;;  %v472_v13 = vld [vmem:[#allocation6 + $0x50] sm:$0xff]  ;;  %v6601_v17 = vpack.c.bf16 %v465_v11, %v462_v10 }
  0xa4   :  { %4919 = vmatpush3.bf16.msra.mxu1 %v4916_v41  ;;  %v4932_v14 = vpack.c.bf16 %v196_v7, %v193_v6  ;;  %v199_v15 = vld [vmem:[#allocation4 + $0x160] sm:$0xff]  ;;  %v202_v16 = vld [vmem:[#allocation4 + $0x178] sm:$0xff]  ;;  %v6604_v18 = vpack.c.bf16 %v472_v13, %v469_v12  ;;  %v468_v19 = vld [vmem:[#allocation6 + $0x30] sm:$0xff] }
  0xa5   :  { %4921 = vmatprep.subr.bf16.mxu1 %v4920_v50  ;;  %v471_v20 = vld [vmem:[#allocation6 + $0x48] sm:$0xff]  ;;  %v478_v22 = vld [vmem:[#allocation6 + $0x80] sm:$0xff]  ;;  %v4936_v23 = vpack.c.bf16 %v202_v16, %v199_v15  ;;  %v477_v28 = vld [vmem:[#allocation6 + $0x78] sm:$0xff] }
  0xa6   :  { %4895 = vmatpush1.bf16.msra.mxu0 %v4894_v42  ;;  %v475_v21 = vld [vmem:[#allocation6 + $0x68] sm:$0xff]  ;;  %v6612_v25 = vpack.c.bf16 %v471_v20, %v468_v19  ;;  %v474_v27 = vld [vmem:[#allocation6 + $0x60] sm:$0xff]  ;;  %v481_v29 = vld [vmem:[#allocation6 + $0x98] sm:$0xff] }
  0xa7   :  { %4897 = vmatprep.subr.bf16.mxu0 %v4896_v45  ;;  %v148_v24 = vld [vmem:[%s7591_s0 + $0x8] sm:$0xff]  ;;  %v6615_v26 = vpack.c.bf16 %v478_v22, %v475_v21  ;;  %v484_v30 = vld [vmem:[#allocation6 + $0xb0] sm:$0xff]  ;;  %v6622_v34 = vpack.c.bf16 %v477_v28, %v474_v27  ;;  %v490_v39 = vld [vmem:[#allocation6 + $0xe0] sm:$0xff] }
  0xa8   :  { %4923 = vmatpush3.bf16.msra.mxu1 %v4920_v50  ;;  %v464_v31 = vld [vmem:[#allocation6 + $0x10] sm:$0xff]  ;;  %v467_v32 = vld [vmem:[#allocation6 + $0x28] sm:$0xff]  ;;  %v6625_v35 = vpack.c.bf16 %v484_v30, %v481_v29  ;;  %v470_v42 = vld [vmem:[#allocation6 + $0x40] sm:$0xff] }
  0xa9   :  { %4925 = vmatprep.subr.bf16.mxu1 %v4924_v59  ;;  %v149_v33 = vld [vmem:[%s7591_s0 + $0x10] sm:$0xff]  ;;  %v483_v37 = vld [vmem:[#allocation6 + $0xa8] sm:$0xff]  ;;  %v6628_v41 = vpack.c.bf16 %v467_v32, %v464_v31  ;;  %v473_v43 = vld [vmem:[#allocation6 + $0x58] sm:$0xff] }
  0xaa   :  { %4899 = vmatpush1.bf16.msra.mxu0 %v4898_v53  ;;  %v487_v38 = vld [vmem:[#allocation6 + $0xc8] sm:$0xff]  ;;  %v150_v44 = vld [vmem:[%s7591_s0 + $0x18] sm:$0xff]  ;;  %v486_v47 = vld [vmem:[#allocation6 + $0xc0] sm:$0xff]  ;;  %v6641_v51 = vpack.c.bf16 %v473_v43, %v470_v42 }
  0xab   :  { %4901 = vmatprep.subr.bf16.mxu0 %v4900_v54  ;;  %v6638_v46 = vpack.c.bf16 %v490_v39, %v487_v38  ;;  %v489_v48 = vld [vmem:[#allocation6 + $0xd8] sm:$0xff]  ;;  %v496_v50 = vld [vmem:[#allocation6 + $0x110] sm:$0xff]  ;;  %v479_v53 = vld [vmem:[#allocation6 + $0x88] sm:$0xff] }
  0xac   :  { %4927 = vmatpush3.bf16.msra.mxu1 %v4924_v59  ;;  %v493_v49 = vld [vmem:[#allocation6 + $0xf8] sm:$0xff]  ;;  %v476_v52 = vld [vmem:[#allocation6 + $0x70] sm:$0xff]  ;;  %v151_v54 = vld [vmem:[%s7591_s0 + $0x20] sm:$0xff]  ;;  %v6649_v55 = vpack.c.bf16 %v489_v48, %v486_v47 }
  0xad   :  { %4929 = vmatprep.subr.bf16.mxu1 %v4928_v5  ;;  %v6652_v56 = vpack.c.bf16 %v496_v50, %v493_v49  ;;  %v492_v57 = vld [vmem:[#allocation6 + $0xf0] sm:$0xff]  ;;  %v495_v58 = vld [vmem:[#allocation6 + $0x108] sm:$0xff]  ;;  %v502_v60 = vld [vmem:[#allocation6 + $0x140] sm:$0xff]  ;;  %v6655_v61 = vpack.c.bf16 %v479_v53, %v476_v52 }
  0xae   :  { %4903 = vmatpush1.bf16.msra.mxu0 %v4902_v62  ;;  %v499_v59 = vld [vmem:[#allocation6 + $0x128] sm:$0xff]  ;;  %v482_v62 = vld [vmem:[#allocation6 + $0xa0] sm:$0xff]  ;;  %v6663_v2 = vpack.c.bf16 %v495_v58, %v492_v57  ;;  %v153_v3 = vld [vmem:[%s7591_s0 + $0x30] sm:$0xff] }
  0xaf   :  { %4905 = vmatprep.subr.bf16.mxu0 %v4904_v63  ;;  %v485_v63 = vld [vmem:[#allocation6 + $0xb8] sm:$0xff]  ;;  %v152_v1 = vld [vmem:[%s7591_s0 + $0x28] sm:$0xff]  ;;  %v6669_v4 = vpack.c.bf16 %v502_v60, %v499_v59  ;;  %v488_v11 = vld [vmem:[#allocation6 + $0xd0] sm:$0xff] }
  0xb0   :  { %4931 = vmatpush3.bf16.msra.mxu1 %v4928_v5  ;;  %v498_v5 = vld [vmem:[#allocation6 + $0x120] sm:$0xff]  ;;  %v501_v6 = vld [vmem:[#allocation6 + $0x138] sm:$0xff]  ;;  %v6672_v10 = vpack.c.bf16 %v485_v63, %v482_v62  ;;  %v491_v12 = vld [vmem:[#allocation6 + $0xe8] sm:$0xff] }
  0xb1   :  { %4933 = vmatprep.subr.bf16.mxu1 %v4932_v14  ;;  %v505_v7 = vld [vmem:[#allocation6 + $0x158] sm:$0xff]  ;;  %v6677_v13 = vpack.c.bf16 %v501_v6, %v498_v5  ;;  %v504_v16 = vld [vmem:[#allocation6 + $0x150] sm:$0xff]  ;;  %v507_v19 = vld [vmem:[#allocation6 + $0x168] sm:$0xff]  ;;  %v6686_v20 = vpack.c.bf16 %v491_v12, %v488_v11 }
  0xb2   :  { %4907 = vmatpush1.bf16.msra.mxu0 %v4906_v8  ;;  %v508_v8 = vld [vmem:[#allocation6 + $0x170] sm:$0xff]  ;;  %v494_v21 = vld [vmem:[#allocation6 + $0x100] sm:$0xff]  ;;  %v497_v22 = vld [vmem:[#allocation6 + $0x118] sm:$0xff] }
  0xb3   :  { %4941 = vmatprep.subr.bf16.mxu0 %v6599_v9  ;;  %v6683_v15 = vpack.c.bf16 %v508_v8, %v505_v7  ;;  %v500_v27 = vld [vmem:[#allocation6 + $0x130] sm:$0xff]  ;;  %v503_v28 = vld [vmem:[#allocation6 + $0x148] sm:$0xff]  ;;  %v506_v30 = vld [vmem:[#allocation6 + $0x160] sm:$0xff] }
  0xb4   :  { %4935 = vmatpush3.bf16.msra.mxu1 %v4932_v14  ;;  %v154_v14 = vld [vmem:[%s7591_s0 + $0x38] sm:$0xff]  ;;  %v6704_v29 = vpack.c.bf16 %v503_v28, %v500_v27  ;;  %v203_v38 = vld [vmem:[%s7594_s3] sm:$0x7] }
  0xb5   :  { %285 = vmatmul.mubr.f32.vlgmr.msra.gmra.mrb[0].mxu0 %v6596_v36  ;;  %4937 = vmatprep.subr.bf16.mxu1 %v4936_v23  ;;  %v480_v36 = vld [vmem:[#allocation6 + $0x90] sm:$0xff]  ;;  %v509_v31 = vld [vmem:[#allocation6 + $0x178] sm:$0xff]  ;;  %v6784_v28 = vld [vmem:[#allocation8] ss:$0 sm:$0xff] }
  0xb6   :  { %4943 = vmatpush1.bf16.msra.mxu0 %v6601_v17  ;;  %290 = vmatprep.mubr.f32.mxu0 %v6390_v0  ;;  %v6635_v45 = vpack.c.bf16 %v483_v37, %v480_v36  ;;  %v6712_v32 = vpack.c.bf16 %v509_v31, %v506_v30 }
  0xb7   :  { %4945 = vmatprep.subr.bf16.mxu0 %v6604_v18 }
  0xb8   :  { %4939 = vmatpush3.bf16.msra.mxu1 %v4936_v23  ;;  %v6693_v23 = vpack.c.bf16 %v507_v19, %v504_v16 }
  0xb9   :  { %291 = vmatmul.mubr.f32.gmra.mrb[2].mxu0 %v148_v24  ;;  %4972 = vmatprep.subr.bf16.mxu1 %v6391_v40 }
  0xba   :  { %4947 = vmatpush1.bf16.msra.mxu0 %v6612_v25  ;;  %296 = vmatprep.mubr.f32.mxu0 %v6390_v0 }
  0xbb   :  { %4949 = vmatprep.subr.bf16.mxu0 %v6615_v26  ;;  %4191 = vmatmul.mubr.f32.vlgmr.msra.gmra.mrb[0].mxu1 %v148_v24  ;;  %v6697_v24 = vpack.c.bf16 %v497_v22, %v494_v21 }
  0xbc   :  { %4974 = vmatpush3.bf16.msra.mxu1 %v6628_v41  ;;  %4193 = vmatprep.mubr.f32.mxu1 %v149_v33 }
  0xbd   :  { %297 = vmatmul.mubr.f32.gmra.mrb[4].mxu0 %v149_v33  ;;  %4975 = vmatprep.subr.bf16.mxu1 %v6391_v40  ;;  %v205_v33 = vlaneseq }
  0xbe   :  { %4951 = vmatpush1.bf16.msra.mxu0 %v6622_v34  ;;  %302 = vmatprep.mubr.f32.mxu0 %v6390_v0 }
  0xbf   :  { %4953 = vmatprep.subr.bf16.mxu0 %v6625_v35  ;;  %4194 = vmatmul.mubr.f32.gmra.mrb[2].mxu1 %v150_v44  ;;  %v6750_v36 = vshrl.u32 %v205_v33, 7 }
  0xc0   :  { %4977 = vmatpush3.bf16.msra.mxu1 %v6641_v51  ;;  %4196 = vmatprep.mubr.f32.mxu1 %v151_v54 }
  0xc1   :  { %303 = vmatmul.mubr.f32.gmra.mrb[6].mxu0 %v150_v44  ;;  %4978 = vmatprep.subr.bf16.mxu1 %v6391_v40  ;;  %v215_v37 = vsub.s32 2, %v6750_v36  ;;  %v207_v63 = vsub.s32 0, %v6750_v36 }
  0xc2   :  { %4955 = vmatpush1.bf16.msra.mxu0 %v6635_v45  ;;  %308 = vmatprep.mubr.f32.mxu0 %v6390_v0 }
  0xc3   :  { %4957 = vmatprep.subr.bf16.mxu0 %v6638_v46  ;;  %4197 = vmatmul.mubr.f32.gmra.mrb[4].mxu1 %v152_v1  ;;  %v216_v39 = vrot.slane %v203_v38, %v215_v37 }
  0xc4   :  { %4980 = vmatpush3.bf16.msra.mxu1 %v6655_v61  ;;  %4199 = vmatprep.mubr.f32.mxu1 %v153_v3 }
  0xc5   :  { %309 = vmatmul.mubr.f32.gmra.mrb[8].mxu0 %v151_v54  ;;  %4981 = vmatprep.subr.bf16.mxu1 %v6391_v40 }
  0xc6   :  { %4959 = vmatpush1.bf16.msra.mxu0 %v6649_v55  ;;  %314 = vmatprep.mubr.f32.mxu0 %v6390_v0 }
  0xc7   :  { %4961 = vmatprep.subr.bf16.mxu0 %v6652_v56  ;;  %4200 = vmatmul.mubr.f32.gmra.mrb[6].mxu1 %v154_v14 }
  0xc8   :  { %4983 = vmatpush3.bf16.msra.mxu1 %v6672_v10  ;;  %4234 = vmatprep.mubr.msk.f32.mxu1 %vm6392_vm0, %v6390_v0 }
  0xc9   :  { %315 = vmatmul.mubr.f32.gmra.mrb[10].mxu0 %v152_v1  ;;  %4984 = vmatprep.subr.bf16.mxu1 %v6391_v40  ;;  %v211_v1 = vsub.s32 1, %v6750_v36 }
  0xca   :  { %4963 = vmatpush1.bf16.msra.mxu0 %v6663_v2  ;;  %320 = vmatprep.mubr.f32.mxu0 %v6390_v0 }
  0xcb   :  { %4965 = vmatprep.subr.bf16.mxu0 %v6669_v4  ;;  %v6780_v6 = vrot.slane %v203_v38, %v211_v1 }
  0xcc   :  { %4986 = vmatpush3.bf16.msra.mxu1 %v6686_v20 }
  0xcd   :  { %321 = vmatmul.mubr.f32.gmra.mrb[12].mxu0 %v153_v3  ;;  %4987 = vmatprep.subr.bf16.mxu1 %v6391_v40  ;;  %v6776_v3 = vrot.slane %v203_v38, %v207_v63 }
  0xce   :  { %4967 = vmatpush1.bf16.msra.mxu0 %v6677_v13  ;;  %326 = vmatprep.mubr.f32.mxu0 %v6390_v0 }
  0xcf   :  { %4969 = vmatprep.subr.bf16.mxu0 %v6683_v15 }
  0xd0   :  { %4989 = vmatpush3.bf16.msra.mxu1 %v6697_v24 }
  0xd1   :  { %327 = vmatmul.mubr.f32.gmra.mrb[14].mxu0 %v154_v14  ;;  %4990 = vmatprep.subr.bf16.mxu1 %v6391_v40 }
  0xd2   :  { %4971 = vmatpush1.bf16.msra.mxu0 %v6693_v23  ;;  %584 = vmatprep.mubr.f32.mxu0 %v6390_v0 }
  0xd3   :  { %4997 = vmatprep.subr.bf16.mxu0 %v6599_v9 }
  0xd4   :  { %4992 = vmatpush3.bf16.msra.mxu1 %v6704_v29 }
  0xd5   :  { %585 = vmatmul.mubr.f32.vlgmr.msra.gmra.mrb[0].mxu0 %v6390_v0  ;;  %4993 = vmatprep.subr.bf16.mxu1 %v6391_v40 }
  0xd6   :  { %4999 = vmatpush1.bf16.msra.mxu0 %v6601_v17  ;;  %752 = vmatprep.mubr.f32.mxu0 %v6390_v0 }
  0xd7   :  { %5001 = vmatprep.subr.bf16.mxu0 %v6604_v18 }
  0xd8   :  { %4995 = vmatpush3.bf16.msra.mxu1 %v6712_v32 }
  0xd9   :  { %5028 = vmatprep.subr.bf16.mxu1 %v6391_v40 }
  0xda   :  { %5003 = vmatpush1.bf16.msra.mxu0 %v6612_v25 }
  0xdb   :  { %5005 = vmatprep.subr.bf16.mxu0 %v6615_v26  ;;  %4235 = vmatmul.mubr.f32.vlgmr.msra.gmra.mrb[8].mxu1 %v6390_v0 }
  0xdc   :  { %5030 = vmatpush3.bf16.msra.mxu1 %v6628_v41  ;;  %4269 = vmatprep.mubr.msk.f32.mxu1 %vm6392_vm0, %v6390_v0 }
  0xdd   :  { %5031 = vmatprep.subr.bf16.mxu1 %v6391_v40 }
  0xde   :  { %5007 = vmatpush1.bf16.msra.mxu0 %v6622_v34 }
  0xdf   :  { %5009 = vmatprep.subr.bf16.mxu0 %v6625_v35 }
  0xe0   :  { %5033 = vmatpush3.bf16.msra.mxu1 %v6641_v51 }
  0xe1   :  { %5034 = vmatprep.subr.bf16.mxu1 %v6391_v40 }
  0xe2   :  { %5011 = vmatpush1.bf16.msra.mxu0 %v6635_v45 }
  0xe3   :  { %5013 = vmatprep.subr.bf16.mxu0 %v6638_v46 }
  0xe4   :  { %5036 = vmatpush3.bf16.msra.mxu1 %v6655_v61 }
  0xe5   :  { %5037 = vmatprep.subr.bf16.mxu1 %v6391_v40 }
  0xe6   :  { %5015 = vmatpush1.bf16.msra.mxu0 %v6649_v55 }
  0xe7   :  { %5017 = vmatprep.subr.bf16.mxu0 %v6652_v56 }
  0xe8   :  { %5039 = vmatpush3.bf16.msra.mxu1 %v6672_v10 }
  0xe9   :  { %5040 = vmatprep.subr.bf16.mxu1 %v6391_v40 }
  0xea   :  { %5019 = vmatpush1.bf16.msra.mxu0 %v6663_v2 }
  0xeb   :  { %5021 = vmatprep.subr.bf16.mxu0 %v6669_v4 }
  0xec   :  { %5042 = vmatpush3.bf16.msra.mxu1 %v6686_v20 }
  0xed   :  { %5043 = vmatprep.subr.bf16.mxu1 %v6391_v40 }
  0xee   :  { %5023 = vmatpush1.bf16.msra.mxu0 %v6677_v13 }
  0xef   :  { %5025 = vmatprep.subr.bf16.mxu0 %v6683_v15 }
  0xf0   :  { %5045 = vmatpush3.bf16.msra.mxu1 %v6697_v24 }
  0xf1   :  { %5046 = vmatprep.subr.bf16.mxu1 %v6391_v40 }
  0xf2   :  { %5027 = vmatpush1.bf16.msra.mxu0 %v6693_v23 }
  0xf3   :  { %5053 = vmatprep.subr.bf16.mxu0 %v6599_v9 }
  0xf4   :  { %5048 = vmatpush3.bf16.msra.mxu1 %v6704_v29 }
  0xf5   :  { %5049 = vmatprep.subr.bf16.mxu1 %v6391_v40 }
  0xf8   :  { %5051 = vmatpush3.bf16.msra.mxu1 %v6712_v32 }
  0xf9   :  { %5084 = vmatprep.subr.bf16.mxu1 %v6391_v40 }
 0x18e   :  { %v4192_v42 = vpop.f32.mrb[0].mxu1 }
 0x18f   :  { %v6758_v43 = vadd.f32 %v4192_v42, %v216_v39  ;;  %v399_v44 = vpop.f32.mrb[1].mxu1 }
 0x190   :  { %v400_v38 = vadd.f32 %v399_v44, %v216_v39 }
 0x192   :  { %v4195_v47 = vpop.f32.mrb[2].mxu1 }
 0x193   :  { %v6760_v48 = vadd.f32 %v4195_v47, %v216_v39  ;;  %v409_v49 = vpop.f32.mrb[3].mxu1 }
 0x194   :  { %v6762_v50 = vadd.f32 %v409_v49, %v216_v39 }
 0x196   :  { %v4198_v52 = vpop.f32.mrb[4].mxu1 }
 0x197   :  { %v6764_v53 = vadd.f32 %v4198_v52, %v216_v39  ;;  %v419_v54 = vpop.f32.mrb[5].mxu1 }
 0x198   :  { %v6766_v57 = vadd.f32 %v419_v54, %v216_v39 }
 0x19a   :  { %v4201_v58 = vpop.f32.mrb[6].mxu1 }
 0x19b   :  { %v6768_v59 = vadd.f32 %v4201_v58, %v216_v39  ;;  %v429_v60 = vpop.f32.mrb[7].mxu1 }
 0x19c   :  { %v6770_v62 = vadd.f32 %v429_v60, %v216_v39 }
 0x1a8   :  { %v586_v5 = vpop.f32.mrb[0].mxu0 }
 0x1a9   :  { %v5948_v7 = vadd.f32 %v586_v5, %v6776_v3  ;;  %v588_v8 = vpop.f32.mrb[1].mxu0 }
 0x1aa   :  { %v5949_v12 = vadd.f32 %v588_v8, %v6780_v6 }
 0x1ab   :  { %v3768_v11 = vmul.f32 -1.442695, %v5948_v7 }
 0x1ac   :  { %v3769_v14 = vmul.f32 -1.442695, %v5949_v12 }
 0x1ad   :  { %6027 = vpow2.f32 %v3768_v11 }
 0x1ae   :  { %v657_v16 = vpop.f32.mrb[8].mxu1  ;;  %6029 = vpow2.f32 %v3769_v14 }
 0x1af   :  { %v4236_v19 = vpop.f32.mrb[9].mxu1  ;;  %v675_v31 = vadd.f32 %v6784_v28, %v657_v16 }
 0x1b7   :  { %v6028_v21 = vpop.eup %6027 }
 0x1b8   :  { %v665_v22 = vadd.f32 1.0, %v6028_v21  ;;  %v6030_v27 = vpop.eup %6029 }
 0x1b9   :  { %v672_v30 = vadd.f32 1.0, %v6030_v27 }
 0x1ba   :  { %6031 = vrcp.f32 %v665_v22 }
 0x1bb   :  { %6033 = vrcp.f32 %v672_v30 }
 0x1c4   :  { %v6032_v33 = vpop.eup %6031 }
 0x1c5   :  { %v676_v42 = vmul.f32 %v6032_v33, %v675_v31  ;;  %v6034_v49 = vpop.eup %6033 }
 0x1c6   :  { %v679_v52 = vsub.f32 1.0, %v6034_v49  ;;  %v681_v60 = vmul.f32 0.0, %v6034_v49 }
 0x1c7   :  { %v677_v47 = vadd.f32 %v676_v42, %v400_v38 }
 0x1c9   :  { %6035 = vtanh.f32 %v677_v47 }
 0x1d3   :  { %v6036_v54 = vpop.eup %6035 }
 0x1d4   :  { %v680_v58 = vmul.f32 %v6036_v54, %v679_v52 }
 0x1d6   :  { %v6787_v5 = vadd.f32 %v681_v60, %v680_v58 }
 0x1d8   :  { %753 = vmatmul.mubr.f32.vlgmr.msra.gmra.mrb[2].mxu0 %v6787_v5  ;;  %4270 = vmatmul.mubr.f32.vlgmr.msra.gmra.mrb[10].mxu1 %v6787_v5 }
 0x1d9   :  { %5055 = vmatpush1.bf16.msra.mxu0 %v6601_v17  ;;  %5086 = vmatpush3.bf16.msra.mxu1 %v6628_v41 }
 0x1da   :  { %5057 = vmatprep.subr.bf16.mxu0 %v6604_v18  ;;  %5087 = vmatprep.subr.bf16.mxu1 %v6391_v40 }
 0x1db   :  { %921 = vmatprep.mubr.f32.mxu0 %v6390_v0  ;;  %4304 = vmatprep.mubr.msk.f32.mxu1 %vm6392_vm0, %v6390_v0 }
 0x1dd   :  { %5059 = vmatpush1.bf16.msra.mxu0 %v6612_v25  ;;  %5089 = vmatpush3.bf16.msra.mxu1 %v6641_v51 }
 0x1de   :  { %5061 = vmatprep.subr.bf16.mxu0 %v6615_v26  ;;  %5090 = vmatprep.subr.bf16.mxu1 %v6391_v40 }
 0x1e1   :  { %5063 = vmatpush1.bf16.msra.mxu0 %v6622_v34  ;;  %5092 = vmatpush3.bf16.msra.mxu1 %v6655_v61 }
 0x1e2   :  { %5065 = vmatprep.subr.bf16.mxu0 %v6625_v35  ;;  %5093 = vmatprep.subr.bf16.mxu1 %v6391_v40 }
 0x1e5   :  { %5067 = vmatpush1.bf16.msra.mxu0 %v6635_v45  ;;  %5095 = vmatpush3.bf16.msra.mxu1 %v6672_v10 }
 0x1e6   :  { %5069 = vmatprep.subr.bf16.mxu0 %v6638_v46  ;;  %5096 = vmatprep.subr.bf16.mxu1 %v6391_v40 }
 0x1e9   :  { %5071 = vmatpush1.bf16.msra.mxu0 %v6649_v55  ;;  %5098 = vmatpush3.bf16.msra.mxu1 %v6686_v20 }
 0x1ea   :  { %5073 = vmatprep.subr.bf16.mxu0 %v6652_v56  ;;  %5099 = vmatprep.subr.bf16.mxu1 %v6391_v40 }
 0x1ed   :  { %5075 = vmatpush1.bf16.msra.mxu0 %v6663_v2  ;;  %5101 = vmatpush3.bf16.msra.mxu1 %v6697_v24 }
 0x1ee   :  { %5077 = vmatprep.subr.bf16.mxu0 %v6669_v4  ;;  %5102 = vmatprep.subr.bf16.mxu1 %v6391_v40 }
 0x1f1   :  { %5079 = vmatpush1.bf16.msra.mxu0 %v6677_v13  ;;  %5104 = vmatpush3.bf16.msra.mxu1 %v6704_v29 }
 0x1f2   :  { %5081 = vmatprep.subr.bf16.mxu0 %v6683_v15  ;;  %5105 = vmatprep.subr.bf16.mxu1 %v6391_v40 }
 0x1f5   :  { %5083 = vmatpush1.bf16.msra.mxu0 %v6693_v23  ;;  %5107 = vmatpush3.bf16.msra.mxu1 %v6712_v32 }
 0x1f6   :  { %5109 = vmatprep.subr.bf16.mxu0 %v6599_v9  ;;  %5140 = vmatprep.subr.bf16.mxu1 %v6391_v40 }
 0x2ab   :  { %v754_v39 = vpop.f32.mrb[2].mxu0  ;;  %v825_v44 = vpop.f32.mrb[10].mxu1 }
 0x2ac   :  { %v5950_v7 = vadd.f32 %v754_v39, %v6776_v3  ;;  %v756_v8 = vpop.f32.mrb[3].mxu0  ;;  %v4271_v11 = vpop.f32.mrb[11].mxu1  ;;  %v843_v30 = vadd.f32 %v6784_v28, %v825_v44 }
 0x2ad   :  { %v5951_v14 = vadd.f32 %v756_v8, %v6780_v6 }
 0x2ae   :  { %v3770_v12 = vmul.f32 -1.442695, %v5950_v7 }
 0x2af   :  { %v3771_v16 = vmul.f32 -1.442695, %v5951_v14 }
 0x2b0   :  { %6037 = vpow2.f32 %v3770_v12 }
 0x2b1   :  { %6039 = vpow2.f32 %v3771_v16 }
 0x2ba   :  { %v6038_v19 = vpop.eup %6037 }
 0x2bb   :  { %v833_v21 = vadd.f32 1.0, %v6038_v19  ;;  %v6040_v22 = vpop.eup %6039 }
 0x2bc   :  { %v840_v27 = vadd.f32 1.0, %v6040_v22 }
 0x2bd   :  { %6041 = vrcp.f32 %v833_v21 }
 0x2be   :  { %6043 = vrcp.f32 %v840_v27 }
 0x2c7   :  { %v6042_v31 = vpop.eup %6041 }
 0x2c8   :  { %v844_v33 = vmul.f32 %v6042_v31, %v843_v30  ;;  %v6044_v42 = vpop.eup %6043 }
 0x2c9   :  { %v847_v47 = vsub.f32 1.0, %v6044_v42  ;;  %v849_v54 = vmul.f32 %v6044_v42, %v6787_v5 }
 0x2ca   :  { %v845_v38 = vadd.f32 %v844_v33, %v6758_v43 }
 0x2cc   :  { %6045 = vtanh.f32 %v845_v38 }
 0x2d6   :  { %v6046_v49 = vpop.eup %6045 }
 0x2d7   :  { %v848_v52 = vmul.f32 %v6046_v49, %v847_v47 }
 0x2d9   :  { %v6831_v58 = vadd.f32 %v849_v54, %v848_v52 }
 0x2db   :  { %922 = vmatmul.mubr.f32.vlgmr.msra.gmra.mrb[4].mxu0 %v6831_v58  ;;  %4305 = vmatmul.mubr.f32.vlgmr.msra.gmra.mrb[12].mxu1 %v6831_v58 }
 0x2dc   :  { %5111 = vmatpush1.bf16.msra.mxu0 %v6601_v17  ;;  %5142 = vmatpush3.bf16.msra.mxu1 %v6628_v41 }
 0x2dd   :  { %5113 = vmatprep.subr.bf16.mxu0 %v6604_v18  ;;  %5143 = vmatprep.subr.bf16.mxu1 %v6391_v40 }
 0x2de   :  { %1090 = vmatprep.mubr.f32.mxu0 %v6390_v0  ;;  %4339 = vmatprep.mubr.msk.f32.mxu1 %vm6392_vm0, %v6390_v0 }
 0x2e0   :  { %5115 = vmatpush1.bf16.msra.mxu0 %v6612_v25  ;;  %5145 = vmatpush3.bf16.msra.mxu1 %v6641_v51 }
 0x2e1   :  { %5117 = vmatprep.subr.bf16.mxu0 %v6615_v26  ;;  %5146 = vmatprep.subr.bf16.mxu1 %v6391_v40 }
 0x2e4   :  { %5119 = vmatpush1.bf16.msra.mxu0 %v6622_v34  ;;  %5148 = vmatpush3.bf16.msra.mxu1 %v6655_v61 }
 0x2e5   :  { %5121 = vmatprep.subr.bf16.mxu0 %v6625_v35  ;;  %5149 = vmatprep.subr.bf16.mxu1 %v6391_v40 }
 0x2e8   :  { %5123 = vmatpush1.bf16.msra.mxu0 %v6635_v45  ;;  %5151 = vmatpush3.bf16.msra.mxu1 %v6672_v10 }
 0x2e9   :  { %5125 = vmatprep.subr.bf16.mxu0 %v6638_v46  ;;  %5152 = vmatprep.subr.bf16.mxu1 %v6391_v40 }
 0x2ec   :  { %5127 = vmatpush1.bf16.msra.mxu0 %v6649_v55  ;;  %5154 = vmatpush3.bf16.msra.mxu1 %v6686_v20 }
 0x2ed   :  { %5129 = vmatprep.subr.bf16.mxu0 %v6652_v56  ;;  %5155 = vmatprep.subr.bf16.mxu1 %v6391_v40 }
 0x2f0   :  { %5131 = vmatpush1.bf16.msra.mxu0 %v6663_v2  ;;  %5157 = vmatpush3.bf16.msra.mxu1 %v6697_v24 }
 0x2f1   :  { %5133 = vmatprep.subr.bf16.mxu0 %v6669_v4  ;;  %5158 = vmatprep.subr.bf16.mxu1 %v6391_v40 }
 0x2f4   :  { %5135 = vmatpush1.bf16.msra.mxu0 %v6677_v13  ;;  %5160 = vmatpush3.bf16.msra.mxu1 %v6704_v29 }
 0x2f5   :  { %5137 = vmatprep.subr.bf16.mxu0 %v6683_v15  ;;  %5161 = vmatprep.subr.bf16.mxu1 %v6391_v40 }
 0x2f8   :  { %5139 = vmatpush1.bf16.msra.mxu0 %v6693_v23  ;;  %5163 = vmatpush3.bf16.msra.mxu1 %v6712_v32 }
 0x2f9   :  { %5165 = vmatprep.subr.bf16.mxu0 %v6599_v9  ;;  %5196 = vmatprep.subr.bf16.mxu1 %v6391_v40 }
 0x3ae   :  { %v923_v43 = vpop.f32.mrb[4].mxu0  ;;  %v994_v60 = vpop.f32.mrb[12].mxu1 }
 0x3af   :  { %v5952_v39 = vadd.f32 %v923_v43, %v6776_v3  ;;  %v925_v44 = vpop.f32.mrb[5].mxu0  ;;  %v4306_v7 = vpop.f32.mrb[13].mxu1  ;;  %v1012_v22 = vadd.f32 %v6784_v28, %v994_v60 }
 0x3b0   :  { %v5953_v11 = vadd.f32 %v925_v44, %v6780_v6 }
 0x3b1   :  { %v3772_v8 = vmul.f32 -1.442695, %v5952_v39 }
 0x3b2   :  { %v3773_v12 = vmul.f32 -1.442695, %v5953_v11 }
 0x3b3   :  { %6047 = vpow2.f32 %v3772_v8 }
 0x3b4   :  { %6049 = vpow2.f32 %v3773_v12 }
 0x3bd   :  { %v6048_v14 = vpop.eup %6047 }
 0x3be   :  { %v1002_v16 = vadd.f32 1.0, %v6048_v14  ;;  %v6050_v19 = vpop.eup %6049 }
 0x3bf   :  { %v1009_v21 = vadd.f32 1.0, %v6050_v19 }
 0x3c0   :  { %6051 = vrcp.f32 %v1002_v16 }
 0x3c1   :  { %6053 = vrcp.f32 %v1009_v21 }
 0x3ca   :  { %v6052_v27 = vpop.eup %6051 }
 0x3cb   :  { %v1013_v30 = vmul.f32 %v6052_v27, %v1012_v22  ;;  %v6054_v33 = vpop.eup %6053 }
 0x3cc   :  { %v1016_v38 = vsub.f32 1.0, %v6054_v33  ;;  %v1018_v49 = vmul.f32 %v6054_v33, %v6831_v58 }
 0x3cd   :  { %v1014_v31 = vadd.f32 %v1013_v30, %v6762_v50 }
 0x3cf   :  { %6055 = vtanh.f32 %v1014_v31 }
 0x3d9   :  { %v6056_v42 = vpop.eup %6055 }
 0x3da   :  { %v1017_v47 = vmul.f32 %v6056_v42, %v1016_v38 }
 0x3dc   :  { %v6875_v52 = vadd.f32 %v1018_v49, %v1017_v47 }
 0x3de   :  { %1091 = vmatmul.mubr.f32.vlgmr.msra.gmra.mrb[6].mxu0 %v6875_v52  ;;  %4340 = vmatmul.mubr.f32.vlgmr.msra.gmra.mrb[14].mxu1 %v6875_v52 }
 0x3df   :  { %5167 = vmatpush1.bf16.msra.mxu0 %v6601_v17  ;;  %5198 = vmatpush3.bf16.msra.mxu1 %v6628_v41 }
 0x3e0   :  { %5169 = vmatprep.subr.bf16.mxu0 %v6604_v18  ;;  %5199 = vmatprep.subr.bf16.mxu1 %v6391_v40 }
 0x3e1   :  { %1259 = vmatprep.mubr.f32.mxu0 %v6390_v0  ;;  %4374 = vmatprep.mubr.msk.f32.mxu1 %vm6392_vm0, %v6390_v0 }
 0x3e3   :  { %5171 = vmatpush1.bf16.msra.mxu0 %v6612_v25  ;;  %5201 = vmatpush3.bf16.msra.mxu1 %v6641_v51 }
 0x3e4   :  { %5173 = vmatprep.subr.bf16.mxu0 %v6615_v26  ;;  %5202 = vmatprep.subr.bf16.mxu1 %v6391_v40 }
 0x3e7   :  { %5175 = vmatpush1.bf16.msra.mxu0 %v6622_v34  ;;  %5204 = vmatpush3.bf16.msra.mxu1 %v6655_v61 }
 0x3e8   :  { %5177 = vmatprep.subr.bf16.mxu0 %v6625_v35  ;;  %5205 = vmatprep.subr.bf16.mxu1 %v6391_v40 }
 0x3eb   :  { %5179 = vmatpush1.bf16.msra.mxu0 %v6635_v45  ;;  %5207 = vmatpush3.bf16.msra.mxu1 %v6672_v10 }
 0x3ec   :  { %5181 = vmatprep.subr.bf16.mxu0 %v6638_v46  ;;  %5208 = vmatprep.subr.bf16.mxu1 %v6391_v40 }
 0x3ef   :  { %5183 = vmatpush1.bf16.msra.mxu0 %v6649_v55  ;;  %5210 = vmatpush3.bf16.msra.mxu1 %v6686_v20 }
 0x3f0   :  { %5185 = vmatprep.subr.bf16.mxu0 %v6652_v56  ;;  %5211 = vmatprep.subr.bf16.mxu1 %v6391_v40 }
 0x3f3   :  { %5187 = vmatpush1.bf16.msra.mxu0 %v6663_v2  ;;  %5213 = vmatpush3.bf16.msra.mxu1 %v6697_v24 }
 0x3f4   :  { %5189 = vmatprep.subr.bf16.mxu0 %v6669_v4  ;;  %5214 = vmatprep.subr.bf16.mxu1 %v6391_v40 }
 0x3f7   :  { %5191 = vmatpush1.bf16.msra.mxu0 %v6677_v13  ;;  %5216 = vmatpush3.bf16.msra.mxu1 %v6704_v29 }
 0x3f8   :  { %5193 = vmatprep.subr.bf16.mxu0 %v6683_v15  ;;  %5217 = vmatprep.subr.bf16.mxu1 %v6391_v40 }
 0x3fb   :  { %5195 = vmatpush1.bf16.msra.mxu0 %v6693_v23  ;;  %5219 = vmatpush3.bf16.msra.mxu1 %v6712_v32 }
 0x3fc   :  { %5221 = vmatprep.subr.bf16.mxu0 %v6599_v9  ;;  %5252 = vmatprep.subr.bf16.mxu1 %v6391_v40 }
 0x4b1   :  { %v1092_v50 = vpop.f32.mrb[6].mxu0  ;;  %v1163_v54 = vpop.f32.mrb[14].mxu1 }
 0x4b2   :  { %v5954_v43 = vadd.f32 %v1092_v50, %v6776_v3  ;;  %v1094_v60 = vpop.f32.mrb[7].mxu0  ;;  %v4341_v39 = vpop.f32.mrb[15].mxu1  ;;  %v1181_v19 = vadd.f32 %v6784_v28, %v1163_v54 }
 0x4b3   :  { %v5955_v7 = vadd.f32 %v1094_v60, %v6780_v6 }
 0x4b4   :  { %v3774_v44 = vmul.f32 -1.442695, %v5954_v43 }
 0x4b5   :  { %v3775_v8 = vmul.f32 -1.442695, %v5955_v7 }
 0x4b6   :  { %6057 = vpow2.f32 %v3774_v44 }
 0x4b7   :  { %6059 = vpow2.f32 %v3775_v8 }
 0x4c0   :  { %v6058_v11 = vpop.eup %6057 }
 0x4c1   :  { %v1171_v12 = vadd.f32 1.0, %v6058_v11  ;;  %v6060_v14 = vpop.eup %6059 }
 0x4c2   :  { %v1178_v16 = vadd.f32 1.0, %v6060_v14 }
 0x4c3   :  { %6061 = vrcp.f32 %v1171_v12 }
 0x4c4   :  { %6063 = vrcp.f32 %v1178_v16 }
 0x4cd   :  { %v6062_v21 = vpop.eup %6061 }
 0x4ce   :  { %v1182_v22 = vmul.f32 %v6062_v21, %v1181_v19  ;;  %v6064_v30 = vpop.eup %6063 }
 0x4cf   :  { %v1185_v31 = vsub.f32 1.0, %v6064_v30  ;;  %v1187_v42 = vmul.f32 %v6064_v30, %v6875_v52 }
 0x4d0   :  { %v1183_v27 = vadd.f32 %v1182_v22, %v6760_v48 }
 0x4d2   :  { %6065 = vtanh.f32 %v1183_v27 }
 0x4dc   :  { %v6066_v33 = vpop.eup %6065 }
 0x4dd   :  { %v1186_v38 = vmul.f32 %v6066_v33, %v1185_v31 }
 0x4df   :  { %v6919_v47 = vadd.f32 %v1187_v42, %v1186_v38 }
 0x4e1   :  { %1260 = vmatmul.mubr.f32.vlgmr.msra.gmra.mrb[8].mxu0 %v6919_v47  ;;  %4375 = vmatmul.mubr.f32.vlgmr.msra.gmra.mrb[16].mxu1 %v6919_v47 }
 0x4e2   :  { %5223 = vmatpush1.bf16.msra.mxu0 %v6601_v17  ;;  %5254 = vmatpush3.bf16.msra.mxu1 %v6628_v41 }
 0x4e3   :  { %5225 = vmatprep.subr.bf16.mxu0 %v6604_v18  ;;  %5255 = vmatprep.subr.bf16.mxu1 %v6391_v40 }
 0x4e4   :  { %1428 = vmatprep.mubr.f32.mxu0 %v6390_v0  ;;  %4409 = vmatprep.mubr.msk.f32.mxu1 %vm6392_vm0, %v6390_v0 }
 0x4e6   :  { %5227 = vmatpush1.bf16.msra.mxu0 %v6612_v25  ;;  %5257 = vmatpush3.bf16.msra.mxu1 %v6641_v51 }
 0x4e7   :  { %5229 = vmatprep.subr.bf16.mxu0 %v6615_v26  ;;  %5258 = vmatprep.subr.bf16.mxu1 %v6391_v40 }
 0x4ea   :  { %5231 = vmatpush1.bf16.msra.mxu0 %v6622_v34  ;;  %5260 = vmatpush3.bf16.msra.mxu1 %v6655_v61 }
 0x4eb   :  { %5233 = vmatprep.subr.bf16.mxu0 %v6625_v35  ;;  %5261 = vmatprep.subr.bf16.mxu1 %v6391_v40 }
 0x4ee   :  { %5235 = vmatpush1.bf16.msra.mxu0 %v6635_v45  ;;  %5263 = vmatpush3.bf16.msra.mxu1 %v6672_v10 }
 0x4ef   :  { %5237 = vmatprep.subr.bf16.mxu0 %v6638_v46  ;;  %5264 = vmatprep.subr.bf16.mxu1 %v6391_v40 }
 0x4f2   :  { %5239 = vmatpush1.bf16.msra.mxu0 %v6649_v55  ;;  %5266 = vmatpush3.bf16.msra.mxu1 %v6686_v20 }
 0x4f3   :  { %5241 = vmatprep.subr.bf16.mxu0 %v6652_v56  ;;  %5267 = vmatprep.subr.bf16.mxu1 %v6391_v40 }
 0x4f6   :  { %5243 = vmatpush1.bf16.msra.mxu0 %v6663_v2  ;;  %5269 = vmatpush3.bf16.msra.mxu1 %v6697_v24 }
 0x4f7   :  { %5245 = vmatprep.subr.bf16.mxu0 %v6669_v4  ;;  %5270 = vmatprep.subr.bf16.mxu1 %v6391_v40 }
 0x4fa   :  { %5247 = vmatpush1.bf16.msra.mxu0 %v6677_v13  ;;  %5272 = vmatpush3.bf16.msra.mxu1 %v6704_v29 }
 0x4fb   :  { %5249 = vmatprep.subr.bf16.mxu0 %v6683_v15  ;;  %5273 = vmatprep.subr.bf16.mxu1 %v6391_v40 }
 0x4fe   :  { %5251 = vmatpush1.bf16.msra.mxu0 %v6693_v23  ;;  %5275 = vmatpush3.bf16.msra.mxu1 %v6712_v32 }
 0x4ff   :  { %5277 = vmatprep.subr.bf16.mxu0 %v6599_v9  ;;  %5308 = vmatprep.subr.bf16.mxu1 %v6391_v40 }
 0x5b4   :  { %v1261_v48 = vpop.f32.mrb[8].mxu0  ;;  %v1332_v49 = vpop.f32.mrb[16].mxu1 }
 0x5b5   :  { %v5956_v50 = vadd.f32 %v1261_v48, %v6776_v3  ;;  %v1263_v54 = vpop.f32.mrb[9].mxu0  ;;  %v4376_v43 = vpop.f32.mrb[17].mxu1  ;;  %v1350_v14 = vadd.f32 %v6784_v28, %v1332_v49 }
 0x5b6   :  { %v5957_v39 = vadd.f32 %v1263_v54, %v6780_v6 }
 0x5b7   :  { %v3776_v60 = vmul.f32 -1.442695, %v5956_v50 }
 0x5b8   :  { %v3777_v44 = vmul.f32 -1.442695, %v5957_v39 }
 0x5b9   :  { %6067 = vpow2.f32 %v3776_v60 }
 0x5ba   :  { %6069 = vpow2.f32 %v3777_v44 }
 0x5c3   :  { %v6068_v7 = vpop.eup %6067 }
 0x5c4   :  { %v1340_v8 = vadd.f32 1.0, %v6068_v7  ;;  %v6070_v11 = vpop.eup %6069 }
 0x5c5   :  { %v1347_v12 = vadd.f32 1.0, %v6070_v11 }
 0x5c6   :  { %6071 = vrcp.f32 %v1340_v8 }
 0x5c7   :  { %6073 = vrcp.f32 %v1347_v12 }
 0x5d0   :  { %v6072_v16 = vpop.eup %6071 }
 0x5d1   :  { %v1351_v19 = vmul.f32 %v6072_v16, %v1350_v14  ;;  %v6074_v22 = vpop.eup %6073 }
 0x5d2   :  { %v1354_v27 = vsub.f32 1.0, %v6074_v22  ;;  %v1356_v33 = vmul.f32 %v6074_v22, %v6919_v47 }
 0x5d3   :  { %v1352_v21 = vadd.f32 %v1351_v19, %v6766_v57 }
 0x5d5   :  { %6075 = vtanh.f32 %v1352_v21 }
 0x5df   :  { %v6076_v30 = vpop.eup %6075 }
 0x5e0   :  { %v1355_v31 = vmul.f32 %v6076_v30, %v1354_v27 }
 0x5e2   :  { %v6963_v38 = vadd.f32 %v1356_v33, %v1355_v31  ;;  %v1875_v31 = vld [vmem:[#allocation9] sm:$0xff]  ;;  %v1878_v33 = vld [vmem:[#allocation9 + $0x18] sm:$0xff] }
 0x5e4   :  { %1429 = vmatmul.mubr.f32.vlgmr.msra.gmra.mrb[10].mxu0 %v6963_v38  ;;  %4410 = vmatmul.mubr.f32.vlgmr.msra.gmra.mrb[18].mxu1 %v6963_v38 }
 0x5e5   :  { %5279 = vmatpush1.bf16.msra.mxu0 %v6601_v17  ;;  %5310 = vmatpush3.bf16.msra.mxu1 %v6628_v41 }
 0x5e6   :  { %5281 = vmatprep.subr.bf16.mxu0 %v6604_v18  ;;  %5311 = vmatprep.subr.bf16.mxu1 %v6391_v40 }
 0x5e7   :  { %1597 = vmatprep.mubr.f32.mxu0 %v6390_v0  ;;  %4444 = vmatprep.mubr.msk.f32.mxu1 %vm6392_vm0, %v6390_v0 }
 0x5e9   :  { %5283 = vmatpush1.bf16.msra.mxu0 %v6612_v25  ;;  %5313 = vmatpush3.bf16.msra.mxu1 %v6641_v51 }
 0x5ea   :  { %5285 = vmatprep.subr.bf16.mxu0 %v6615_v26  ;;  %5314 = vmatprep.subr.bf16.mxu1 %v6391_v40 }
 0x5ed   :  { %5287 = vmatpush1.bf16.msra.mxu0 %v6622_v34  ;;  %5316 = vmatpush3.bf16.msra.mxu1 %v6655_v61 }
 0x5ee   :  { %5289 = vmatprep.subr.bf16.mxu0 %v6625_v35  ;;  %5317 = vmatprep.subr.bf16.mxu1 %v6391_v40 }
 0x5f1   :  { %5291 = vmatpush1.bf16.msra.mxu0 %v6635_v45  ;;  %5319 = vmatpush3.bf16.msra.mxu1 %v6672_v10 }
 0x5f2   :  { %5293 = vmatprep.subr.bf16.mxu0 %v6638_v46  ;;  %5320 = vmatprep.subr.bf16.mxu1 %v6391_v40 }
 0x5f5   :  { %5295 = vmatpush1.bf16.msra.mxu0 %v6649_v55  ;;  %5322 = vmatpush3.bf16.msra.mxu1 %v6686_v20 }
 0x5f6   :  { %5297 = vmatprep.subr.bf16.mxu0 %v6652_v56  ;;  %5323 = vmatprep.subr.bf16.mxu1 %v6391_v40 }
 0x5f9   :  { %5299 = vmatpush1.bf16.msra.mxu0 %v6663_v2  ;;  %5325 = vmatpush3.bf16.msra.mxu1 %v6697_v24 }
 0x5fa   :  { %5301 = vmatprep.subr.bf16.mxu0 %v6669_v4  ;;  %5326 = vmatprep.subr.bf16.mxu1 %v6391_v40 }
 0x5fd   :  { %5303 = vmatpush1.bf16.msra.mxu0 %v6677_v13  ;;  %5328 = vmatpush3.bf16.msra.mxu1 %v6704_v29 }
 0x5fe   :  { %5305 = vmatprep.subr.bf16.mxu0 %v6683_v15  ;;  %5329 = vmatprep.subr.bf16.mxu1 %v6391_v40 }
 0x601   :  { %5307 = vmatpush1.bf16.msra.mxu0 %v6693_v23  ;;  %5331 = vmatpush3.bf16.msra.mxu1 %v6712_v32 }
 0x602   :  { %5333 = vmatprep.subr.bf16.mxu0 %v6599_v9  ;;  %5364 = vmatprep.subr.bf16.mxu1 %v6391_v40 }
 0x6b7   :  { %v1430_v57 = vpop.f32.mrb[10].mxu0  ;;  %v1501_v42 = vpop.f32.mrb[18].mxu1 }
 0x6b8   :  { %v5958_v48 = vadd.f32 %v1430_v57, %v6776_v3  ;;  %v1432_v49 = vpop.f32.mrb[11].mxu0  ;;  %v4411_v50 = vpop.f32.mrb[19].mxu1  ;;  %v1519_v9 = vadd.f32 %v6784_v28, %v1501_v42  ;;  %v1882_v42 = vld [vmem:[#allocation9 + $0x38] sm:$0xff] }
 0x6b9   :  { %v5959_v43 = vadd.f32 %v1432_v49, %v6780_v6 }
 0x6ba   :  { %v3778_v54 = vmul.f32 -1.442695, %v5958_v48  ;;  %v1885_v48 = vld [vmem:[#allocation9 + $0x50] sm:$0xff] }
 0x6bb   :  { %v3779_v60 = vmul.f32 -1.442695, %v5959_v43  ;;  %v1886_v43 = vld [vmem:[#allocation9 + $0x58] sm:$0xff] }
 0x6bc   :  { %6077 = vpow2.f32 %v3778_v54  ;;  %v1883_v54 = vld [vmem:[#allocation9 + $0x40] sm:$0xff] }
 0x6bd   :  { %6079 = vpow2.f32 %v3779_v60  ;;  %v5390_v60 = vpack.c.bf16 %v1878_v33, %v1875_v31  ;;  %v1905_v31 = vld [vmem:[#allocation9 + $0xf0] sm:$0xff]  ;;  %v1908_v33 = vld [vmem:[#allocation9 + $0x108] sm:$0xff] }
 0x6c6   :  { %v6078_v39 = vpop.eup %6077 }
 0x6c7   :  { %v1509_v44 = vadd.f32 1.0, %v6078_v39  ;;  %v6080_v7 = vpop.eup %6079  ;;  %v5392_v39 = vpack.c.bf16 %v1885_v48, %v1882_v42  ;;  %v1915_v42 = vld [vmem:[#allocation9 + $0x140] sm:$0xff]  ;;  %v1913_v48 = vld [vmem:[#allocation9 + $0x130] sm:$0xff] }
 0x6c8   :  { %v1516_v8 = vadd.f32 1.0, %v6080_v7  ;;  %v1884_v7 = vld [vmem:[#allocation9 + $0x48] sm:$0xff] }
 0x6c9   :  { %6081 = vrcp.f32 %v1509_v44  ;;  %v1881_v44 = vld [vmem:[#allocation9 + $0x30] sm:$0xff] }
 0x6ca   :  { %6083 = vrcp.f32 %v1516_v8  ;;  %v5424_v8 = vpack.c.bf16 %v1886_v43, %v1883_v54 }
 0x6d3   :  { %v6082_v11 = vpop.eup %6081 }
 0x6d4   :  { %v1520_v12 = vmul.f32 %v6082_v11, %v1519_v9  ;;  %v6084_v16 = vpop.eup %6083  ;;  %v1891_v9 = vld [vmem:[#allocation9 + $0x80] sm:$0xff]  ;;  %v1889_v11 = vld [vmem:[#allocation9 + $0x70] sm:$0xff] }
 0x6d5   :  { %v1523_v19 = vsub.f32 1.0, %v6084_v16  ;;  %v1525_v27 = vmul.f32 %v6084_v16, %v6963_v38 }
 0x6d6   :  { %v1521_v14 = vadd.f32 %v1520_v12, %v6764_v53  ;;  %v1892_v12 = vld [vmem:[#allocation9 + $0x88] sm:$0xff] }
 0x6d8   :  { %6085 = vtanh.f32 %v1521_v14  ;;  %v5394_v14 = vpack.c.bf16 %v1884_v7, %v1881_v44  ;;  %v1918_v44 = vld [vmem:[#allocation9 + $0x158] sm:$0xff]  ;;  %v1921_v7 = vld [vmem:[#allocation9 + $0x170] sm:$0xff] }
 0x6e2   :  { %v6086_v21 = vpop.eup %6085 }
 0x6e3   :  { %v1524_v22 = vmul.f32 %v6086_v21, %v1523_v19  ;;  %v5428_v19 = vpack.c.bf16 %v1892_v12, %v1889_v11  ;;  %v1887_v21 = vld [vmem:[#allocation9 + $0x60] sm:$0xff]  ;;  %v5416_v11 = vpack.c.bf16 %v1921_v7, %v1918_v44  ;;  %v2225_v7 = vld [vmem:[#allocation11 + $0x158] sm:$0xff] }
 0x6e5   :  { %v7007_v30 = vadd.f32 %v1525_v27, %v1524_v22  ;;  %v1890_v22 = vld [vmem:[#allocation9 + $0x78] sm:$0xff] }
 0x6e6   :  { %v1894_v27 = vld [vmem:[#allocation9 + $0x98] sm:$0xff] }
 0x6e7   :  { %1598 = vmatmul.mubr.f32.vlgmr.msra.gmra.mrb[12].mxu0 %v7007_v30  ;;  %4445 = vmatmul.mubr.f32.vlgmr.msra.gmra.mrb[20].mxu1 %v7007_v30 }
 0x6e8   :  { %5335 = vmatpush1.bf16.msra.mxu0 %v6601_v17  ;;  %5366 = vmatpush3.bf16.msra.mxu1 %v6628_v41  ;;  %v1876_v17 = vld [vmem:[#allocation9 + $0x8] sm:$0xff] }
 0x6e9   :  { %5337 = vmatprep.subr.bf16.mxu0 %v6604_v18  ;;  %5367 = vmatprep.subr.bf16.mxu1 %v6391_v40  ;;  %v1879_v18 = vld [vmem:[#allocation9 + $0x20] sm:$0xff] }
 0x6ea   :  { %1766 = vmatprep.mubr.f32.mxu0 %v6390_v0  ;;  %4479 = vmatprep.mubr.msk.f32.mxu1 %vm6392_vm0, %v6390_v0 }
 0x6ec   :  { %5339 = vmatpush1.bf16.msra.mxu0 %v6612_v25  ;;  %5369 = vmatpush3.bf16.msra.mxu1 %v6641_v51  ;;  %v1877_v25 = vld [vmem:[#allocation9 + $0x10] sm:$0xff] }
 0x6ed   :  { %5341 = vmatprep.subr.bf16.mxu0 %v6615_v26  ;;  %5370 = vmatprep.subr.bf16.mxu1 %v6391_v40  ;;  %v5388_v26 = vpack.c.bf16 %v1879_v18, %v1876_v17  ;;  %v1897_v17 = vld [vmem:[#allocation9 + $0xb0] sm:$0xff]  ;;  %v1895_v18 = vld [vmem:[#allocation9 + $0xa0] sm:$0xff] }
 0x6f0   :  { %5343 = vmatpush1.bf16.msra.mxu0 %v6622_v34  ;;  %5372 = vmatpush3.bf16.msra.mxu1 %v6655_v61  ;;  %v1880_v34 = vld [vmem:[#allocation9 + $0x28] sm:$0xff] }
 0x6f1   :  { %5345 = vmatprep.subr.bf16.mxu0 %v6625_v35  ;;  %5373 = vmatprep.subr.bf16.mxu1 %v6391_v40  ;;  %v5420_v35 = vpack.c.bf16 %v1880_v34, %v1877_v25  ;;  %v1898_v25 = vld [vmem:[#allocation9 + $0xb8] sm:$0xff]  ;;  %v5400_v34 = vpack.c.bf16 %v1897_v17, %v1894_v27  ;;  %v2188_v17 = vld [vmem:[#allocation11 + $0x30] sm:$0xff] }
 0x6f4   :  { %5347 = vmatpush1.bf16.msra.mxu0 %v6635_v45  ;;  %5375 = vmatpush3.bf16.msra.mxu1 %v6672_v10 }
 0x6f5   :  { %5349 = vmatprep.subr.bf16.mxu0 %v6638_v46  ;;  %5376 = vmatprep.subr.bf16.mxu1 %v6391_v40 }
 0x6f8   :  { %5351 = vmatpush1.bf16.msra.mxu0 %v6649_v55  ;;  %5378 = vmatpush3.bf16.msra.mxu1 %v6686_v20 }
 0x6f9   :  { %5353 = vmatprep.subr.bf16.mxu0 %v6652_v56  ;;  %5379 = vmatprep.subr.bf16.mxu1 %v6391_v40 }
 0x6fc   :  { %5355 = vmatpush1.bf16.msra.mxu0 %v6663_v2  ;;  %5381 = vmatpush3.bf16.msra.mxu1 %v6697_v24 }
 0x6fd   :  { %5357 = vmatprep.subr.bf16.mxu0 %v6669_v4  ;;  %5382 = vmatprep.subr.bf16.mxu1 %v6391_v40 }
 0x700   :  { %5359 = vmatpush1.bf16.msra.mxu0 %v6677_v13  ;;  %5384 = vmatpush3.bf16.msra.mxu1 %v6704_v29 }
 0x701   :  { %5361 = vmatprep.subr.bf16.mxu0 %v6683_v15  ;;  %5385 = vmatprep.subr.bf16.mxu1 %v6391_v40 }
 0x704   :  { %5363 = vmatpush1.bf16.msra.mxu0 %v6693_v23  ;;  %5387 = vmatpush3.bf16.msra.mxu1 %v6712_v32 }
 0x705   :  { %5389 = vmatprep.subr.bf16.mxu0 %v5388_v26  ;;  %5421 = vmatprep.subr.bf16.mxu1 %v5420_v35  ;;  %v5398_v26 = vpack.c.bf16 %v1890_v22, %v1887_v21  ;;  %v2182_v21 = vld [vmem:[#allocation11] sm:$0xff] }
 0x7ba   :  { %v1599_v41 = vpop.f32.mrb[12].mxu0  ;;  %v1670_v45 = vpop.f32.mrb[20].mxu1 }
 0x7bb   :  { %v5960_v46 = vadd.f32 %v1599_v41, %v6776_v3  ;;  %v1601_v51 = vpop.f32.mrb[13].mxu0  ;;  %v4446_v55 = vpop.f32.mrb[21].mxu1  ;;  %v1688_v20 = vadd.f32 %v6784_v28, %v1670_v45  ;;  %v1893_v41 = vld [vmem:[#allocation9 + $0x90] sm:$0xff]  ;;  %v1896_v45 = vld [vmem:[#allocation9 + $0xa8] sm:$0xff] }
 0x7bc   :  { %v5961_v61 = vadd.f32 %v1601_v51, %v6780_v6  ;;  %v1903_v51 = vld [vmem:[#allocation9 + $0xe0] sm:$0xff]  ;;  %v1901_v55 = vld [vmem:[#allocation9 + $0xd0] sm:$0xff] }
 0x7bd   :  { %v3780_v56 = vmul.f32 -1.442695, %v5960_v46  ;;  %v1900_v46 = vld [vmem:[#allocation9 + $0xc8] sm:$0xff] }
 0x7be   :  { %v3781_v2 = vmul.f32 -1.442695, %v5961_v61  ;;  %v5402_v61 = vpack.c.bf16 %v1896_v45, %v1893_v41  ;;  %v2194_v41 = vld [vmem:[#allocation11 + $0x60] sm:$0xff]  ;;  %v2197_v45 = vld [vmem:[#allocation11 + $0x78] sm:$0xff] }
 0x7bf   :  { %6087 = vpow2.f32 %v3780_v56  ;;  %v1904_v56 = vld [vmem:[#allocation9 + $0xe8] sm:$0xff] }
 0x7c0   :  { %6089 = vpow2.f32 %v3781_v2  ;;  %v5404_v2 = vpack.c.bf16 %v1903_v51, %v1900_v46  ;;  %v7090_v46 = vpack.c.bf16 %v2197_v45, %v2194_v41  ;;  %v2201_v51 = vld [vmem:[#allocation11 + $0x98] sm:$0xff] }
 0x7c1   :  { %v2217_v41 = vld [vmem:[#allocation11 + $0x118] sm:$0xff] }
 0x7c9   :  { %v6088_v4 = vpop.eup %6087 }
 0x7ca   :  { %v1678_v10 = vadd.f32 1.0, %v6088_v4  ;;  %v6090_v13 = vpop.eup %6089  ;;  %v5436_v4 = vpack.c.bf16 %v1904_v56, %v1901_v55  ;;  %v2204_v55 = vld [vmem:[#allocation11 + $0xb0] sm:$0xff] }
 0x7cb   :  { %v1685_v15 = vadd.f32 1.0, %v6090_v13  ;;  %v1902_v13 = vld [vmem:[#allocation9 + $0xd8] sm:$0xff]  ;;  %v7094_v56 = vpack.c.bf16 %v2204_v55, %v2201_v51  ;;  %v2220_v51 = vld [vmem:[#allocation11 + $0x130] sm:$0xff]  ;;  %v2223_v55 = vld [vmem:[#allocation11 + $0x148] sm:$0xff] }
 0x7cc   :  { %6091 = vrcp.f32 %v1678_v10  ;;  %v1899_v10 = vld [vmem:[#allocation9 + $0xc0] sm:$0xff] }
 0x7cd   :  { %6093 = vrcp.f32 %v1685_v15  ;;  %v1906_v15 = vld [vmem:[#allocation9 + $0xf8] sm:$0xff] }
 0x7d6   :  { %v6092_v23 = vpop.eup %6091 }
 0x7d7   :  { %v1689_v24 = vmul.f32 %v6092_v23, %v1688_v20  ;;  %v6094_v32 = vpop.eup %6093  ;;  %v1909_v20 = vld [vmem:[#allocation9 + $0x110] sm:$0xff]  ;;  %v1907_v23 = vld [vmem:[#allocation9 + $0x100] sm:$0xff] }
 0x7d8   :  { %v1692_v53 = vsub.f32 1.0, %v6094_v32  ;;  %v1694_v50 = vmul.f32 %v6094_v32, %v7007_v30  ;;  %v5408_v32 = vpack.c.bf16 %v1909_v20, %v1906_v15  ;;  %v2206_v20 = vld [vmem:[#allocation11 + $0xc0] sm:$0xff] }
 0x7d9   :  { %v1690_v29 = vadd.f32 %v1689_v24, %v6770_v62  ;;  %v1888_v62 = vld [vmem:[#allocation9 + $0x68] sm:$0xff]  ;;  %v1910_v24 = vld [vmem:[#allocation9 + $0x118] sm:$0xff] }
 0x7da   :  { %v5396_v16 = vpack.c.bf16 %v1891_v9, %v1888_v62  ;;  %v1919_v62 = vld [vmem:[#allocation9 + $0x160] sm:$0xff] }
 0x7db   :  { %6095 = vtanh.f32 %v1690_v29  ;;  %v5406_v29 = vpack.c.bf16 %v1902_v13, %v1899_v10  ;;  %v2207_v10 = vld [vmem:[#allocation11 + $0xc8] sm:$0xff]  ;;  %v2210_v13 = vld [vmem:[#allocation11 + $0xe0] sm:$0xff] }
 0x7dc   :  { %v7100_v15 = vpack.c.bf16 %v2210_v13, %v2207_v10  ;;  %v2229_v10 = vld [vmem:[#allocation11 + $0x178] sm:$0xff] }
 0x7e5   :  { %v6096_v57 = vpop.eup %6095 }
 0x7e6   :  { %v1693_v49 = vmul.f32 %v6096_v57, %v1692_v53  ;;  %v5440_v53 = vpack.c.bf16 %v1910_v24, %v1907_v23  ;;  %v1912_v57 = vld [vmem:[#allocation9 + $0x128] sm:$0xff]  ;;  %v2209_v23 = vld [vmem:[#allocation11 + $0xd8] sm:$0xff] }
 0x7e7   :  { %v5412_v54 = vpack.c.bf16 %v1915_v42, %v1912_v57  ;;  %v7102_v24 = vpack.c.bf16 %v2209_v23, %v2206_v20  ;;  %v2219_v42 = vld [vmem:[#allocation11 + $0x128] sm:$0xff] }
 0x7e8   :  { %v7049_v28 = vadd.f32 %v1694_v50, %v1693_v49  ;;  %v1916_v49 = vld [vmem:[#allocation9 + $0x148] sm:$0xff]  ;;  %v5410_v50 = vpack.c.bf16 %v1908_v33, %v1905_v31  ;;  %v2212_v31 = vld [vmem:[#allocation11 + $0xf0] sm:$0xff] }
 0x7e9   :  { %v5444_v43 = vpack.c.bf16 %v1916_v49, %v1913_v48  ;;  %v2215_v33 = vld [vmem:[#allocation11 + $0x108] sm:$0xff]  ;;  %v2222_v48 = vld [vmem:[#allocation11 + $0x140] sm:$0xff] }
 0x7ea   :  { %1767 = vmatmul.mubr.f32.vlgmr.msra.gmra.mrb[14].mxu0 %v7049_v28  ;;  %4480 = vmatmul.mubr.f32.vlgmr.msra.gmra.mrb[22].mxu1 %v7049_v28  ;;  %v7108_v57 = vpack.c.bf16 %v2215_v33, %v2212_v31  ;;  %v2218_v49 = vld [vmem:[#allocation11 + $0x120] sm:$0xff] }
 0x7eb   :  { %5391 = vmatpush1.bf16.msra.mxu0 %v5390_v60  ;;  %5423 = vmatpush3.bf16.msra.mxu1 %v5420_v35  ;;  %v5432_v35 = vpack.c.bf16 %v1898_v25, %v1895_v18  ;;  %v1911_v60 = vld [vmem:[#allocation9 + $0x120] sm:$0xff]  ;;  %v2191_v18 = vld [vmem:[#allocation11 + $0x48] sm:$0xff] }
 0x7ec   :  { %4514 = vmatprep.mubr.f32.mxu1 %v6787_v5  ;;  %5393 = vmatprep.subr.bf16.mxu0 %v5392_v39  ;;  %v1914_v39 = vld [vmem:[#allocation9 + $0x138] sm:$0xff]  ;;  %v7084_v25 = vpack.c.bf16 %v2191_v18, %v2188_v17  ;;  %v2208_v17 = vld [vmem:[#allocation11 + $0xd0] sm:$0xff]  ;;  %v2211_v18 = vld [vmem:[#allocation11 + $0xe8] sm:$0xff] }
 0x7ed   :  { %5425 = vmatprep.subr.bf16.mxu1 %v5424_v8  ;;  %2004 = vmatprep.mubr.f32.mxu0 %v6390_v0  ;;  %v5414_v9 = vpack.c.bf16 %v1914_v39, %v1911_v60  ;;  %v2187_v60 = vld [vmem:[#allocation11 + $0x28] sm:$0xff] }
 0x7ef   :  { %5395 = vmatpush1.bf16.msra.mxu0 %v5394_v14  ;;  %5427 = vmatpush3.bf16.msra.mxu1 %v5424_v8  ;;  %v1922_v8 = vld [vmem:[#allocation9 + $0x178] sm:$0xff]  ;;  %v1917_v14 = vld [vmem:[#allocation9 + $0x150] sm:$0xff] }
 0x7f0   :  { %5397 = vmatprep.subr.bf16.mxu0 %v5396_v16  ;;  %5429 = vmatprep.subr.bf16.mxu1 %v5428_v19  ;;  %v5448_v12 = vpack.c.bf16 %v1922_v8, %v1919_v62  ;;  %v1920_v16 = vld [vmem:[#allocation9 + $0x168] sm:$0xff]  ;;  %v2228_v62 = vld [vmem:[#allocation11 + $0x170] sm:$0xff] }
 0x7f1   :  { %v7121_v8 = vpack.c.bf16 %v2228_v62, %v2225_v7  ;;  %v6191_v7 = vld [vmem:[#allocation8] ss:$0 sm:$0xff] }
 0x7f3   :  { %5399 = vmatpush1.bf16.msra.mxu0 %v5398_v26  ;;  %5431 = vmatpush3.bf16.msra.mxu1 %v5428_v19  ;;  %v5418_v19 = vpack.c.bf16 %v1920_v16, %v1917_v14  ;;  %v2195_v26 = vld [vmem:[#allocation11 + $0x68] sm:$0xff]  ;;  %v2190_v14 = vld [vmem:[#allocation11 + $0x40] sm:$0xff]  ;;  %v2193_v16 = vld [vmem:[#allocation11 + $0x58] sm:$0xff] }
 0x7f4   :  { %5401 = vmatprep.subr.bf16.mxu0 %v5400_v34  ;;  %5433 = vmatprep.subr.bf16.mxu1 %v5432_v35  ;;  %v2198_v34 = vld [vmem:[#allocation11 + $0x80] sm:$0xff] }
 0x7f7   :  { %5403 = vmatpush1.bf16.msra.mxu0 %v5402_v61  ;;  %5435 = vmatpush3.bf16.msra.mxu1 %v5432_v35  ;;  %v7088_v35 = vpack.c.bf16 %v2198_v34, %v2195_v26  ;;  %v2200_v61 = vld [vmem:[#allocation11 + $0x90] sm:$0xff]  ;;  %v7140_v26 = vpack.c.bf16 %v2211_v18, %v2208_v17  ;;  %v2214_v34 = vld [vmem:[#allocation11 + $0x100] sm:$0xff] }
 0x7f8   :  { %5405 = vmatprep.subr.bf16.mxu0 %v5404_v2  ;;  %5437 = vmatprep.subr.bf16.mxu1 %v5436_v4  ;;  %v2203_v2 = vld [vmem:[#allocation11 + $0xa8] sm:$0xff]  ;;  %v7144_v45 = vpack.c.bf16 %v2217_v41, %v2214_v34 }
 0x7fb   :  { %5407 = vmatpush1.bf16.msra.mxu0 %v5406_v29  ;;  %5439 = vmatpush3.bf16.msra.mxu1 %v5436_v4  ;;  %v7096_v4 = vpack.c.bf16 %v2203_v2, %v2200_v61  ;;  %v2213_v29 = vld [vmem:[#allocation11 + $0xf8] sm:$0xff]  ;;  %v7148_v61 = vpack.c.bf16 %v2223_v55, %v2220_v51  ;;  %v2226_v2 = vld [vmem:[#allocation11 + $0x160] sm:$0xff] }
 0x7fc   :  { %5409 = vmatprep.subr.bf16.mxu0 %v5408_v32  ;;  %5441 = vmatprep.subr.bf16.mxu1 %v5440_v53  ;;  %v2216_v32 = vld [vmem:[#allocation11 + $0x110] sm:$0xff]  ;;  %v7152_v13 = vpack.c.bf16 %v2229_v10, %v2226_v2 }
 0x7ff   :  { %5411 = vmatpush1.bf16.msra.mxu0 %v5410_v50  ;;  %5443 = vmatpush3.bf16.msra.mxu1 %v5440_v53  ;;  %v7106_v53 = vpack.c.bf16 %v2216_v32, %v2213_v29  ;;  %v7112_v50 = vpack.c.bf16 %v2222_v48, %v2219_v42 }
 0x800   :  { %5413 = vmatprep.subr.bf16.mxu0 %v5412_v54  ;;  %5445 = vmatprep.subr.bf16.mxu1 %v5444_v43  ;;  %v2221_v54 = vld [vmem:[#allocation11 + $0x138] sm:$0xff] }
 0x801   :  { %v7114_v39 = vpack.c.bf16 %v2221_v54, %v2218_v49 }
 0x803   :  { %5415 = vmatpush1.bf16.msra.mxu0 %v5414_v9  ;;  %5447 = vmatpush3.bf16.msra.mxu1 %v5444_v43  ;;  %v2184_v43 = vld [vmem:[#allocation11 + $0x10] sm:$0xff] }
 0x804   :  { %5417 = vmatprep.subr.bf16.mxu0 %v5416_v11  ;;  %5449 = vmatprep.subr.bf16.mxu1 %v5448_v12  ;;  %v7116_v44 = vpack.c.bf16 %v2187_v60, %v2184_v43  ;;  %v2224_v9 = vld [vmem:[#allocation11 + $0x150] sm:$0xff]  ;;  %v2227_v11 = vld [vmem:[#allocation11 + $0x168] sm:$0xff] }
 0x807   :  { %5419 = vmatpush1.bf16.msra.mxu0 %v5418_v19  ;;  %5451 = vmatpush3.bf16.msra.mxu1 %v5448_v12  ;;  %v7124_v12 = vpack.c.bf16 %v2227_v11, %v2224_v9  ;;  %v7127_v19 = vpack.c.bf16 %v2193_v16, %v2190_v14 }
 0x808   :  { %5484 = vmatprep.subr.bf16.mxu1 %v6391_v40 }
 0x80a   :  { %2005 = vmatmul.mubr.f32.vlgmr.msra.gmra.mrb[16].mxu0 %v6787_v5  ;;  %4515 = vmatmul.mubr.f32.vlgmr.msra.gmra.mrb[24].mxu1 %v6831_v58  ;;  %v2183_v5 = vld [vmem:[#allocation11 + $0x8] sm:$0xff] }
 0x80b   :  { %4517 = vmatprep.mubr.f32.mxu1 %v6875_v52  ;;  %2010 = vmatprep.mubr.f32.mxu0 %v6390_v0 }
 0x80c   :  { %5486 = vmatpush3.bf16.msra.mxu1 %v7116_v44 }
 0x80d   :  { %5487 = vmatprep.subr.bf16.mxu1 %v6391_v40 }
 0x80e   :  { %2011 = vmatmul.mubr.f32.gmra.mrb[18].mxu0 %v6831_v58  ;;  %4518 = vmatmul.mubr.f32.gmra.mrb[26].mxu1 %v6919_v47  ;;  %v2186_v58 = vld [vmem:[#allocation11 + $0x20] sm:$0xff] }
 0x80f   :  { %4520 = vmatprep.mubr.f32.mxu1 %v6963_v38  ;;  %2016 = vmatprep.mubr.f32.mxu0 %v6390_v0 }
 0x810   :  { %5489 = vmatpush3.bf16.msra.mxu1 %v7127_v19 }
 0x811   :  { %5490 = vmatprep.subr.bf16.mxu1 %v6391_v40 }
 0x812   :  { %2017 = vmatmul.mubr.f32.gmra.mrb[20].mxu0 %v6875_v52  ;;  %4521 = vmatmul.mubr.f32.gmra.mrb[28].mxu1 %v7007_v30  ;;  %v7076_v52 = vpack.c.bf16 %v2186_v58, %v2183_v5  ;;  %v2196_v5 = vld [vmem:[#allocation11 + $0x70] sm:$0xff]  ;;  %v2199_v58 = vld [vmem:[#allocation11 + $0x88] sm:$0xff] }
 0x813   :  { %4523 = vmatprep.mubr.f32.mxu1 %v7049_v28  ;;  %2022 = vmatprep.mubr.f32.mxu0 %v6390_v0 }
 0x814   :  { %5453 = vmatprep.subr.bf16.mxu0 %v7076_v52 }
 0x816   :  { %2023 = vmatmul.mubr.f32.gmra.mrb[22].mxu0 %v6919_v47  ;;  %v2185_v47 = vld [vmem:[#allocation11 + $0x18] sm:$0xff] }
 0x817   :  { %2028 = vmatprep.mubr.f32.mxu0 %v6390_v0  ;;  %v7078_v22 = vpack.c.bf16 %v2185_v47, %v2182_v21  ;;  %v2202_v21 = vld [vmem:[#allocation11 + $0xa0] sm:$0xff]  ;;  %v7133_v47 = vpack.c.bf16 %v2199_v58, %v2196_v5 }
 0x819   :  { %5455 = vmatpush1.bf16.msra.mxu0 %v7078_v22  ;;  %5492 = vmatpush3.bf16.msra.mxu1 %v7133_v47 }
 0x81a   :  { %2029 = vmatmul.mubr.f32.gmra.mrb[24].mxu0 %v6963_v38  ;;  %v2189_v38 = vld [vmem:[#allocation11 + $0x38] sm:$0xff]  ;;  %5493 = vmatprep.subr.bf16.mxu1 %v6391_v40 }
 0x81b   :  { %2034 = vmatprep.mubr.f32.mxu0 %v6390_v0 }
 0x81e   :  { %2035 = vmatmul.mubr.f32.gmra.mrb[26].mxu0 %v7007_v30  ;;  %v2192_v30 = vld [vmem:[#allocation11 + $0x50] sm:$0xff] }
 0x81f   :  { %2040 = vmatprep.mubr.f32.mxu0 %v6390_v0  ;;  %v7082_v27 = vpack.c.bf16 %v2192_v30, %v2189_v38  ;;  %v2205_v38 = vld [vmem:[#allocation11 + $0xb8] sm:$0xff] }
 0x820   :  { %v7136_v30 = vpack.c.bf16 %v2205_v38, %v2202_v21 }
 0x821   :  { %5457 = vmatprep.subr.bf16.mxu0 %v7082_v27 }
 0x822   :  { %2041 = vmatmul.mubr.f32.gmra.mrb[28].mxu0 %v7049_v28  ;;  %5495 = vmatpush3.bf16.msra.mxu1 %v7136_v30 }
 0x823   :  { %2046 = vmatprep.mubr.f32.mxu0 %v6390_v0  ;;  %5459 = vmatpush1.bf16.msra.mxu0 %v7084_v25 }
 0x824   :  { %5461 = vmatprep.subr.bf16.mxu0 %v7088_v35  ;;  %5496 = vmatprep.subr.bf16.mxu1 %v6391_v40 }
 0x826   :  { %5498 = vmatpush3.bf16.msra.mxu1 %v7140_v26 }
 0x827   :  { %5463 = vmatpush1.bf16.msra.mxu0 %v7090_v46  ;;  %5499 = vmatprep.subr.bf16.mxu1 %v6391_v40 }
 0x828   :  { %5465 = vmatprep.subr.bf16.mxu0 %v7094_v56 }
 0x82a   :  { %5501 = vmatpush3.bf16.msra.mxu1 %v7144_v45 }
 0x82b   :  { %5467 = vmatpush1.bf16.msra.mxu0 %v7096_v4  ;;  %5502 = vmatprep.subr.bf16.mxu1 %v6391_v40 }
 0x82c   :  { %5469 = vmatprep.subr.bf16.mxu0 %v7100_v15 }
 0x82e   :  { %5504 = vmatpush3.bf16.msra.mxu1 %v7148_v61 }
 0x82f   :  { %5471 = vmatpush1.bf16.msra.mxu0 %v7102_v24  ;;  %5505 = vmatprep.subr.bf16.mxu1 %v6391_v40 }
 0x830   :  { %5473 = vmatprep.subr.bf16.mxu0 %v7106_v53 }
 0x832   :  { %5507 = vmatpush3.bf16.msra.mxu1 %v7152_v13 }
 0x833   :  { %5475 = vmatpush1.bf16.msra.mxu0 %v7108_v57  ;;  %5540 = vmatprep.subr.bf16.mxu1 %v6391_v40 }
 0x834   :  { %5477 = vmatprep.subr.bf16.mxu0 %v7112_v50 }
 0x837   :  { %5479 = vmatpush1.bf16.msra.mxu0 %v7114_v39 }
 0x838   :  { %5481 = vmatprep.subr.bf16.mxu0 %v7121_v8 }
 0x83b   :  { %5483 = vmatpush1.bf16.msra.mxu0 %v7124_v12 }
 0x83c   :  { %5509 = vmatprep.subr.bf16.mxu0 %v7076_v52 }
 0x8bd   :  { %v1768_v20 = vpop.f32.mrb[14].mxu0  ;;  %v1839_v23 = vpop.f32.mrb[22].mxu1 }
 0x8be   :  { %v5962_v29 = vadd.f32 %v1768_v20, %v6776_v3  ;;  %v1770_v32 = vpop.f32.mrb[15].mxu0  ;;  %v4481_v31 = vpop.f32.mrb[23].mxu1  ;;  %v1857_v62 = vadd.f32 %v6191_v7, %v1839_v23 }
 0x8bf   :  { %v5963_v42 = vadd.f32 %v1770_v32, %v6780_v6 }
 0x8c0   :  { %v3782_v33 = vmul.f32 -1.442695, %v5962_v29 }
 0x8c1   :  { %v3783_v48 = vmul.f32 -1.442695, %v5963_v42 }
 0x8c2   :  { %6097 = vpow2.f32 %v3782_v33 }
 0x8c3   :  { %6099 = vpow2.f32 %v3783_v48 }
 0x8cc   :  { %v6098_v49 = vpop.eup %6097 }
 0x8cd   :  { %v1847_v54 = vadd.f32 1.0, %v6098_v49  ;;  %v6100_v43 = vpop.eup %6099 }
 0x8ce   :  { %v1854_v60 = vadd.f32 1.0, %v6100_v43  ;;  %v7230_v43 = vld [vmem:[#allocation12] ss:$0 sm:$0xff] }
 0x8cf   :  { %6101 = vrcp.f32 %v1847_v54 }
 0x8d0   :  { %6103 = vrcp.f32 %v1854_v60 }
 0x8d9   :  { %v6102_v9 = vpop.eup %6101 }
 0x8da   :  { %v1858_v11 = vmul.f32 %v6102_v9, %v1857_v62  ;;  %v6104_v58 = vpop.eup %6103 }
 0x8db   :  { %v1861_v17 = vsub.f32 1.0, %v6104_v58  ;;  %v1863_v41 = vmul.f32 %v6104_v58, %v7049_v28  ;;  %v1923_v28 = vld [vmem:[%s7598_s7] sm:$0x7] }
 0x8dc   :  { %v1859_v3 = vadd.f32 %v1858_v11, %v6768_v59  ;;  %v7222_v2 = vrot.slane %v1923_v28, %v207_v63  ;;  %v7226_v20 = vrot.slane %v1923_v28, %v211_v1  ;;  %v7234_v1 = vrot.slane %v1923_v28, %v215_v37 }
 0x8dd   :  { %v7160_v14 = vpop.f32.mrb[24].mxu1 }
 0x8de   :  { %6105 = vtanh.f32 %v1859_v3  ;;  %v7162_v16 = vpop.f32.mrb[25].mxu1 }
 0x8df   :  { %v2120_v9 = vadd.f32 %v7162_v16, %v7234_v1 }
 0x8e1   :  { %v7164_v6 = vpop.f32.mrb[26].mxu1 }
 0x8e2   :  { %v7166_v5 = vpop.f32.mrb[27].mxu1 }
 0x8e5   :  { %v7168_v21 = vpop.f32.mrb[28].mxu1 }
 0x8e6   :  { %v7170_v38 = vpop.f32.mrb[29].mxu1 }
 0x8e8   :  { %v6106_v18 = vpop.eup %6105 }
 0x8e9   :  { %v1862_v34 = vmul.f32 %v6106_v18, %v1861_v17 }
 0x8eb   :  { %v1864_v59 = vadd.f32 %v1863_v41, %v1862_v34 }
 0x8ed   :  { %2047 = vmatmul.mubr.f32.gmra.mrb[30].mxu0 %v1864_v59  ;;  %4524 = vmatmul.mubr.f32.gmra.mrb[30].mxu1 %v1864_v59 }
 0x8ee   :  { %2304 = vmatprep.mubr.f32.mxu0 %v6390_v0  ;;  %4558 = vmatprep.mubr.msk.f32.mxu1 %vm6392_vm0, %v6390_v0 }
 0x8f1   :  { %2305 = vmatmul.mubr.f32.vlgmr.msra.gmra.mrb[16].mxu0 %v6390_v0  ;;  %4559 = vmatmul.mubr.f32.vlgmr.msra.gmra.mrb[32].mxu1 %v6390_v0 }
 0x8f2   :  { %5511 = vmatpush1.bf16.msra.mxu0 %v7078_v22  ;;  %5542 = vmatpush3.bf16.msra.mxu1 %v7116_v44 }
 0x8f3   :  { %5513 = vmatprep.subr.bf16.mxu0 %v7082_v27  ;;  %5543 = vmatprep.subr.bf16.mxu1 %v6391_v40 }
 0x8f4   :  { %2470 = vmatprep.mubr.f32.mxu0 %v6390_v0  ;;  %4593 = vmatprep.mubr.msk.f32.mxu1 %vm6392_vm0, %v6390_v0 }
 0x8f6   :  { %5515 = vmatpush1.bf16.msra.mxu0 %v7084_v25  ;;  %5545 = vmatpush3.bf16.msra.mxu1 %v7127_v19 }
 0x8f7   :  { %5517 = vmatprep.subr.bf16.mxu0 %v7088_v35  ;;  %5546 = vmatprep.subr.bf16.mxu1 %v6391_v40 }
 0x8fa   :  { %5519 = vmatpush1.bf16.msra.mxu0 %v7090_v46  ;;  %5548 = vmatpush3.bf16.msra.mxu1 %v7133_v47 }
 0x8fb   :  { %5521 = vmatprep.subr.bf16.mxu0 %v7094_v56  ;;  %5549 = vmatprep.subr.bf16.mxu1 %v6391_v40 }
 0x8fe   :  { %5523 = vmatpush1.bf16.msra.mxu0 %v7096_v4  ;;  %5551 = vmatpush3.bf16.msra.mxu1 %v7136_v30 }
 0x8ff   :  { %5525 = vmatprep.subr.bf16.mxu0 %v7100_v15  ;;  %5552 = vmatprep.subr.bf16.mxu1 %v6391_v40 }
 0x902   :  { %5527 = vmatpush1.bf16.msra.mxu0 %v7102_v24  ;;  %5554 = vmatpush3.bf16.msra.mxu1 %v7140_v26 }
 0x903   :  { %5529 = vmatprep.subr.bf16.mxu0 %v7106_v53  ;;  %5555 = vmatprep.subr.bf16.mxu1 %v6391_v40 }
 0x906   :  { %5531 = vmatpush1.bf16.msra.mxu0 %v7108_v57  ;;  %5557 = vmatpush3.bf16.msra.mxu1 %v7144_v45 }
 0x907   :  { %5533 = vmatprep.subr.bf16.mxu0 %v7112_v50  ;;  %5558 = vmatprep.subr.bf16.mxu1 %v6391_v40 }
 0x90a   :  { %5535 = vmatpush1.bf16.msra.mxu0 %v7114_v39  ;;  %5560 = vmatpush3.bf16.msra.mxu1 %v7148_v61 }
 0x90b   :  { %5537 = vmatprep.subr.bf16.mxu0 %v7121_v8  ;;  %5561 = vmatprep.subr.bf16.mxu1 %v6391_v40 }
 0x90e   :  { %5539 = vmatpush1.bf16.msra.mxu0 %v7124_v12  ;;  %5563 = vmatpush3.bf16.msra.mxu1 %v7152_v13 }
 0x90f   :  { %5565 = vmatprep.subr.bf16.mxu0 %v7076_v52  ;;  %5596 = vmatprep.subr.bf16.mxu1 %v6391_v40 }
 0x9c0   :  { %v7216_v51 = vpop.f32.mrb[30].mxu1 }
 0x9c1   :  { %v7218_v55 = vpop.f32.mrb[31].mxu1 }
 0x9c4   :  { %v2306_v10 = vpop.f32.mrb[16].mxu0  ;;  %v2377_v23 = vpop.f32.mrb[32].mxu1 }
 0x9c5   :  { %v5964_v29 = vadd.f32 %v2306_v10, %v7222_v2  ;;  %v2308_v32 = vpop.f32.mrb[17].mxu0  ;;  %v4560_v31 = vpop.f32.mrb[33].mxu1  ;;  %v2395_v7 = vadd.f32 %v7230_v43, %v2377_v23 }
 0x9c6   :  { %v5965_v42 = vadd.f32 %v2308_v32, %v7226_v20 }
 0x9c7   :  { %v3785_v33 = vmul.f32 -1.442695, %v5964_v29 }
 0x9c8   :  { %v3786_v48 = vmul.f32 -1.442695, %v5965_v42 }
 0x9c9   :  { %6107 = vpow2.f32 %v3785_v33 }
 0x9ca   :  { %6109 = vpow2.f32 %v3786_v48 }
 0x9d3   :  { %v6108_v49 = vpop.eup %6107 }
 0x9d4   :  { %v2385_v54 = vadd.f32 1.0, %v6108_v49  ;;  %v6110_v63 = vpop.eup %6109 }
 0x9d5   :  { %v2392_v60 = vadd.f32 1.0, %v6110_v63  ;;  %v2125_v63 = vadd.f32 %v7160_v14, %v7234_v1 }
 0x9d6   :  { %6111 = vrcp.f32 %v2385_v54 }
 0x9d7   :  { %6113 = vrcp.f32 %v2392_v60 }
 0x9e0   :  { %v6112_v62 = vpop.eup %6111 }
 0x9e1   :  { %v2396_v11 = vmul.f32 %v6112_v62, %v2395_v7  ;;  %v6114_v58 = vpop.eup %6113 }
 0x9e2   :  { %v2399_v17 = vsub.f32 1.0, %v6114_v58  ;;  %v2401_v41 = vmul.f32 0.0, %v6114_v58 }
 0x9e3   :  { %v2397_v3 = vadd.f32 %v2396_v11, %v2120_v9 }
 0x9e5   :  { %6115 = vtanh.f32 %v2397_v3 }
 0x9ef   :  { %v6116_v18 = vpop.eup %6115 }
 0x9f0   :  { %v2400_v34 = vmul.f32 %v6116_v18, %v2399_v17 }
 0x9f2   :  { %v7239_v59 = vadd.f32 %v2401_v41, %v2400_v34 }
 0x9f4   :  { %2471 = vmatmul.mubr.f32.vlgmr.msra.gmra.mrb[18].mxu0 %v7239_v59  ;;  %4594 = vmatmul.mubr.f32.vlgmr.msra.gmra.mrb[34].mxu1 %v7239_v59 }
 0x9f5   :  { %5567 = vmatpush1.bf16.msra.mxu0 %v7078_v22  ;;  %5598 = vmatpush3.bf16.msra.mxu1 %v7116_v44 }
 0x9f6   :  { %5569 = vmatprep.subr.bf16.mxu0 %v7082_v27  ;;  %5599 = vmatprep.subr.bf16.mxu1 %v6391_v40 }
 0x9f7   :  { %2636 = vmatprep.mubr.f32.mxu0 %v6390_v0  ;;  %4628 = vmatprep.mubr.msk.f32.mxu1 %vm6392_vm0, %v6390_v0 }
 0x9f9   :  { %5571 = vmatpush1.bf16.msra.mxu0 %v7084_v25  ;;  %5601 = vmatpush3.bf16.msra.mxu1 %v7127_v19 }
 0x9fa   :  { %5573 = vmatprep.subr.bf16.mxu0 %v7088_v35  ;;  %5602 = vmatprep.subr.bf16.mxu1 %v6391_v40 }
 0x9fd   :  { %5575 = vmatpush1.bf16.msra.mxu0 %v7090_v46  ;;  %5604 = vmatpush3.bf16.msra.mxu1 %v7133_v47 }
 0x9fe   :  { %5577 = vmatprep.subr.bf16.mxu0 %v7094_v56  ;;  %5605 = vmatprep.subr.bf16.mxu1 %v6391_v40 }
 0xa01   :  { %5579 = vmatpush1.bf16.msra.mxu0 %v7096_v4  ;;  %5607 = vmatpush3.bf16.msra.mxu1 %v7136_v30 }
 0xa02   :  { %5581 = vmatprep.subr.bf16.mxu0 %v7100_v15  ;;  %5608 = vmatprep.subr.bf16.mxu1 %v6391_v40 }
 0xa05   :  { %5583 = vmatpush1.bf16.msra.mxu0 %v7102_v24  ;;  %5610 = vmatpush3.bf16.msra.mxu1 %v7140_v26 }
 0xa06   :  { %5585 = vmatprep.subr.bf16.mxu0 %v7106_v53  ;;  %5611 = vmatprep.subr.bf16.mxu1 %v6391_v40 }
 0xa09   :  { %5587 = vmatpush1.bf16.msra.mxu0 %v7108_v57  ;;  %5613 = vmatpush3.bf16.msra.mxu1 %v7144_v45 }
 0xa0a   :  { %5589 = vmatprep.subr.bf16.mxu0 %v7112_v50  ;;  %5614 = vmatprep.subr.bf16.mxu1 %v6391_v40 }
 0xa0d   :  { %5591 = vmatpush1.bf16.msra.mxu0 %v7114_v39  ;;  %5616 = vmatpush3.bf16.msra.mxu1 %v7148_v61 }
 0xa0e   :  { %5593 = vmatprep.subr.bf16.mxu0 %v7121_v8  ;;  %5617 = vmatprep.subr.bf16.mxu1 %v6391_v40 }
 0xa11   :  { %5595 = vmatpush1.bf16.msra.mxu0 %v7124_v12  ;;  %5619 = vmatpush3.bf16.msra.mxu1 %v7152_v13 }
 0xa12   :  { %5621 = vmatprep.subr.bf16.mxu0 %v7076_v52  ;;  %5652 = vmatprep.subr.bf16.mxu1 %v6391_v40 }
 0xac7   :  { %v2472_v36 = vpop.f32.mrb[18].mxu0  ;;  %v2543_v37 = vpop.f32.mrb[34].mxu1 }
 0xac8   :  { %v5966_v16 = vadd.f32 %v2472_v36, %v7222_v2  ;;  %v2474_v28 = vpop.f32.mrb[19].mxu0  ;;  %v4595_v10 = vpop.f32.mrb[35].mxu1  ;;  %v2561_v49 = vadd.f32 %v7230_v43, %v2543_v37 }
 0xac9   :  { %v5967_v29 = vadd.f32 %v2474_v28, %v7226_v20 }
 0xaca   :  { %v3787_v23 = vmul.f32 -1.442695, %v5966_v16 }
 0xacb   :  { %v3788_v32 = vmul.f32 -1.442695, %v5967_v29 }
 0xacc   :  { %6117 = vpow2.f32 %v3787_v23 }
 0xacd   :  { %6119 = vpow2.f32 %v3788_v32 }
 0xad6   :  { %v6118_v31 = vpop.eup %6117 }
 0xad7   :  { %v2551_v33 = vadd.f32 1.0, %v6118_v31  ;;  %v6120_v42 = vpop.eup %6119 }
 0xad8   :  { %v2558_v48 = vadd.f32 1.0, %v6120_v42 }
 0xad9   :  { %6121 = vrcp.f32 %v2551_v33  ;;  %v2130_v33 = vadd.f32 %v7166_v5, %v7234_v1 }
 0xada   :  { %6123 = vrcp.f32 %v2558_v48 }
 0xae3   :  { %v6122_v54 = vpop.eup %6121 }
 0xae4   :  { %v2562_v60 = vmul.f32 %v6122_v54, %v2561_v49  ;;  %v6124_v62 = vpop.eup %6123 }
 0xae5   :  { %v2565_v9 = vsub.f32 1.0, %v6124_v62  ;;  %v2567_v58 = vmul.f32 %v6124_v62, %v7239_v59 }
 0xae6   :  { %v2563_v7 = vadd.f32 %v2562_v60, %v2125_v63 }
 0xae8   :  { %6125 = vtanh.f32 %v2563_v7 }
 0xaf2   :  { %v6126_v11 = vpop.eup %6125 }
 0xaf3   :  { %v2566_v3 = vmul.f32 %v6126_v11, %v2565_v9 }
 0xaf5   :  { %v7284_v17 = vadd.f32 %v2567_v58, %v2566_v3 }
 0xaf7   :  { %2637 = vmatmul.mubr.f32.vlgmr.msra.gmra.mrb[20].mxu0 %v7284_v17  ;;  %4629 = vmatmul.mubr.f32.vlgmr.msra.gmra.mrb[36].mxu1 %v7284_v17 }
 0xaf8   :  { %5623 = vmatpush1.bf16.msra.mxu0 %v7078_v22  ;;  %5654 = vmatpush3.bf16.msra.mxu1 %v7116_v44 }
 0xaf9   :  { %5625 = vmatprep.subr.bf16.mxu0 %v7082_v27  ;;  %5655 = vmatprep.subr.bf16.mxu1 %v6391_v40 }
 0xafa   :  { %2802 = vmatprep.mubr.f32.mxu0 %v6390_v0  ;;  %4663 = vmatprep.mubr.msk.f32.mxu1 %vm6392_vm0, %v6390_v0 }
 0xafc   :  { %5627 = vmatpush1.bf16.msra.mxu0 %v7084_v25  ;;  %5657 = vmatpush3.bf16.msra.mxu1 %v7127_v19 }
 0xafd   :  { %5629 = vmatprep.subr.bf16.mxu0 %v7088_v35  ;;  %5658 = vmatprep.subr.bf16.mxu1 %v6391_v40 }
 0xb00   :  { %5631 = vmatpush1.bf16.msra.mxu0 %v7090_v46  ;;  %5660 = vmatpush3.bf16.msra.mxu1 %v7133_v47 }
 0xb01   :  { %5633 = vmatprep.subr.bf16.mxu0 %v7094_v56  ;;  %5661 = vmatprep.subr.bf16.mxu1 %v6391_v40 }
 0xb04   :  { %5635 = vmatpush1.bf16.msra.mxu0 %v7096_v4  ;;  %5663 = vmatpush3.bf16.msra.mxu1 %v7136_v30 }
 0xb05   :  { %5637 = vmatprep.subr.bf16.mxu0 %v7100_v15  ;;  %5664 = vmatprep.subr.bf16.mxu1 %v6391_v40 }
 0xb08   :  { %5639 = vmatpush1.bf16.msra.mxu0 %v7102_v24  ;;  %5666 = vmatpush3.bf16.msra.mxu1 %v7140_v26 }
 0xb09   :  { %5641 = vmatprep.subr.bf16.mxu0 %v7106_v53  ;;  %5667 = vmatprep.subr.bf16.mxu1 %v6391_v40 }
 0xb0c   :  { %5643 = vmatpush1.bf16.msra.mxu0 %v7108_v57  ;;  %5669 = vmatpush3.bf16.msra.mxu1 %v7144_v45 }
 0xb0d   :  { %5645 = vmatprep.subr.bf16.mxu0 %v7112_v50  ;;  %5670 = vmatprep.subr.bf16.mxu1 %v6391_v40 }
 0xb10   :  { %5647 = vmatpush1.bf16.msra.mxu0 %v7114_v39  ;;  %5672 = vmatpush3.bf16.msra.mxu1 %v7148_v61 }
 0xb11   :  { %5649 = vmatprep.subr.bf16.mxu0 %v7121_v8  ;;  %5673 = vmatprep.subr.bf16.mxu1 %v6391_v40 }
 0xb14   :  { %5651 = vmatpush1.bf16.msra.mxu0 %v7124_v12  ;;  %5675 = vmatpush3.bf16.msra.mxu1 %v7152_v13 }
 0xb15   :  { %5677 = vmatprep.subr.bf16.mxu0 %v7076_v52  ;;  %5708 = vmatprep.subr.bf16.mxu1 %v6391_v40 }
 0xbca   :  { %v2638_v14 = vpop.f32.mrb[20].mxu0  ;;  %v2709_v18 = vpop.f32.mrb[36].mxu1 }
 0xbcb   :  { %v5968_v34 = vadd.f32 %v2638_v14, %v7222_v2  ;;  %v2640_v41 = vpop.f32.mrb[21].mxu0  ;;  %v4630_v59 = vpop.f32.mrb[37].mxu1  ;;  %v2727_v32 = vadd.f32 %v7230_v43, %v2709_v18 }
 0xbcc   :  { %v5969_v37 = vadd.f32 %v2640_v41, %v7226_v20 }
 0xbcd   :  { %v3789_v36 = vmul.f32 -1.442695, %v5968_v34 }
 0xbce   :  { %v3790_v16 = vmul.f32 -1.442695, %v5969_v37 }
 0xbcf   :  { %6127 = vpow2.f32 %v3789_v36 }
 0xbd0   :  { %6129 = vpow2.f32 %v3790_v16 }
 0xbd9   :  { %v6128_v28 = vpop.eup %6127 }
 0xbda   :  { %v2717_v10 = vadd.f32 1.0, %v6128_v28  ;;  %v6130_v23 = vpop.eup %6129  ;;  %v2135_v28 = vadd.f32 %v7164_v6, %v7234_v1 }
 0xbdb   :  { %v2724_v29 = vadd.f32 1.0, %v6130_v23 }
 0xbdc   :  { %6131 = vrcp.f32 %v2717_v10 }
 0xbdd   :  { %6133 = vrcp.f32 %v2724_v29 }
 0xbe6   :  { %v6132_v31 = vpop.eup %6131 }
 0xbe7   :  { %v2728_v42 = vmul.f32 %v6132_v31, %v2727_v32  ;;  %v6134_v49 = vpop.eup %6133 }
 0xbe8   :  { %v2731_v54 = vsub.f32 1.0, %v6134_v49  ;;  %v2733_v7 = vmul.f32 %v6134_v49, %v7284_v17 }
 0xbe9   :  { %v2729_v48 = vadd.f32 %v2728_v42, %v2130_v33 }
 0xbeb   :  { %6135 = vtanh.f32 %v2729_v48 }
 0xbf5   :  { %v6136_v63 = vpop.eup %6135 }
 0xbf6   :  { %v2732_v60 = vmul.f32 %v6136_v63, %v2731_v54 }
 0xbf8   :  { %v7329_v62 = vadd.f32 %v2733_v7, %v2732_v60 }
 0xbfa   :  { %2803 = vmatmul.mubr.f32.vlgmr.msra.gmra.mrb[22].mxu0 %v7329_v62  ;;  %4664 = vmatmul.mubr.f32.vlgmr.msra.gmra.mrb[38].mxu1 %v7329_v62 }
 0xbfb   :  { %5679 = vmatpush1.bf16.msra.mxu0 %v7078_v22  ;;  %5710 = vmatpush3.bf16.msra.mxu1 %v7116_v44 }
 0xbfc   :  { %5681 = vmatprep.subr.bf16.mxu0 %v7082_v27  ;;  %5711 = vmatprep.subr.bf16.mxu1 %v6391_v40 }
 0xbfd   :  { %2968 = vmatprep.mubr.f32.mxu0 %v6390_v0  ;;  %4698 = vmatprep.mubr.msk.f32.mxu1 %vm6392_vm0, %v6390_v0 }
 0xbff   :  { %5683 = vmatpush1.bf16.msra.mxu0 %v7084_v25  ;;  %5713 = vmatpush3.bf16.msra.mxu1 %v7127_v19 }
 0xc00   :  { %5685 = vmatprep.subr.bf16.mxu0 %v7088_v35  ;;  %5714 = vmatprep.subr.bf16.mxu1 %v6391_v40 }
 0xc03   :  { %5687 = vmatpush1.bf16.msra.mxu0 %v7090_v46  ;;  %5716 = vmatpush3.bf16.msra.mxu1 %v7133_v47 }
 0xc04   :  { %5689 = vmatprep.subr.bf16.mxu0 %v7094_v56  ;;  %5717 = vmatprep.subr.bf16.mxu1 %v6391_v40 }
 0xc07   :  { %5691 = vmatpush1.bf16.msra.mxu0 %v7096_v4  ;;  %5719 = vmatpush3.bf16.msra.mxu1 %v7136_v30 }
 0xc08   :  { %5693 = vmatprep.subr.bf16.mxu0 %v7100_v15  ;;  %5720 = vmatprep.subr.bf16.mxu1 %v6391_v40 }
 0xc0b   :  { %5695 = vmatpush1.bf16.msra.mxu0 %v7102_v24  ;;  %5722 = vmatpush3.bf16.msra.mxu1 %v7140_v26 }
 0xc0c   :  { %5697 = vmatprep.subr.bf16.mxu0 %v7106_v53  ;;  %5723 = vmatprep.subr.bf16.mxu1 %v6391_v40 }
 0xc0f   :  { %5699 = vmatpush1.bf16.msra.mxu0 %v7108_v57  ;;  %5725 = vmatpush3.bf16.msra.mxu1 %v7144_v45 }
 0xc10   :  { %5701 = vmatprep.subr.bf16.mxu0 %v7112_v50  ;;  %5726 = vmatprep.subr.bf16.mxu1 %v6391_v40 }
 0xc13   :  { %5703 = vmatpush1.bf16.msra.mxu0 %v7114_v39  ;;  %5728 = vmatpush3.bf16.msra.mxu1 %v7148_v61 }
 0xc14   :  { %5705 = vmatprep.subr.bf16.mxu0 %v7121_v8  ;;  %5729 = vmatprep.subr.bf16.mxu1 %v6391_v40 }
 0xc17   :  { %5707 = vmatpush1.bf16.msra.mxu0 %v7124_v12  ;;  %5731 = vmatpush3.bf16.msra.mxu1 %v7152_v13 }
 0xc18   :  { %5733 = vmatprep.subr.bf16.mxu0 %v7076_v52  ;;  %5764 = vmatprep.subr.bf16.mxu1 %v6391_v40 }
 0xccd   :  { %v2804_v5 = vpop.f32.mrb[22].mxu0  ;;  %v2875_v9 = vpop.f32.mrb[38].mxu1 }
 0xcce   :  { %v5970_v11 = vadd.f32 %v2804_v5, %v7222_v2  ;;  %v2806_v3 = vpop.f32.mrb[23].mxu0  ;;  %v4665_v58 = vpop.f32.mrb[39].mxu1  ;;  %v2893_v37 = vadd.f32 %v7230_v43, %v2875_v9 }
 0xccf   :  { %v5971_v14 = vadd.f32 %v2806_v3, %v7226_v20 }
 0xcd0   :  { %v3791_v17 = vmul.f32 -1.442695, %v5970_v11 }
 0xcd1   :  { %v3792_v18 = vmul.f32 -1.442695, %v5971_v14 }
 0xcd2   :  { %6137 = vpow2.f32 %v3791_v17 }
 0xcd3   :  { %6139 = vpow2.f32 %v3792_v18  ;;  %v2140_v18 = vadd.f32 %v7170_v38, %v7234_v1 }
 0xcdc   :  { %v6138_v34 = vpop.eup %6137 }
 0xcdd   :  { %v2883_v41 = vadd.f32 1.0, %v6138_v34  ;;  %v6140_v59 = vpop.eup %6139 }
 0xcde   :  { %v2890_v36 = vadd.f32 1.0, %v6140_v59 }
 0xcdf   :  { %6141 = vrcp.f32 %v2883_v41 }
 0xce0   :  { %6143 = vrcp.f32 %v2890_v36 }
 0xce9   :  { %v6142_v16 = vpop.eup %6141 }
 0xcea   :  { %v2894_v10 = vmul.f32 %v6142_v16, %v2893_v37  ;;  %v6144_v29 = vpop.eup %6143 }
 0xceb   :  { %v2897_v32 = vsub.f32 1.0, %v6144_v29  ;;  %v2899_v42 = vmul.f32 %v6144_v29, %v7329_v62 }
 0xcec   :  { %v2895_v23 = vadd.f32 %v2894_v10, %v2135_v28 }
 0xcee   :  { %6145 = vtanh.f32 %v2895_v23 }
 0xcf8   :  { %v6146_v31 = vpop.eup %6145 }
 0xcf9   :  { %v2898_v33 = vmul.f32 %v6146_v31, %v2897_v32 }
 0xcfb   :  { %v7374_v48 = vadd.f32 %v2899_v42, %v2898_v33 }
 0xcfd   :  { %2969 = vmatmul.mubr.f32.vlgmr.msra.gmra.mrb[24].mxu0 %v7374_v48  ;;  %4699 = vmatmul.mubr.f32.vlgmr.msra.gmra.mrb[40].mxu1 %v7374_v48 }
 0xcfe   :  { %5735 = vmatpush1.bf16.msra.mxu0 %v7078_v22  ;;  %5766 = vmatpush3.bf16.msra.mxu1 %v7116_v44 }
 0xcff   :  { %5737 = vmatprep.subr.bf16.mxu0 %v7082_v27  ;;  %5767 = vmatprep.subr.bf16.mxu1 %v6391_v40 }
 0xd00   :  { %3134 = vmatprep.mubr.f32.mxu0 %v6390_v0  ;;  %4733 = vmatprep.mubr.msk.f32.mxu1 %vm6392_vm0, %v6390_v0 }
 0xd02   :  { %5739 = vmatpush1.bf16.msra.mxu0 %v7084_v25  ;;  %5769 = vmatpush3.bf16.msra.mxu1 %v7127_v19 }
 0xd03   :  { %5741 = vmatprep.subr.bf16.mxu0 %v7088_v35  ;;  %5770 = vmatprep.subr.bf16.mxu1 %v6391_v40 }
 0xd06   :  { %5743 = vmatpush1.bf16.msra.mxu0 %v7090_v46  ;;  %5772 = vmatpush3.bf16.msra.mxu1 %v7133_v47 }
 0xd07   :  { %5745 = vmatprep.subr.bf16.mxu0 %v7094_v56  ;;  %5773 = vmatprep.subr.bf16.mxu1 %v6391_v40 }
 0xd0a   :  { %5747 = vmatpush1.bf16.msra.mxu0 %v7096_v4  ;;  %5775 = vmatpush3.bf16.msra.mxu1 %v7136_v30 }
 0xd0b   :  { %5749 = vmatprep.subr.bf16.mxu0 %v7100_v15  ;;  %5776 = vmatprep.subr.bf16.mxu1 %v6391_v40 }
 0xd0e   :  { %5751 = vmatpush1.bf16.msra.mxu0 %v7102_v24  ;;  %5778 = vmatpush3.bf16.msra.mxu1 %v7140_v26 }
 0xd0f   :  { %5753 = vmatprep.subr.bf16.mxu0 %v7106_v53  ;;  %5779 = vmatprep.subr.bf16.mxu1 %v6391_v40 }
 0xd12   :  { %5755 = vmatpush1.bf16.msra.mxu0 %v7108_v57  ;;  %5781 = vmatpush3.bf16.msra.mxu1 %v7144_v45 }
 0xd13   :  { %5757 = vmatprep.subr.bf16.mxu0 %v7112_v50  ;;  %5782 = vmatprep.subr.bf16.mxu1 %v6391_v40 }
 0xd16   :  { %5759 = vmatpush1.bf16.msra.mxu0 %v7114_v39  ;;  %5784 = vmatpush3.bf16.msra.mxu1 %v7148_v61 }
 0xd17   :  { %5761 = vmatprep.subr.bf16.mxu0 %v7121_v8  ;;  %5785 = vmatprep.subr.bf16.mxu1 %v6391_v40 }
 0xd1a   :  { %5763 = vmatpush1.bf16.msra.mxu0 %v7124_v12  ;;  %5787 = vmatpush3.bf16.msra.mxu1 %v7152_v13 }
 0xd1b   :  { %5789 = vmatprep.subr.bf16.mxu0 %v7076_v52  ;;  %5820 = vmatprep.subr.bf16.mxu1 %v6391_v40 }
 0xdd0   :  { %v2970_v6 = vpop.f32.mrb[24].mxu0  ;;  %v3041_v49 = vpop.f32.mrb[40].mxu1 }
 0xdd1   :  { %v5972_v54 = vadd.f32 %v2970_v6, %v7222_v2  ;;  %v2972_v63 = vpop.f32.mrb[25].mxu0  ;;  %v4700_v60 = vpop.f32.mrb[41].mxu1  ;;  %v3059_v17 = vadd.f32 %v7230_v43, %v3041_v49 }
 0xdd2   :  { %v5973_v62 = vadd.f32 %v2972_v63, %v7226_v20 }
 0xdd3   :  { %v3793_v7 = vmul.f32 -1.442695, %v5972_v54 }
 0xdd4   :  { %v3794_v5 = vmul.f32 -1.442695, %v5973_v62 }
 0xdd5   :  { %6147 = vpow2.f32 %v3793_v7  ;;  %v2145_v7 = vadd.f32 %v7168_v21, %v7234_v1  ;;  %v3565_v21 = vld [vmem:[#allocation14] sm:$0xff] }
 0xdd6   :  { %6149 = vpow2.f32 %v3794_v5 }
 0xddf   :  { %v6148_v9 = vpop.eup %6147 }
 0xde0   :  { %v3049_v11 = vadd.f32 1.0, %v6148_v9  ;;  %v6150_v3 = vpop.eup %6149 }
 0xde1   :  { %v3056_v58 = vadd.f32 1.0, %v6150_v3 }
 0xde2   :  { %6151 = vrcp.f32 %v3049_v11 }
 0xde3   :  { %6153 = vrcp.f32 %v3056_v58 }
 0xdec   :  { %v6152_v14 = vpop.eup %6151 }
 0xded   :  { %v3060_v34 = vmul.f32 %v6152_v14, %v3059_v17  ;;  %v6154_v59 = vpop.eup %6153 }
 0xdee   :  { %v3063_v36 = vsub.f32 1.0, %v6154_v59  ;;  %v3065_v28 = vmul.f32 %v6154_v59, %v7374_v48 }
 0xdef   :  { %v3061_v41 = vadd.f32 %v3060_v34, %v2140_v18  ;;  %v3567_v34 = vld [vmem:[#allocation14 + $0x10] sm:$0xff] }
 0xdf1   :  { %6155 = vtanh.f32 %v3061_v41  ;;  %v3568_v41 = vld [vmem:[#allocation14 + $0x18] sm:$0xff] }
 0xdf2   :  { %v5904_v59 = vpack.c.bf16 %v3568_v41, %v3567_v34  ;;  %v3677_v34 = vld [vmem:[%s7602_s11 + $0x68] sm:$0xff] }
 0xdfb   :  { %v6156_v37 = vpop.eup %6155 }
 0xdfc   :  { %v3064_v16 = vmul.f32 %v6156_v37, %v3063_v36  ;;  %v3569_v36 = vld [vmem:[#allocation14 + $0x20] sm:$0xff]  ;;  %v3570_v37 = vld [vmem:[#allocation14 + $0x28] sm:$0xff] }
 0xdfe   :  { %v7419_v10 = vadd.f32 %v3065_v28, %v3064_v16  ;;  %v5907_v16 = vpack.c.bf16 %v3570_v37, %v3569_v36  ;;  %v3571_v28 = vld [vmem:[#allocation14 + $0x30] sm:$0xff] }
 0xdff   :  { %v3679_v36 = vld [vmem:[%s7602_s11 + $0x78] sm:$0xff] }
 0xe00   :  { %3135 = vmatmul.mubr.f32.vlgmr.msra.gmra.mrb[26].mxu0 %v7419_v10  ;;  %4734 = vmatmul.mubr.f32.vlgmr.msra.gmra.mrb[42].mxu1 %v7419_v10 }
 0xe01   :  { %5791 = vmatpush1.bf16.msra.mxu0 %v7078_v22  ;;  %5822 = vmatpush3.bf16.msra.mxu1 %v7116_v44 }
 0xe02   :  { %5793 = vmatprep.subr.bf16.mxu0 %v7082_v27  ;;  %5823 = vmatprep.subr.bf16.mxu1 %v6391_v40 }
 0xe03   :  { %3300 = vmatprep.mubr.f32.mxu0 %v6390_v0  ;;  %4768 = vmatprep.mubr.msk.f32.mxu1 %vm6392_vm0, %v6390_v0 }
 0xe05   :  { %5795 = vmatpush1.bf16.msra.mxu0 %v7084_v25  ;;  %5825 = vmatpush3.bf16.msra.mxu1 %v7127_v19 }
 0xe06   :  { %5797 = vmatprep.subr.bf16.mxu0 %v7088_v35  ;;  %5826 = vmatprep.subr.bf16.mxu1 %v6391_v40 }
 0xe09   :  { %5799 = vmatpush1.bf16.msra.mxu0 %v7090_v46  ;;  %5828 = vmatpush3.bf16.msra.mxu1 %v7133_v47 }
 0xe0a   :  { %5801 = vmatprep.subr.bf16.mxu0 %v7094_v56  ;;  %5829 = vmatprep.subr.bf16.mxu1 %v6391_v40 }
 0xe0d   :  { %5803 = vmatpush1.bf16.msra.mxu0 %v7096_v4  ;;  %5831 = vmatpush3.bf16.msra.mxu1 %v7136_v30 }
 0xe0e   :  { %5805 = vmatprep.subr.bf16.mxu0 %v7100_v15  ;;  %5832 = vmatprep.subr.bf16.mxu1 %v6391_v40 }
 0xe11   :  { %5807 = vmatpush1.bf16.msra.mxu0 %v7102_v24  ;;  %5834 = vmatpush3.bf16.msra.mxu1 %v7140_v26 }
 0xe12   :  { %5809 = vmatprep.subr.bf16.mxu0 %v7106_v53  ;;  %5835 = vmatprep.subr.bf16.mxu1 %v6391_v40 }
 0xe15   :  { %5811 = vmatpush1.bf16.msra.mxu0 %v7108_v57  ;;  %5837 = vmatpush3.bf16.msra.mxu1 %v7144_v45 }
 0xe16   :  { %5813 = vmatprep.subr.bf16.mxu0 %v7112_v50  ;;  %5838 = vmatprep.subr.bf16.mxu1 %v6391_v40 }
 0xe19   :  { %5815 = vmatpush1.bf16.msra.mxu0 %v7114_v39  ;;  %5840 = vmatpush3.bf16.msra.mxu1 %v7148_v61 }
 0xe1a   :  { %5817 = vmatprep.subr.bf16.mxu0 %v7121_v8  ;;  %5841 = vmatprep.subr.bf16.mxu1 %v6391_v40 }
 0xe1d   :  { %5819 = vmatpush1.bf16.msra.mxu0 %v7124_v12  ;;  %5843 = vmatpush3.bf16.msra.mxu1 %v7152_v13 }
 0xe1e   :  { %5845 = vmatprep.subr.bf16.mxu0 %v7076_v52  ;;  %5876 = vmatprep.subr.bf16.mxu1 %v6391_v40 }
 0xed3   :  { %v3136_v38 = vpop.f32.mrb[26].mxu0  ;;  %v3207_v23 = vpop.f32.mrb[42].mxu1 }
 0xed4   :  { %v5974_v29 = vadd.f32 %v3136_v38, %v7222_v2  ;;  %v3138_v32 = vpop.f32.mrb[27].mxu0  ;;  %v4735_v31 = vpop.f32.mrb[43].mxu1  ;;  %v3225_v52 = vadd.f32 %v7230_v43, %v3207_v23  ;;  %v3573_v38 = vld [vmem:[#allocation14 + $0x40] sm:$0xff]  ;;  %v3574_v23 = vld [vmem:[#allocation14 + $0x48] sm:$0xff] }
 0xed5   :  { %v5975_v42 = vadd.f32 %v3138_v32, %v7226_v20  ;;  %v3575_v32 = vld [vmem:[#allocation14 + $0x50] sm:$0xff]  ;;  %v3576_v31 = vld [vmem:[#allocation14 + $0x58] sm:$0xff] }
 0xed6   :  { %v3795_v33 = vmul.f32 -1.442695, %v5974_v29  ;;  %v5913_v29 = vpack.c.bf16 %v3574_v23, %v3573_v38 }
 0xed7   :  { %v3796_v48 = vmul.f32 -1.442695, %v5975_v42  ;;  %v3577_v42 = vld [vmem:[#allocation14 + $0x60] sm:$0xff] }
 0xed8   :  { %6157 = vpow2.f32 %v3795_v33  ;;  %v5916_v33 = vpack.c.bf16 %v3576_v31, %v3575_v32  ;;  %v3803_v31 = vld [vmem:[%s7603_s12] ss:$0 sm:$0xff] }
 0xed9   :  { %6159 = vpow2.f32 %v3796_v48  ;;  %v3578_v48 = vld [vmem:[#allocation14 + $0x68] sm:$0xff] }
 0xee2   :  { %v6158_v6 = vpop.eup %6157 }
 0xee3   :  { %v3215_v49 = vadd.f32 1.0, %v6158_v6  ;;  %v6160_v54 = vpop.eup %6159  ;;  %v5919_v6 = vpack.c.bf16 %v3578_v48, %v3577_v42 }
 0xee4   :  { %v3222_v63 = vadd.f32 1.0, %v6160_v54  ;;  %v3580_v54 = vld [vmem:[#allocation14 + $0x78] sm:$0xff] }
 0xee5   :  { %6161 = vrcp.f32 %v3215_v49  ;;  %v3579_v49 = vld [vmem:[#allocation14 + $0x70] sm:$0xff] }
 0xee6   :  { %6163 = vrcp.f32 %v3222_v63  ;;  %v5922_v63 = vpack.c.bf16 %v3580_v54, %v3579_v49 }
 0xeef   :  { %v6162_v60 = vpop.eup %6161 }
 0xef0   :  { %v3226_v62 = vmul.f32 %v6162_v60, %v3225_v52  ;;  %v6164_v9 = vpop.eup %6163  ;;  %v3664_v52 = vld [vmem:[%s7602_s11] sm:$0xff]  ;;  %v3665_v60 = vld [vmem:[%s7602_s11 + $0x8] sm:$0xff] }
 0xef1   :  { %v3229_v11 = vsub.f32 1.0, %v6164_v9  ;;  %v3231_v17 = vmul.f32 %v6164_v9, %v7419_v10 }
 0xef2   :  { %v3227_v5 = vadd.f32 %v3226_v62, %v2145_v7  ;;  %v5925_v7 = vpack.c.bf16 %v3665_v60, %v3664_v52 }
 0xef4   :  { %6165 = vtanh.f32 %v3227_v5 }
 0xefe   :  { %v6166_v3 = vpop.eup %6165 }
 0xeff   :  { %v3230_v58 = vmul.f32 %v6166_v3, %v3229_v11 }
 0xf01   :  { %v7464_v14 = vadd.f32 %v3231_v17, %v3230_v58 }
 0xf03   :  { %3301 = vmatmul.mubr.f32.vlgmr.msra.gmra.mrb[28].mxu0 %v7464_v14  ;;  %4769 = vmatmul.mubr.f32.vlgmr.msra.gmra.mrb[44].mxu1 %v7464_v14 }
 0xf04   :  { %5847 = vmatpush1.bf16.msra.mxu0 %v7078_v22  ;;  %5878 = vmatpush3.bf16.msra.mxu1 %v7116_v44 }
 0xf05   :  { %5849 = vmatprep.subr.bf16.mxu0 %v7082_v27  ;;  %5879 = vmatprep.subr.bf16.mxu1 %v6391_v40 }
 0xf06   :  { %3466 = vmatprep.mubr.f32.mxu0 %v6390_v0  ;;  %4803 = vmatprep.mubr.msk.f32.mxu1 %vm6392_vm0, %v6390_v0 }
 0xf08   :  { %5851 = vmatpush1.bf16.msra.mxu0 %v7084_v25  ;;  %5881 = vmatpush3.bf16.msra.mxu1 %v7127_v19 }
 0xf09   :  { %5853 = vmatprep.subr.bf16.mxu0 %v7088_v35  ;;  %5882 = vmatprep.subr.bf16.mxu1 %v6391_v40 }
 0xf0c   :  { %5855 = vmatpush1.bf16.msra.mxu0 %v7090_v46  ;;  %5884 = vmatpush3.bf16.msra.mxu1 %v7133_v47 }
 0xf0d   :  { %5857 = vmatprep.subr.bf16.mxu0 %v7094_v56  ;;  %5885 = vmatprep.subr.bf16.mxu1 %v6391_v40 }
 0xf10   :  { %5859 = vmatpush1.bf16.msra.mxu0 %v7096_v4  ;;  %5887 = vmatpush3.bf16.msra.mxu1 %v7136_v30 }
 0xf11   :  { %5861 = vmatprep.subr.bf16.mxu0 %v7100_v15  ;;  %5888 = vmatprep.subr.bf16.mxu1 %v6391_v40 }
 0xf14   :  { %5863 = vmatpush1.bf16.msra.mxu0 %v7102_v24  ;;  %5890 = vmatpush3.bf16.msra.mxu1 %v7140_v26 }
 0xf15   :  { %5865 = vmatprep.subr.bf16.mxu0 %v7106_v53  ;;  %5891 = vmatprep.subr.bf16.mxu1 %v6391_v40 }
 0xf18   :  { %5867 = vmatpush1.bf16.msra.mxu0 %v7108_v57  ;;  %5893 = vmatpush3.bf16.msra.mxu1 %v7144_v45 }
 0xf19   :  { %5869 = vmatprep.subr.bf16.mxu0 %v7112_v50  ;;  %5894 = vmatprep.subr.bf16.mxu1 %v6391_v40 }
 0xf1c   :  { %5871 = vmatpush1.bf16.msra.mxu0 %v7114_v39  ;;  %5896 = vmatpush3.bf16.msra.mxu1 %v7148_v61 }
 0xf1d   :  { %5873 = vmatprep.subr.bf16.mxu0 %v7121_v8  ;;  %5897 = vmatprep.subr.bf16.mxu1 %v6391_v40  ;;  %v2150_v8 = vadd.f32 %v7218_v55, %v7234_v1  ;;  %v3566_v55 = vld [vmem:[#allocation14 + $0x8] sm:$0xff] }
 0xf1e   :  { %v5901_v18 = vpack.c.bf16 %v3566_v55, %v3565_v21  ;;  %v3675_v21 = vld [vmem:[%s7602_s11 + $0x58] sm:$0xff] }
 0xf20   :  { %5875 = vmatpush1.bf16.msra.mxu0 %v7124_v12  ;;  %5899 = vmatpush3.bf16.msra.mxu1 %v7152_v13 }
 0xf21   :  { %5900 = vmatprep.subr.bf16.mxu0 %v6391_v40  ;;  %5924 = vmatprep.subr.bf16.mxu1 %v6391_v40 }
 0xfd6   :  { %v3302_v22 = vpop.f32.mrb[28].mxu0  ;;  %v3373_v27 = vpop.f32.mrb[44].mxu1 }
 0xfd7   :  { %v5976_v25 = vadd.f32 %v3302_v22, %v7222_v2  ;;  %v3304_v35 = vpop.f32.mrb[29].mxu0  ;;  %v4770_v46 = vpop.f32.mrb[45].mxu1  ;;  %v3391_v39 = vadd.f32 %v7230_v43, %v3373_v27 }
 0xfd8   :  { %v5977_v4 = vadd.f32 %v3304_v35, %v7226_v20 }
 0xfd9   :  { %v3797_v56 = vmul.f32 -1.442695, %v5976_v25 }
 0xfda   :  { %v3798_v15 = vmul.f32 -1.442695, %v5977_v4  ;;  %v2155_v4 = vadd.f32 %v7216_v51, %v7234_v1  ;;  %v3667_v51 = vld [vmem:[%s7602_s11 + $0x18] sm:$0xff] }
 0xfdb   :  { %6167 = vpow2.f32 %v3797_v56 }
 0xfdc   :  { %6169 = vpow2.f32 %v3798_v15 }
 0xfe5   :  { %v6168_v24 = vpop.eup %6167 }
 0xfe6   :  { %v3381_v53 = vadd.f32 1.0, %v6168_v24  ;;  %v6170_v57 = vpop.eup %6169 }
 0xfe7   :  { %v3388_v50 = vadd.f32 1.0, %v6170_v57 }
 0xfe8   :  { %6171 = vrcp.f32 %v3381_v53 }
 0xfe9   :  { %6173 = vrcp.f32 %v3388_v50 }
 0xff2   :  { %v6172_v44 = vpop.eup %6171 }
 0xff3   :  { %v3392_v12 = vmul.f32 %v6172_v44, %v3391_v39  ;;  %v6174_v47 = vpop.eup %6173  ;;  %v3668_v44 = vld [vmem:[%s7602_s11 + $0x20] sm:$0xff] }
 0xff4   :  { %v3395_v30 = vsub.f32 1.0, %v6174_v47  ;;  %v3397_v61 = vmul.f32 %v6174_v47, %v7464_v14  ;;  %v3671_v47 = vld [vmem:[%s7602_s11 + $0x38] sm:$0xff] }
 0xff5   :  { %v3393_v19 = vadd.f32 %v3392_v12, %v2150_v8  ;;  %v3669_v8 = vld [vmem:[%s7602_s11 + $0x28] sm:$0xff] }
 0xff6   :  { %v5931_v12 = vpack.c.bf16 %v3669_v8, %v3668_v44 }
 0xff7   :  { %6175 = vtanh.f32 %v3393_v19  ;;  %v3670_v19 = vld [vmem:[%s7602_s11 + $0x30] sm:$0xff] }
0x1001   :  { %v6176_v26 = vpop.eup %6175 }
0x1002   :  { %v3396_v45 = vmul.f32 %v6176_v26, %v3395_v30  ;;  %v5934_v30 = vpack.c.bf16 %v3671_v47, %v3670_v19  ;;  %v3672_v26 = vld [vmem:[%s7602_s11 + $0x40] sm:$0xff] }
0x1004   :  { %v7509_v13 = vadd.f32 %v3397_v61, %v3396_v45  ;;  %v3673_v45 = vld [vmem:[%s7602_s11 + $0x48] sm:$0xff] }
0x1005   :  { %v5937_v61 = vpack.c.bf16 %v3673_v45, %v3672_v26 }
0x1006   :  { %3467 = vmatmul.mubr.f32.vlgmr.msra.gmra.mrb[30].mxu0 %v7509_v13  ;;  %4804 = vmatmul.mubr.f32.vlgmr.msra.gmra.mrb[46].mxu1 %v7509_v13 }
0x1007   :  { %4838 = vmatprep.mubr.msk.f32.mxu0 %vm6392_vm0, %v6390_v0  ;;  %4873 = vmatprep.mubr.msk.f32.mxu1 %vm6392_vm0, %v6390_v0  ;;  %v3572_v0 = vld [vmem:[#allocation14 + $0x38] sm:$0xff] }
0x1008   :  { %5902 = vmatpush3.bf16.msra.mxu0 %v5901_v18  ;;  %v5910_v10 = vpack.c.bf16 %v3572_v0, %v3571_v28  ;;  %5926 = vmatpush3.bf16.msra.mxu1 %v5925_v7  ;;  %v3676_v18 = vld [vmem:[%s7602_s11 + $0x60] sm:$0xff] }
0x1009   :  { %5903 = vmatprep.subr.bf16.mxu0 %v6391_v40  ;;  %5927 = vmatprep.subr.bf16.mxu1 %v6391_v40  ;;  %v5943_v41 = vpack.c.bf16 %v3677_v34, %v3676_v18 }
0x100c   :  { %5905 = vmatpush3.bf16.msra.mxu0 %v5904_v59  ;;  %v3678_v59 = vld [vmem:[%s7602_s11 + $0x70] sm:$0xff] }
0x100d   :  { %5906 = vmatprep.subr.bf16.mxu0 %v6391_v40  ;;  %v5946_v37 = vpack.c.bf16 %v3679_v36, %v3678_v59 }
0x1010   :  { %5908 = vmatpush3.bf16.msra.mxu0 %v5907_v16  ;;  %v3801_v16 = vld [vmem:[#allocation15] ss:$0 sm:$0xff] }
0x1011   :  { %5909 = vmatprep.subr.bf16.mxu0 %v6391_v40 }
0x1014   :  { %5911 = vmatpush3.bf16.msra.mxu0 %v5910_v10 }
0x1015   :  { %5912 = vmatprep.subr.bf16.mxu0 %v6391_v40 }
0x1018   :  { %5914 = vmatpush3.bf16.msra.mxu0 %v5913_v29 }
0x1019   :  { %5915 = vmatprep.subr.bf16.mxu0 %v6391_v40 }
0x101c   :  { %5917 = vmatpush3.bf16.msra.mxu0 %v5916_v33 }
0x101d   :  { %5918 = vmatprep.subr.bf16.mxu0 %v6391_v40 }
0x1020   :  { %5920 = vmatpush3.bf16.msra.mxu0 %v5919_v6 }
0x1021   :  { %5921 = vmatprep.subr.bf16.mxu0 %v6391_v40 }
0x1024   :  { %5923 = vmatpush3.bf16.msra.mxu0 %v5922_v63 }
0x10d9   :  { %v3468_v62 = vpop.f32.mrb[30].mxu0  ;;  %v3539_v5 = vpop.f32.mrb[46].mxu1 }
0x10da   :  { %v5978_v9 = vadd.f32 %v3468_v62, %v7222_v2  ;;  %v3470_v11 = vpop.f32.mrb[31].mxu0  ;;  %v4805_v3 = vpop.f32.mrb[47].mxu1  ;;  %v3557_v46 = vadd.f32 %v7230_v43, %v3539_v5  ;;  %v3666_v43 = vld [vmem:[%s7602_s11 + $0x10] sm:$0xff] }
0x10db   :  { %v5979_v17 = vadd.f32 %v3470_v11, %v7226_v20  ;;  %v5928_v1 = vpack.c.bf16 %v3667_v51, %v3666_v43 }
0x10dc   :  { %v3799_v58 = vmul.f32 -1.442695, %v5978_v9 }
0x10dd   :  { %v3800_v14 = vmul.f32 -1.442695, %v5979_v17  ;;  %5929 = vmatpush3.bf16.msra.mxu1 %v5928_v1 }
0x10de   :  { %6177 = vpow2.f32 %v3799_v58  ;;  %5930 = vmatprep.subr.bf16.mxu1 %v6391_v40 }
0x10df   :  { %6179 = vpow2.f32 %v3800_v14 }
0x10e1   :  { %5932 = vmatpush3.bf16.msra.mxu1 %v5931_v12 }
0x10e2   :  { %5933 = vmatprep.subr.bf16.mxu1 %v6391_v40 }
0x10e5   :  { %5935 = vmatpush3.bf16.msra.mxu1 %v5934_v30 }
0x10e6   :  { %5936 = vmatprep.subr.bf16.mxu1 %v6391_v40 }
0x10e8   :  { %v6178_v22 = vpop.eup %6177 }
0x10e9   :  { %v3547_v27 = vadd.f32 1.0, %v6178_v22  ;;  %v6180_v25 = vpop.eup %6179  ;;  %5938 = vmatpush3.bf16.msra.mxu1 %v5937_v61 }
0x10ea   :  { %v3554_v35 = vadd.f32 1.0, %v6180_v25  ;;  %5939 = vmatprep.subr.bf16.mxu1 %v6391_v40 }
0x10eb   :  { %6181 = vrcp.f32 %v3547_v27 }
0x10ec   :  { %6183 = vrcp.f32 %v3554_v35 }
0x10f5   :  { %v6182_v56 = vpop.eup %6181 }
0x10f6   :  { %v3558_v2 = vmul.f32 %v6182_v56, %v3557_v46  ;;  %v6184_v24 = vpop.eup %6183 }
0x10f7   :  { %v3561_v20 = vsub.f32 1.0, %v6184_v24  ;;  %v3563_v50 = vmul.f32 %v6184_v24, %v7509_v13  ;;  %v3674_v13 = vld [vmem:[%s7602_s11 + $0x50] sm:$0xff] }
0x10f8   :  { %v3559_v15 = vadd.f32 %v3558_v2, %v2155_v4  ;;  %v5940_v55 = vpack.c.bf16 %v3675_v21, %v3674_v13 }
0x10fa   :  { %6185 = vtanh.f32 %v3559_v15  ;;  %5941 = vmatpush3.bf16.msra.mxu1 %v5940_v55 }
0x10fb   :  { %5942 = vmatprep.subr.bf16.mxu1 %v6391_v40 }
0x10fe   :  { %5944 = vmatpush3.bf16.msra.mxu1 %v5943_v41 }
0x10ff   :  { %5945 = vmatprep.subr.bf16.mxu1 %v6391_v40 }
0x1102   :  { %5947 = vmatpush3.bf16.msra.mxu1 %v5946_v37 }
0x1104   :  { %v6186_v53 = vpop.eup %6185 }
0x1105   :  { %v3562_v57 = vmul.f32 %v6186_v53, %v3561_v20 }
0x1107   :  { %v3564_v39 = vadd.f32 %v3563_v50, %v3562_v57 }
0x1109   :  { %4839 = vmatmul.mubr.f32.vlgmr.msra.gmra.mrb[32].mxu0 %v3564_v39 }
0x11dc   :  { %v3654_v28 = vpop.f32.mrb[32].mxu0 }
0x11dd   :  { %v3655_v0 = vadd.f32 %v3801_v16, %v3654_v28  ;;  %v4840_v10 = vpop.f32.mrb[33].mxu0 }
0x11df   :  { %v3802_v38 = vmul.f32 -1.442695, %v3655_v0 }
0x11e1   :  { %6187 = vpow2.f32 %v3802_v38 }
0x11eb   :  { %v6188_v23 = vpop.eup %6187 }
0x11ec   :  { %v3661_v29 = vadd.f32 1.0, %v6188_v23 }
0x11ee   :  { %6189 = vrcp.f32 %v3661_v29 }
0x11f8   :  { %v6190_v32 = vpop.eup %6189 }
0x11f9   :  { %4874 = vmatmul.mubr.f32.vlgmr.msra.gmra.mrb[48].mxu1 %v6190_v32 }
0x12cc   :  { %v3753_v33 = vpop.f32.mrb[48].mxu1 }
0x12cd   :  { %v3754_v42 = vadd.f32 %v3803_v31, %v3753_v33  ;;  %v4875_v48 = vpop.f32.mrb[49].mxu1 }
0x12cf   :  { %3757 = vst [vmem:[%s7604_s13] sm:$0xff] %v3754_v42 }
0x12d0   :  { %3762 = vsyncpa [#allocation5], 1 }
0x12d1   :  { %3763 = vsyncpa [#allocation7], 1 }
0x12d2   :  { %3764 = vsyncpa [#allocation10], 1 }
0x12d3   :  { %3765 = vsyncpa [#allocation13], 1 }
0x12d4   :  { %3766 = vsyncpa [#allocation16], 1 }

</bundles_post_ra>
